<compile_context>
chip_gen: v7x
topology: tpu7x:2x2x1
jax: 0.10.0
libtpu: 0.0.40
codegen_flags: <defaults>
</compile_context>

<pallas_src>
import functools

import jax
import jax.numpy as jnp
from jax.experimental import pallas as pl
from jax.experimental.pallas import tpu as pltpu

LEAKY_SLOPE = 0.01                    # PyTorch nn.LeakyReLU default
_TP_MAX = 1024                        # folded rows per grid step (~1.5 MiB real HBM payload)
_NSPLIT = 4                           # aim for >= 4 grid steps (>= 2 per v7x TensorCore)
_VMEM_LIMIT = 48 * 1024 * 1024        # explicit scoped-VMEM budget (under v7x 64 MiB physical)


def _leaky_relu(x):
    return jnp.where(x > 0, x, LEAKY_SLOPE * x)


def _round_up(n, m):
    return ((n + m - 1) // m) * m


def _choose_fold(dim_hidden):
    # Fold enough rows that the output block approaches 128 lanes, while keeping the
    # replicated (fold*dh, fold*dh) hidden weight resident-friendly (<= 4 MiB).
    return max(1, min(32, 1024 // max(dim_hidden, 1)))


# ---------------------------------------------------------------------------
# Kernels (all operands are lane-dense folded 2-D tiles).
# NOTE: default matmul precision is kept (DMA-bound kernel); pass
# precision=jax.lax.Precision.HIGHEST here if exact f32 parity is ever needed.
# ---------------------------------------------------------------------------
def _mlp_fold_kernel_branch(main_ref, branch_ref, w0m_ref, w0b_ref, b0_ref,
                            w1_ref, b1_ref, wo_ref, bo_ref, out_ref):
    h = (jnp.dot(main_ref[...], w0m_ref[...], preferred_element_type=jnp.float32)
         + jnp.dot(branch_ref[...], w0b_ref[...], preferred_element_type=jnp.float32)
         + b0_ref[...])
    h = _leaky_relu(h)
    h = jnp.dot(h, w1_ref[...], preferred_element_type=jnp.float32) + b1_ref[...]
    h = _leaky_relu(h)
    out_ref[...] = (jnp.dot(h, wo_ref[...], preferred_element_type=jnp.float32)
                    + bo_ref[...]).astype(out_ref.dtype)


def _mlp_fold_kernel_nobranch(main_ref, w0_ref, b0_ref, w1_ref, b1_ref,
                              wo_ref, bo_ref, out_ref):
    h = jnp.dot(main_ref[...], w0_ref[...], preferred_element_type=jnp.float32) + b0_ref[...]
    h = _leaky_relu(h)
    h = jnp.dot(h, w1_ref[...], preferred_element_type=jnp.float32) + b1_ref[...]
    h = _leaky_relu(h)
    out_ref[...] = (jnp.dot(h, wo_ref[...], preferred_element_type=jnp.float32)
                    + bo_ref[...]).astype(out_ref.dtype)


# ---------------------------------------------------------------------------
# One-time weight packing: block-diagonal replication for the folded layout.
# Done once per model (weights are static across steps), not per forward call.
# ---------------------------------------------------------------------------
def _block_diag(w, fold):
    """(k, n) -> (fold*k, fold*n) with `fold` copies of w on the diagonal."""
    k, n = w.shape
    eye = jnp.eye(fold, dtype=w.dtype)
    return (eye[:, None, :, None] * w[None, :, None, :]).reshape(fold * k, fold * n)


def pack_params(params, *, dim_main, dim_branch, fold):
    w0, b0 = params["w0"], params["b0"]
    w1, b1 = params["w1"], params["b1"]
    wo, bo = params["wo"], params["bo"]
    packed = {
        "b0": jnp.tile(b0, (1, fold)),
        "w1": _block_diag(w1, fold), "b1": jnp.tile(b1, (1, fold)),
        "wo": _block_diag(wo, fold), "bo": jnp.tile(bo, (1, fold)),
    }
    if dim_branch:
        packed["w0m"] = _block_diag(w0[:dim_main], fold)   # main half of the concat-fused layer
        packed["w0b"] = _block_diag(w0[dim_main:], fold)   # branch half
    else:
        packed["w0"] = _block_diag(w0, fold)
    return packed


# ---------------------------------------------------------------------------
# Forward
# ---------------------------------------------------------------------------
@functools.partial(jax.jit, static_argnames=("dim_output", "fold"))
def mlp_net_forward(main_inputs, branch_inputs, packed, *, dim_output, fold):
    B, dim_main = main_inputs.shape
    has_branch = (branch_inputs is not None) and (branch_inputs.shape[-1] != 0)

    # Pad only to the fold factor (<= fold-1 rows); no copy when already aligned.
    # Tail grid blocks are masked partial blocks, so we never pad to a tile multiple.
    b_pad = _round_up(B, fold)

    def pad_rows(x):
        return x if b_pad == B else jnp.pad(x, ((0, b_pad - B), (0, 0)))

    p_rows = b_pad // fold  # folded (lane-dense) batch rows

    # Free row-major regrouping into the lane-dense folded layout.
    main_p = pad_rows(main_inputs).reshape(p_rows, fold * dim_main)

    # Batch tile over folded rows: multiple of 8 sublanes (or the full extent),
    # >= _NSPLIT grid steps when possible (v7x megacore), capped for VMEM.
    if p_rows <= 8:
        tp = p_rows
    else:
        tp = max(8, min(_TP_MAX, _round_up(pl.cdiv(p_rows, _NSPLIT), 8)))
    grid = (pl.cdiv(p_rows, tp),)

    def stream_spec(width):               # batch-tiled activation stream
        # TODO(synk): on v7x, pipeline_mode=pl.Buffered(3) here is a worthwhile sweep.
        return pl.BlockSpec((tp, width), lambda i: (i, 0))

    def resident(arr):                    # weights/biases resident in VMEM across steps
        return pl.BlockSpec(arr.shape, lambda i: (0, 0))

    out_width = fold * dim_output         # = 128 for fold=32, dim_output=4: lane-dense store
    out_shape = jax.ShapeDtypeStruct((p_rows, out_width), jnp.float32)
    out_spec = pl.BlockSpec((tp, out_width), lambda i: (i, 0))

    cparams = pltpu.CompilerParams(
        dimension_semantics=("parallel",),
        vmem_limit_bytes=_VMEM_LIMIT,
    )

    if has_branch:
        dim_branch = branch_inputs.shape[-1]
        branch_p = pad_rows(branch_inputs).reshape(p_rows, fold * dim_branch)
        out_p = pl.pallas_call(
            _mlp_fold_kernel_branch,
            out_shape=out_shape,
            grid=grid,
            in_specs=[
                stream_spec(fold * dim_main),
                stream_spec(fold * dim_branch),
                resident(packed["w0m"]), resident(packed["w0b"]), resident(packed["b0"]),
                resident(packed["w1"]), resident(packed["b1"]),
                resident(packed["wo"]), resident(packed["bo"]),
            ],
            out_specs=out_spec,
            compiler_params=cparams,
        )(main_p, branch_p, packed["w0m"], packed["w0b"], packed["b0"],
          packed["w1"], packed["b1"], packed["wo"], packed["bo"])
    else:
        out_p = pl.pallas_call(
            _mlp_fold_kernel_nobranch,
            out_shape=out_shape,
            grid=grid,
            in_specs=[
                stream_spec(fold * dim_main),
                resident(packed["w0"]), resident(packed["b0"]),
                resident(packed["w1"]), resident(packed["b1"]),
                resident(packed["wo"]), resident(packed["bo"]),
            ],
            out_specs=out_spec,
            compiler_params=cparams,
        )(main_p, packed["w0"], packed["b0"],
          packed["w1"], packed["b1"], packed["wo"], packed["bo"])

    out = out_p.reshape(b_pad, dim_output)   # free view back to batch-major
    return out[:B] if b_pad != B else out


# ---------------------------------------------------------------------------
# Init / reference (pure JAX) for correctness checks
# ---------------------------------------------------------------------------
def init_params(key, infeatures, dim_hidden, dim_output):
    """Deterministic init mimicking nn.Linear's U(-1/sqrt(fan_in), 1/sqrt(fan_in))."""
    def linear(k, fan_in, fan_out):
        kw, kb = jax.random.split(k)
        bound = 1.0 / jnp.sqrt(fan_in)
        w = jax.random.uniform(kw, (fan_in, fan_out), jnp.float32, -bound, bound)
        b = jax.random.uniform(kb, (1, fan_out), jnp.float32, -bound, bound)
        return w, b

    k0, k1, k2 = jax.random.split(key, 3)
    w0, b0 = linear(k0, infeatures, dim_hidden)
    w1, b1 = linear(k1, dim_hidden, dim_hidden)
    wo, bo = linear(k2, dim_hidden, dim_output)
    return {"w0": w0, "b0": b0, "w1": w1, "b1": b1, "wo": wo, "bo": bo}


def reference_forward(main_inputs, branch_inputs, params):
    x = main_inputs if branch_inputs is None else jnp.concatenate(
        [main_inputs, branch_inputs], axis=-1)
    h = _leaky_relu(x @ params["w0"] + params["b0"])
    h = _leaky_relu(h @ params["w1"] + params["b1"])
    return h @ params["wo"] + params["bo"]


if __name__ == "__main__":
    # Module config: dim_input=(6,), dim_branch=(2,), dim_output=4, dim_hidden=32,
    # num_hidden_layers=1, hidden_activation='leakyrelu', output_layer='identity'.
    dim_input, dim_branch, dim_output, dim_hidden = 6, 2, 4, 32
    infeatures = dim_input + dim_branch
    fold = _choose_fold(dim_hidden)          # -> 32 (output block = 128 lanes)

    key = jax.random.PRNGKey(0)
    k_data, k_params, k_params_nb = jax.random.split(key, 3)

    params = init_params(k_params, infeatures, dim_hidden, dim_output)
    packed = pack_params(params, dim_main=dim_input, dim_branch=dim_branch, fold=fold)

    ok = True
    # 8: single tiny folded row; 40: fold-padding path; 4096: multi-step grid path.
    for batch in (8, 40, 4096):
        km, kb = jax.random.split(jax.random.fold_in(k_data, batch))
        main_inputs = jax.random.normal(km, (batch, dim_input), jnp.float32)
        branch_inputs = jax.random.normal(kb, (batch, dim_branch), jnp.float32)

        out = mlp_net_forward(main_inputs, branch_inputs, packed,
                              dim_output=dim_output, fold=fold)
        out = jax.block_until_ready(out)

        ref = reference_forward(main_inputs, branch_inputs, params)
        ok &= (out.shape == (batch, dim_output))
        ok &= bool(jnp.allclose(out, ref, atol=1e-5, rtol=1e-4))

    # No-branch variant of the module (dim_branch[0] == 0 / branch_inputs=None).
    params_nb = init_params(k_params_nb, dim_input, dim_hidden, dim_output)
    packed_nb = pack_params(params_nb, dim_main=dim_input, dim_branch=0, fold=fold)
    main_nb = jax.random.normal(jax.random.fold_in(k_data, 7), (8, dim_input), jnp.float32)
    out_nb = jax.block_until_ready(
        mlp_net_forward(main_nb, None, packed_nb, dim_output=dim_output, fold=fold))
    ref_nb = reference_forward(main_nb, None, params_nb)
    ok &= bool(jnp.allclose(out_nb, ref_nb, atol=1e-5, rtol=1e-4))

    assert ok
    print("KERNEL_OK")
</pallas_src>

<mosaic_0001>
module attributes {stable_mosaic.version = 11 : i64} {
  func.func @_mlp_fold_kernel_branch(%arg0: i32, %arg1: memref<1x192xf32, #tpu.memory_space<vmem>>, %arg2: memref<1x64xf32, #tpu.memory_space<vmem>>, %arg3: memref<192x1024xf32, #tpu.memory_space<vmem>>, %arg4: memref<64x1024xf32, #tpu.memory_space<vmem>>, %arg5: memref<1x1024xf32, #tpu.memory_space<vmem>>, %arg6: memref<1024x1024xf32, #tpu.memory_space<vmem>>, %arg7: memref<1x1024xf32, #tpu.memory_space<vmem>>, %arg8: memref<1024x128xf32, #tpu.memory_space<vmem>>, %arg9: memref<1x128xf32, #tpu.memory_space<vmem>>, %arg10: memref<1x128xf32, #tpu.memory_space<vmem>>) attributes {dimension_semantics = [#tpu.dimension_semantics<parallel>], iteration_bounds = array<i64: 1>, scalar_prefetch = 0 : i64, scratch_operands = 0 : i64, tpu.core_type = #tpu.core_type<tc>, window_params = [{transform_indices = @transform_0, window_bounds = array<i64: 1, 192>}, {transform_indices = @transform_1, window_bounds = array<i64: 1, 64>}, {pipeline_mode = #tpu.pipeline_mode<synchronous>, transform_indices = @transform_2, window_bounds = array<i64: 192, 1024>}, {pipeline_mode = #tpu.pipeline_mode<synchronous>, transform_indices = @transform_3, window_bounds = array<i64: 64, 1024>}, {pipeline_mode = #tpu.pipeline_mode<synchronous>, transform_indices = @transform_4, window_bounds = array<i64: 1, 1024>}, {pipeline_mode = #tpu.pipeline_mode<synchronous>, transform_indices = @transform_5, window_bounds = array<i64: 1024, 1024>}, {pipeline_mode = #tpu.pipeline_mode<synchronous>, transform_indices = @transform_6, window_bounds = array<i64: 1, 1024>}, {pipeline_mode = #tpu.pipeline_mode<synchronous>, transform_indices = @transform_7, window_bounds = array<i64: 1024, 128>}, {pipeline_mode = #tpu.pipeline_mode<synchronous>, transform_indices = @transform_8, window_bounds = array<i64: 1, 128>}, {transform_indices = @transform_9, window_bounds = array<i64: 1, 128>}]} {
    %c0 = arith.constant 0 : index
    %c0_0 = arith.constant 0 : index
    %0 = vector.load %arg1[%c0, %c0_0] : memref<1x192xf32, #tpu.memory_space<vmem>>, vector<1x192xf32>
    %c0_1 = arith.constant 0 : index
    %c0_2 = arith.constant 0 : index
    %1 = vector.load %arg3[%c0_1, %c0_2] : memref<192x1024xf32, #tpu.memory_space<vmem>>, vector<192x1024xf32>
    %cst = arith.constant dense<0.000000e+00> : vector<1x1024xf32>
    %2 = tpu.matmul %0, %1, %cst {dimension_numbers = #tpu.dot_dimension_numbers<[1], [0], [0], [1], [0, 0, 1, 1], [], []>} : vector<1x192xf32>, vector<192x1024xf32>, vector<1x1024xf32> -> vector<1x1024xf32>
    %c0_3 = arith.constant 0 : index
    %c0_4 = arith.constant 0 : index
    %3 = vector.load %arg2[%c0_3, %c0_4] : memref<1x64xf32, #tpu.memory_space<vmem>>, vector<1x64xf32>
    %c0_5 = arith.constant 0 : index
    %c0_6 = arith.constant 0 : index
    %4 = vector.load %arg4[%c0_5, %c0_6] : memref<64x1024xf32, #tpu.memory_space<vmem>>, vector<64x1024xf32>
    %cst_7 = arith.constant dense<0.000000e+00> : vector<1x1024xf32>
    %5 = tpu.matmul %3, %4, %cst_7 {dimension_numbers = #tpu.dot_dimension_numbers<[1], [0], [0], [1], [0, 0, 1, 1], [], []>} : vector<1x64xf32>, vector<64x1024xf32>, vector<1x1024xf32> -> vector<1x1024xf32>
    %6 = arith.addf %2, %5 : vector<1x1024xf32>
    %c0_8 = arith.constant 0 : index
    %c0_9 = arith.constant 0 : index
    %7 = vector.load %arg5[%c0_8, %c0_9] : memref<1x1024xf32, #tpu.memory_space<vmem>>, vector<1x1024xf32>
    %8 = arith.addf %6, %7 : vector<1x1024xf32>
    %cst_10 = arith.constant 0.000000e+00 : f32
    %9 = vector.broadcast %cst_10 : f32 to vector<1x1024xf32>
    %10 = arith.cmpf ogt, %8, %9 : vector<1x1024xf32>
    %cst_11 = arith.constant 0.00999999977 : f32
    %11 = vector.broadcast %cst_11 : f32 to vector<1x1024xf32>
    %12 = arith.mulf %11, %8 : vector<1x1024xf32>
    %13 = arith.select %10, %8, %12 : vector<1x1024xi1>, vector<1x1024xf32>
    %c0_12 = arith.constant 0 : index
    %c0_13 = arith.constant 0 : index
    %14 = vector.load %arg6[%c0_12, %c0_13] : memref<1024x1024xf32, #tpu.memory_space<vmem>>, vector<1024x1024xf32>
    %cst_14 = arith.constant dense<0.000000e+00> : vector<1x1024xf32>
    %15 = tpu.matmul %13, %14, %cst_14 {dimension_numbers = #tpu.dot_dimension_numbers<[1], [0], [0], [1], [0, 0, 1, 1], [], []>} : vector<1x1024xf32>, vector<1024x1024xf32>, vector<1x1024xf32> -> vector<1x1024xf32>
    %c0_15 = arith.constant 0 : index
    %c0_16 = arith.constant 0 : index
    %16 = vector.load %arg7[%c0_15, %c0_16] : memref<1x1024xf32, #tpu.memory_space<vmem>>, vector<1x1024xf32>
    %17 = arith.addf %15, %16 : vector<1x1024xf32>
    %cst_17 = arith.constant 0.000000e+00 : f32
    %18 = vector.broadcast %cst_17 : f32 to vector<1x1024xf32>
    %19 = arith.cmpf ogt, %17, %18 : vector<1x1024xf32>
    %cst_18 = arith.constant 0.00999999977 : f32
    %20 = vector.broadcast %cst_18 : f32 to vector<1x1024xf32>
    %21 = arith.mulf %20, %17 : vector<1x1024xf32>
    %22 = arith.select %19, %17, %21 : vector<1x1024xi1>, vector<1x1024xf32>
    %c0_19 = arith.constant 0 : index
    %c0_20 = arith.constant 0 : index
    %23 = vector.load %arg8[%c0_19, %c0_20] : memref<1024x128xf32, #tpu.memory_space<vmem>>, vector<1024x128xf32>
    %cst_21 = arith.constant dense<0.000000e+00> : vector<1x128xf32>
    %24 = tpu.matmul %22, %23, %cst_21 {dimension_numbers = #tpu.dot_dimension_numbers<[1], [0], [0], [1], [0, 0, 1, 1], [], []>} : vector<1x1024xf32>, vector<1024x128xf32>, vector<1x128xf32> -> vector<1x128xf32>
    %c0_22 = arith.constant 0 : index
    %c0_23 = arith.constant 0 : index
    %25 = vector.load %arg9[%c0_22, %c0_23] : memref<1x128xf32, #tpu.memory_space<vmem>>, vector<1x128xf32>
    %26 = arith.addf %24, %25 : vector<1x128xf32>
    %c0_24 = arith.constant 0 : index
    %c0_25 = arith.constant 0 : index
    %27 = vector.load %arg10[%c0_24, %c0_25] : memref<1x128xf32, #tpu.memory_space<vmem>>, vector<1x128xf32>
    tpu.vector_store %arg10[%c0_24, %c0_25], %26 {strides = array<i32>} : memref<1x128xf32, #tpu.memory_space<vmem>>, vector<1x128xf32>,
    return
  }
  func.func @transform_0(%arg0: i32) -> (i32, i32) {
    %c0_i32 = arith.constant 0 : i32
    %c0_i32_0 = arith.constant 0 : i32
    return %arg0, %c0_i32 : i32, i32
  }
  func.func @transform_1(%arg0: i32) -> (i32, i32) {
    %c0_i32 = arith.constant 0 : i32
    %c0_i32_0 = arith.constant 0 : i32
    return %arg0, %c0_i32 : i32, i32
  }
  func.func @transform_2(%arg0: i32) -> (i32, i32) {
    %c0_i32 = arith.constant 0 : i32
    %c0_i32_0 = arith.constant 0 : i32
    %c0_i32_1 = arith.constant 0 : i32
    return %c0_i32, %c0_i32_0 : i32, i32
  }
  func.func @transform_3(%arg0: i32) -> (i32, i32) {
    %c0_i32 = arith.constant 0 : i32
    %c0_i32_0 = arith.constant 0 : i32
    %c0_i32_1 = arith.constant 0 : i32
    return %c0_i32, %c0_i32_0 : i32, i32
  }
  func.func @transform_4(%arg0: i32) -> (i32, i32) {
    %c0_i32 = arith.constant 0 : i32
    %c0_i32_0 = arith.constant 0 : i32
    %c0_i32_1 = arith.constant 0 : i32
    return %c0_i32, %c0_i32_0 : i32, i32
  }
  func.func @transform_5(%arg0: i32) -> (i32, i32) {
    %c0_i32 = arith.constant 0 : i32
    %c0_i32_0 = arith.constant 0 : i32
    %c0_i32_1 = arith.constant 0 : i32
    return %c0_i32, %c0_i32_0 : i32, i32
  }
  func.func @transform_6(%arg0: i32) -> (i32, i32) {
    %c0_i32 = arith.constant 0 : i32
    %c0_i32_0 = arith.constant 0 : i32
    %c0_i32_1 = arith.constant 0 : i32
    return %c0_i32, %c0_i32_0 : i32, i32
  }
  func.func @transform_7(%arg0: i32) -> (i32, i32) {
    %c0_i32 = arith.constant 0 : i32
    %c0_i32_0 = arith.constant 0 : i32
    %c0_i32_1 = arith.constant 0 : i32
    return %c0_i32, %c0_i32_0 : i32, i32
  }
  func.func @transform_8(%arg0: i32) -> (i32, i32) {
    %c0_i32 = arith.constant 0 : i32
    %c0_i32_0 = arith.constant 0 : i32
    %c0_i32_1 = arith.constant 0 : i32
    return %c0_i32, %c0_i32_0 : i32, i32
  }
  func.func @transform_9(%arg0: i32) -> (i32, i32) {
    %c0_i32 = arith.constant 0 : i32
    %c0_i32_0 = arith.constant 0 : i32
    return %arg0, %c0_i32 : i32, i32
  }
}

</mosaic_0001>

<bundles_post_ra>
// kernel: mlp_net_forward.1
= control target key start
LH: loop header
LB: loop body
LE: loop exit
PB: predicated region body
PF: predicated region fallthrough
CT: control target
= control target key end

     0   :  { %14 = vsyncpa [#allocation3], 0  ;;  %s5813_s0 = inlined_call_operand.vmem [shape: f32[1,192], index: 0, kind: input, shape index: {}]   ;;  %s5814_s1 = inlined_call_operand.vmem [shape: f32[1,64], index: 1, kind: input, shape index: {}]   ;;  %s5815_s2 = inlined_call_operand.hbm [shape: f32[192,1024], index: 2, kind: input, shape index: {}]   ;;  %s5816_s3 = inlined_call_operand.hbm [shape: f32[64,1024], index: 3, kind: input, shape index: {}]   ;;  %s5817_s4 = inlined_call_operand.hbm [shape: f32[1,1024], index: 4, kind: input, shape index: {}]   ;;  %s5818_s5 = inlined_call_operand.hbm [shape: f32[1024,1024], index: 5, kind: input, shape index: {}]   ;;  %s5819_s6 = inlined_call_operand.hbm [shape: f32[1,1024], index: 6, kind: input, shape index: {}]   ;;  %s5820_s7 = inlined_call_operand.hbm [shape: f32[1024,128], index: 7, kind: input, shape index: {}]   ;;  %s5821_s8 = inlined_call_operand.hbm [shape: f32[1,128], index: 8, kind: input, shape index: {}]   ;;  %s5822_s9 = inlined_call_operand.vmem [shape: f32[1,128], index: 9, kind: output, shape index: {}]  }
   0x1   :  { %15 = vsyncpa [#allocation5], 0 }
   0x2   :  { %16 = vsyncpa [#allocation8], 0 }
   0x3   :  { %17 = vsyncpa [#allocation11], 0  ;;  %s5451_s30 = smov [#allocation4]   ;;  %s5452_s11 = smov [#allocation7]  }
   0x4   :  { %s39_s10 = sshll.u32 %s5451_s30, 4  ;;  %s61_s12 = sshll.u32 %s5452_s11, 4  ;;  %s40_s10 = int_to_ptr.vmem [resolvable:$true] %s39_s10  ;;  %s5513_s12 = int_to_ptr.vmem [resolvable:$true] %s61_s12 }
   0x5   :  { %s5289_s15 = scalar_lea.hbm %s5816_s3, 8192 }
   0x6   :  { %p5290_p0 = scmp.ne.s32.totalorder %s5816_s3, %s5289_s15  ;;  %p5293_p1 = scmp.lt.u32.totalorder %s5289_s15, %s5816_s3 }
   0x8   :  { %p5295_p2 = pnand %p5293_p1, %p5290_p0 }
   0xa   :  { %5298 = shalt.err (!%p5295_p2)
}
   0xb   :  { %s5299_s20 = scalar_lea.vmem %s40_s10, 8192  ;;  %p5304_p4 = scmp.lt.s32.totalorder %s40_s10, %s40_s10 }
   0xc   :  { %p5300_p3 = scmp.ne.s32.totalorder %s40_s10, %s5299_s20  ;;  %p5305_p5 = scmp.lt.s32.totalorder %s5299_s20, %s5299_s20 }
   0xe   :  { %p5306_p6 = por %p5305_p5, %p5304_p4 }
  0x10   :  { %p5307_p7 = pnand %p5306_p6, %p5300_p3 }
  0x12   :  { %5310 = shalt.err (!%p5307_p7)
}
  0x13   :  { %s5453_s21 = smov 1024   ;;  %s5454_s22 = smov 64  }
  0x14   :  { %45 = dma.hbm_to_vmem [thread:$0]  %s5816_s3, 8192, %s40_s10, [#allocation5], %s5453_s21, %s5453_s21, %s5454_s22  }
  0x15   :  { %s5311_s27 = scalar_lea.hbm %s5818_s5, 131072 }
  0x16   :  { %p5312_p8 = scmp.ne.s32.totalorder %s5818_s5, %s5311_s27  ;;  %p5315_p9 = scmp.lt.u32.totalorder %s5311_s27, %s5818_s5 }
  0x18   :  { %p5317_p10 = pnand %p5315_p9, %p5312_p8 }
  0x1a   :  { %5320 = shalt.err (!%p5317_p10)
}
  0x1b   :  { %s5321_s13 = scalar_lea.vmem %s5513_s12, 131072  ;;  %p5326_p12 = scmp.lt.s32.totalorder %s5513_s12, %s5513_s12 }
  0x1c   :  { %p5322_p11 = scmp.ne.s32.totalorder %s5513_s12, %s5321_s13  ;;  %p5327_p13 = scmp.lt.s32.totalorder %s5321_s13, %s5321_s13 }
  0x1e   :  { %p5328_p0 = por %p5327_p13, %p5326_p12 }
  0x20   :  { %p5329_p1 = pnand %p5328_p0, %p5322_p11 }
  0x22   :  { %5332 = shalt.err (!%p5329_p1)
}
  0x23   :  { %67 = dma.hbm_to_vmem [thread:$0]  %s5818_s5, 131072, %s5513_s12, [#allocation8], %s5453_s21, %s5453_s21, %s5454_s22  }
  0x24   :  { %s5455_s14 = smov [#allocation10]   ;;  %s5333_s18 = scalar_lea.hbm %s5820_s7, 16384 }
  0x25   :  { %s83_s15 = sshll.u32 %s5455_s14, 4  ;;  %p5334_p2 = scmp.ne.s32.totalorder %s5820_s7, %s5333_s18  ;;  %s84_s15 = int_to_ptr.vmem [resolvable:$true] %s83_s15 }
  0x26   :  { %p5337_p3 = scmp.lt.u32.totalorder %s5333_s18, %s5820_s7 }
  0x28   :  { %p5339_p4 = pnand %p5337_p3, %p5334_p2 }
  0x2a   :  { %5342 = shalt.err (!%p5339_p4)
}
  0x2b   :  { %s5343_s25 = scalar_lea.vmem %s84_s15, 16384  ;;  %p5348_p6 = scmp.lt.s32.totalorder %s84_s15, %s84_s15 }
  0x2c   :  { %p5344_p5 = scmp.ne.s32.totalorder %s84_s15, %s5343_s25  ;;  %p5349_p7 = scmp.lt.s32.totalorder %s5343_s25, %s5343_s25 }
  0x2e   :  { %p5350_p8 = por %p5349_p7, %p5348_p6 }
  0x30   :  { %p5351_p9 = pnand %p5350_p8, %p5344_p5 }
  0x32   :  { %5354 = shalt.err (!%p5351_p9)
}
  0x33   :  { %s5456_s5 = smov 128   ;;  %s5457_s12 = smov 8  }
  0x34   :  { %89 = dma.hbm_to_vmem [thread:$0]  %s5820_s7, 16384, %s84_s15, [#allocation11], %s5456_s5, %s5456_s5, %s5457_s12  }
  0x35   :  { %s5458_s28 = smov [#allocation2]   ;;  %s5459_s30 = smov [#allocation6]  }
  0x36   :  { %s27_s29 = sshll.u32 %s5458_s28, 4  ;;  %s52_s11 = sshll.u32 %s5459_s30, 4  ;;  %s28_s29 = int_to_ptr.vmem [resolvable:$true] %s27_s29  ;;  %s53_s11 = int_to_ptr.vmem [resolvable:$true] %s52_s11 }
  0x37   :  { %s5355_s10 = scalar_lea.hbm %s5815_s2, 24576 }
  0x38   :  { %p5356_p10 = scmp.ne.s32.totalorder %s5815_s2, %s5355_s10  ;;  %p5359_p11 = scmp.lt.u32.totalorder %s5355_s10, %s5815_s2 }
  0x3a   :  { %p5361_p12 = pnand %p5359_p11, %p5356_p10 }
  0x3c   :  { %5364 = shalt.err (!%p5361_p12)
}
  0x3d   :  { %s5365_s7 = scalar_lea.vmem %s28_s29, 24576  ;;  %p5370_p0 = scmp.lt.s32.totalorder %s28_s29, %s28_s29 }
  0x3e   :  { %p5366_p13 = scmp.ne.s32.totalorder %s28_s29, %s5365_s7  ;;  %p5371_p1 = scmp.lt.s32.totalorder %s5365_s7, %s5365_s7 }
  0x40   :  { %p5372_p2 = por %p5371_p1, %p5370_p0 }
  0x42   :  { %p5373_p3 = pnand %p5372_p2, %p5366_p13 }
  0x44   :  { %5376 = shalt.err (!%p5373_p3)
}
  0x45   :  { %33 = dma.hbm_to_vmem [thread:$0]  %s5815_s2, 24576, %s28_s29, [#allocation3], %s5453_s21, %s5453_s21, %s5454_s22  }
  0x46   :  { %s5377_s24 = scalar_lea.hbm %s5817_s4, 128 }
  0x47   :  { %p5378_p4 = scmp.ne.s32.totalorder %s5817_s4, %s5377_s24  ;;  %p5381_p5 = scmp.lt.u32.totalorder %s5377_s24, %s5817_s4 }
  0x49   :  { %p5383_p6 = pnand %p5381_p5, %p5378_p4 }
  0x4b   :  { %5386 = shalt.err (!%p5383_p6)
}
  0x4c   :  { %s5387_s27 = scalar_lea.vmem %s53_s11, 128  ;;  %p5392_p8 = scmp.lt.s32.totalorder %s53_s11, %s53_s11 }
  0x4d   :  { %p5388_p7 = scmp.ne.s32.totalorder %s53_s11, %s5387_s27  ;;  %p5393_p9 = scmp.lt.s32.totalorder %s5387_s27, %s5387_s27 }
  0x4f   :  { %p5394_p10 = por %p5393_p9, %p5392_p8 }
  0x51   :  { %p5395_p11 = pnand %p5394_p10, %p5388_p7 }
  0x53   :  { %5398 = shalt.err (!%p5395_p11)
}
  0x54   :  { %55 = dma.hbm_to_vmem [thread:$0]  %s5817_s4, 128, %s53_s11, [#allocation5]  }
  0x55   :  { %s5460_s22 = smov [#allocation9]   ;;  %s5461_s29 = smov [#allocation12]  }
  0x56   :  { %s74_s28 = sshll.u32 %s5460_s22, 4  ;;  %s96_s30 = sshll.u32 %s5461_s29, 4  ;;  %s75_s28 = int_to_ptr.vmem [resolvable:$true] %s74_s28  ;;  %s97_s30 = int_to_ptr.vmem [resolvable:$true] %s96_s30 }
  0x57   :  { %s5399_s10 = scalar_lea.hbm %s5819_s6, 128 }
  0x58   :  { %p5400_p12 = scmp.ne.s32.totalorder %s5819_s6, %s5399_s10  ;;  %p5403_p13 = scmp.lt.u32.totalorder %s5399_s10, %s5819_s6 }
  0x5a   :  { %p5405_p0 = pnand %p5403_p13, %p5400_p12 }
  0x5c   :  { %5408 = shalt.err (!%p5405_p0)
}
  0x5d   :  { %s5409_s4 = scalar_lea.vmem %s75_s28, 128  ;;  %p5414_p2 = scmp.lt.s32.totalorder %s75_s28, %s75_s28 }
  0x5e   :  { %p5410_p1 = scmp.ne.s32.totalorder %s75_s28, %s5409_s4  ;;  %p5415_p3 = scmp.lt.s32.totalorder %s5409_s4, %s5409_s4 }
  0x60   :  { %p5416_p4 = por %p5415_p3, %p5414_p2 }
  0x62   :  { %p5417_p5 = pnand %p5416_p4, %p5410_p1 }
  0x64   :  { %5420 = shalt.err (!%p5417_p5)
}
  0x65   :  { %77 = dma.hbm_to_vmem [thread:$0]  %s5819_s6, 128, %s75_s28, [#allocation8]  }
  0x66   :  { %s5421_s20 = scalar_lea.hbm %s5821_s8, 16 }
  0x67   :  { %p5422_p6 = scmp.ne.s32.totalorder %s5821_s8, %s5421_s20  ;;  %p5425_p7 = scmp.lt.u32.totalorder %s5421_s20, %s5821_s8 }
  0x69   :  { %p5427_p8 = pnand %p5425_p7, %p5422_p6 }
  0x6b   :  { %5430 = shalt.err (!%p5427_p8)
}
  0x6c   :  { %s5431_s12 = scalar_lea.vmem %s97_s30, 16  ;;  %s5435_s26 = scalar_lea.vmem %s97_s30, 32 }
  0x6d   :  { %p5432_p9 = scmp.ne.s32.totalorder %s97_s30, %s5431_s12  ;;  %p5436_p10 = scmp.lt.s32.totalorder %s97_s30, %s97_s30 }
  0x6e   :  { %p5437_p11 = scmp.lt.s32.totalorder %s5435_s26, %s5431_s12 }
  0x70   :  { %p5438_p12 = por %p5437_p11, %p5436_p10 }
  0x72   :  { %p5439_p13 = pnand %p5438_p12, %p5432_p9 }
  0x74   :  { %5442 = shalt.err (!%p5439_p13)
}
  0x75   :  { %99 = dma.hbm_to_vmem [thread:$0]  %s5821_s8, 16, %s97_s30, [#allocation11]  }
  0x76   :  { %5443 = dma.done.wait [#allocation3], 24576  }
  0x77   :  { %5444 = vsyncadd [#allocation3], 4294942720 }
  0x78   :  { %5445 = dma.done.wait [#allocation5], 8320  }
  0x79   :  { %5446 = vsyncadd [#allocation5], 4294958976 }
  0x7a   :  { %5447 = dma.done.wait [#allocation8], 131200  }
  0x7b   :  { %5448 = vsyncadd [#allocation8], 4294836096 }
  0x7c   :  { %5449 = dma.done.wait [#allocation11], 16400  }
  0x7d   :  { %5450 = vsyncadd [#allocation11], 4294950896  ;;  %v5462_v0 = vmov 0.0   ;;  %v316_v1 = vld [vmem:[#allocation4 + $0x8] sm:$0xff]  ;;  %v318_v3 = vld [vmem:[#allocation4 + $0x18] sm:$0xff]  ;;  %vm379_vm0 = vcmask 523264  }
  0x7e   :  { %447 = vmatprep.mubr.f32.mxu0 %v5462_v0  ;;  %518 = vmatprep.mubr.f32.mxu1 %v5462_v0  ;;  %v324_v2 = vld [vmem:[#allocation4 + $0x48] sm:$0xff]  ;;  %v326_v5 = vld [vmem:[#allocation4 + $0x58] sm:$0xff]  ;;  %v315_v6 = vld [vmem:[#allocation4] sm:$0xff] }
  0x7f   :  { %v3829_v4 = vpack.c.bf16 %v324_v2, %v316_v1  ;;  %v323_v7 = vld [vmem:[#allocation4 + $0x40] sm:$0xff]  ;;  %v3845_v8 = vpack.c.bf16 %v326_v5, %v318_v3  ;;  %v317_v10 = vld [vmem:[#allocation4 + $0x10] sm:$0xff]  ;;  %v332_v12 = vld [vmem:[#allocation4 + $0x88] sm:$0xff] }
  0x80   :  { %v3831_v9 = vpack.c.bf16 %v323_v7, %v315_v6  ;;  %v325_v11 = vld [vmem:[#allocation4 + $0x50] sm:$0xff]  ;;  %v340_v14 = vld [vmem:[#allocation4 + $0xc8] sm:$0xff]  ;;  %v334_v15 = vld [vmem:[#allocation4 + $0x98] sm:$0xff] }
  0x81   :  { %3830 = vmatprep.subr.bf16.mxu0 %v3829_v4  ;;  %v3847_v13 = vpack.c.bf16 %v325_v11, %v317_v10  ;;  %v342_v16 = vld [vmem:[#allocation4 + $0xd8] sm:$0xff]  ;;  %3846 = vmatprep.subr.bf16.mxu1 %v3845_v8  ;;  %v3833_v17 = vpack.c.bf16 %v340_v14, %v332_v12  ;;  %v331_v19 = vld [vmem:[#allocation4 + $0x80] sm:$0xff]  ;;  %v333_v21 = vld [vmem:[#allocation4 + $0x90] sm:$0xff] }
  0x82   :  { %3832 = vmatpush1.bf16.msra.mxu0 %v3831_v9  ;;  %v3849_v18 = vpack.c.bf16 %v342_v16, %v334_v15  ;;  %v339_v20 = vld [vmem:[#allocation4 + $0xc0] sm:$0xff]  ;;  %v341_v23 = vld [vmem:[#allocation4 + $0xd0] sm:$0xff]  ;;  %v348_v24 = vld [vmem:[#allocation4 + $0x108] sm:$0xff] }
  0x83   :  { %3848 = vmatpush1.bf16.msra.mxu1 %v3847_v13  ;;  %v3835_v22 = vpack.c.bf16 %v339_v20, %v331_v19  ;;  %v356_v25 = vld [vmem:[#allocation4 + $0x148] sm:$0xff]  ;;  %3834 = vmatprep.subr.bf16.mxu0 %v3833_v17  ;;  %v3851_v26 = vpack.c.bf16 %v341_v23, %v333_v21  ;;  %v350_v28 = vld [vmem:[#allocation4 + $0x118] sm:$0xff]  ;;  %v347_v30 = vld [vmem:[#allocation4 + $0x100] sm:$0xff] }
  0x84   :  { %3850 = vmatprep.subr.bf16.mxu1 %v3849_v18  ;;  %v3837_v27 = vpack.c.bf16 %v356_v25, %v348_v24  ;;  %v358_v29 = vld [vmem:[#allocation4 + $0x158] sm:$0xff]  ;;  %v355_v32 = vld [vmem:[#allocation4 + $0x140] sm:$0xff]  ;;  %v349_v33 = vld [vmem:[#allocation4 + $0x110] sm:$0xff] }
  0x85   :  { %v3853_v31 = vpack.c.bf16 %v358_v29, %v350_v28  ;;  %v357_v34 = vld [vmem:[#allocation4 + $0x150] sm:$0xff]  ;;  %v3839_v35 = vpack.c.bf16 %v355_v32, %v347_v30  ;;  %v364_v36 = vld [vmem:[#allocation4 + $0x188] sm:$0xff]  ;;  %v366_v38 = vld [vmem:[#allocation4 + $0x198] sm:$0xff] }
  0x86   :  { %3836 = vmatpush1.bf16.msra.mxu0 %v3835_v22  ;;  %v372_v37 = vld [vmem:[#allocation4 + $0x1c8] sm:$0xff]  ;;  %v3855_v39 = vpack.c.bf16 %v357_v34, %v349_v33  ;;  %v374_v41 = vld [vmem:[#allocation4 + $0x1d8] sm:$0xff]  ;;  %v363_v42 = vld [vmem:[#allocation4 + $0x180] sm:$0xff] }
  0x87   :  { %3852 = vmatpush1.bf16.msra.mxu1 %v3851_v26  ;;  %3838 = vmatprep.subr.bf16.mxu0 %v3837_v27  ;;  %v3841_v40 = vpack.c.bf16 %v372_v37, %v364_v36  ;;  %v371_v43 = vld [vmem:[#allocation4 + $0x1c0] sm:$0xff]  ;;  %v3857_v44 = vpack.c.bf16 %v374_v41, %v366_v38  ;;  %v365_v45 = vld [vmem:[#allocation4 + $0x190] sm:$0xff]  ;;  %v320_v47 = vld [vmem:[#allocation4 + $0x28] sm:$0xff] }
  0x88   :  { %3854 = vmatprep.subr.bf16.mxu1 %v3853_v31  ;;  %v373_v46 = vld [vmem:[#allocation4 + $0x1d0] sm:$0xff]  ;;  %v328_v48 = vld [vmem:[#allocation4 + $0x68] sm:$0xff]  ;;  %v322_v49 = vld [vmem:[#allocation4 + $0x38] sm:$0xff]  ;;  %v3843_v51 = vpack.c.bf16 %v371_v43, %v363_v42 }
  0x89   :  { %v330_v50 = vld [vmem:[#allocation4 + $0x78] sm:$0xff]  ;;  %v3859_v52 = vpack.c.bf16 %v373_v46, %v365_v45  ;;  %v3861_v53 = vpack.c.bf16 %v328_v48, %v320_v47  ;;  %v319_v54 = vld [vmem:[#allocation4 + $0x20] sm:$0xff]  ;;  %v321_v56 = vld [vmem:[#allocation4 + $0x30] sm:$0xff] }
  0x8a   :  { %3840 = vmatpush1.bf16.msra.mxu0 %v3839_v35  ;;  %v327_v55 = vld [vmem:[#allocation4 + $0x60] sm:$0xff]  ;;  %v3877_v57 = vpack.c.bf16 %v330_v50, %v322_v49  ;;  %v329_v58 = vld [vmem:[#allocation4 + $0x70] sm:$0xff]  ;;  %v336_v59 = vld [vmem:[#allocation4 + $0xa8] sm:$0xff] }
  0x8b   :  { %3856 = vmatpush1.bf16.msra.mxu1 %v3855_v39  ;;  %3842 = vmatprep.subr.bf16.mxu0 %v3841_v40  ;;  %v344_v60 = vld [vmem:[#allocation4 + $0xe8] sm:$0xff]  ;;  %v338_v61 = vld [vmem:[#allocation4 + $0xb8] sm:$0xff]  ;;  %v5618_v63 = vld [vmem:[%s5814_s1] sm:$0x1]  ;;  %v3863_v1 = vpack.c.bf16 %v327_v55, %v319_v54  ;;  %v3879_v2 = vpack.c.bf16 %v329_v58, %v321_v56 }
  0x8c   :  { %3858 = vmatprep.subr.bf16.mxu1 %v3857_v44  ;;  %v346_v62 = vld [vmem:[#allocation4 + $0xf8] sm:$0xff]  ;;  %v3865_v3 = vpack.c.bf16 %v344_v60, %v336_v59  ;;  %v335_v4 = vld [vmem:[#allocation4 + $0xa0] sm:$0xff]  ;;  %v337_v6 = vld [vmem:[#allocation4 + $0xb0] sm:$0xff] }
  0x8d   :  { %v343_v5 = vld [vmem:[#allocation4 + $0xe0] sm:$0xff]  ;;  %v3881_v7 = vpack.c.bf16 %v346_v62, %v338_v61  ;;  %v345_v8 = vld [vmem:[#allocation4 + $0xf0] sm:$0xff]  ;;  %v352_v9 = vld [vmem:[#allocation4 + $0x128] sm:$0xff] }
  0x8e   :  { %3844 = vmatpush1.bf16.msra.mxu0 %v3843_v51  ;;  %v360_v10 = vld [vmem:[#allocation4 + $0x168] sm:$0xff]  ;;  %v354_v11 = vld [vmem:[#allocation4 + $0x138] sm:$0xff]  ;;  %v3867_v13 = vpack.c.bf16 %v343_v5, %v335_v4  ;;  %v3883_v14 = vpack.c.bf16 %v345_v8, %v337_v6  ;;  %v351_v16 = vld [vmem:[#allocation4 + $0x120] sm:$0xff] }
  0x8f   :  { %3860 = vmatpush1.bf16.msra.mxu1 %v3859_v52  ;;  %3862 = vmatprep.subr.bf16.mxu0 %v3861_v53  ;;  %v362_v12 = vld [vmem:[#allocation4 + $0x178] sm:$0xff]  ;;  %v3869_v15 = vpack.c.bf16 %v360_v10, %v352_v9  ;;  %v359_v17 = vld [vmem:[#allocation4 + $0x160] sm:$0xff]  ;;  %v353_v18 = vld [vmem:[#allocation4 + $0x130] sm:$0xff] }
  0x90   :  { %3878 = vmatprep.subr.bf16.mxu1 %v3877_v57  ;;  %v3885_v19 = vpack.c.bf16 %v362_v12, %v354_v11  ;;  %v361_v20 = vld [vmem:[#allocation4 + $0x170] sm:$0xff]  ;;  %v368_v21 = vld [vmem:[#allocation4 + $0x1a8] sm:$0xff]  ;;  %v370_v23 = vld [vmem:[#allocation4 + $0x1b8] sm:$0xff]  ;;  %v3871_v25 = vpack.c.bf16 %v359_v17, %v351_v16 }
  0x91   :  { %3681 = vmatmul.mubr.msk.f32.vlgmr.msra.gmra.mrb[0].mxu0 %vm379_vm0, %v5618_v63  ;;  %v376_v22 = vld [vmem:[#allocation4 + $0x1e8] sm:$0xff]  ;;  %v378_v24 = vld [vmem:[#allocation4 + $0x1f8] sm:$0xff]  ;;  %v3887_v26 = vpack.c.bf16 %v361_v20, %v353_v18  ;;  %v367_v28 = vld [vmem:[#allocation4 + $0x1a0] sm:$0xff] }
  0x92   :  { %3682 = vmatmul.mubr.msk.f32.vlgmr.msra.gmra.mrb[0].mxu1 %vm379_vm0, %v5618_v63  ;;  %3864 = vmatpush1.bf16.msra.mxu0 %v3863_v1  ;;  %v3873_v27 = vpack.c.bf16 %v376_v22, %v368_v21  ;;  %v375_v29 = vld [vmem:[#allocation4 + $0x1e0] sm:$0xff]  ;;  %v369_v30 = vld [vmem:[#allocation4 + $0x1b0] sm:$0xff]  ;;  %v3889_v31 = vpack.c.bf16 %v378_v24, %v370_v23  ;;  %v123_v33 = vld [vmem:[#allocation2 + $0x8] sm:$0xff] }
  0x93   :  { %3880 = vmatpush1.bf16.msra.mxu1 %v3879_v2  ;;  %3866 = vmatprep.subr.bf16.mxu0 %v3865_v3  ;;  %v377_v32 = vld [vmem:[#allocation4 + $0x1f0] sm:$0xff]  ;;  %v131_v34 = vld [vmem:[#allocation2 + $0x48] sm:$0xff]  ;;  %v125_v35 = vld [vmem:[#allocation2 + $0x18] sm:$0xff]  ;;  %v3875_v37 = vpack.c.bf16 %v375_v29, %v367_v28 }
  0x94   :  { %3882 = vmatprep.subr.bf16.mxu1 %v3881_v7  ;;  %589 = vmatprep.mubr.f32.mxu0 %v5462_v0  ;;  %v133_v36 = vld [vmem:[#allocation2 + $0x58] sm:$0xff]  ;;  %v3893_v38 = vpack.c.bf16 %v131_v34, %v123_v33  ;;  %v122_v39 = vld [vmem:[#allocation2] sm:$0xff]  ;;  %v124_v41 = vld [vmem:[#allocation2 + $0x10] sm:$0xff] }
  0x95   :  { %660 = vmatprep.mubr.f32.mxu1 %v5462_v0  ;;  %v3891_v0 = vpack.c.bf16 %v377_v32, %v369_v30  ;;  %v130_v40 = vld [vmem:[#allocation2 + $0x40] sm:$0xff]  ;;  %v3941_v42 = vpack.c.bf16 %v133_v36, %v125_v35  ;;  %v132_v43 = vld [vmem:[#allocation2 + $0x50] sm:$0xff]  ;;  %v139_v44 = vld [vmem:[#allocation2 + $0x88] sm:$0xff] }
  0x96   :  { %3868 = vmatpush1.bf16.msra.mxu0 %v3867_v13  ;;  %v147_v45 = vld [vmem:[#allocation2 + $0xc8] sm:$0xff]  ;;  %v141_v46 = vld [vmem:[#allocation2 + $0x98] sm:$0xff]  ;;  %v3895_v48 = vpack.c.bf16 %v130_v40, %v122_v39  ;;  %v3943_v49 = vpack.c.bf16 %v132_v43, %v124_v41  ;;  %v138_v51 = vld [vmem:[#allocation2 + $0x80] sm:$0xff] }
  0x97   :  { %3884 = vmatpush1.bf16.msra.mxu1 %v3883_v14  ;;  %3870 = vmatprep.subr.bf16.mxu0 %v3869_v15  ;;  %v149_v47 = vld [vmem:[#allocation2 + $0xd8] sm:$0xff]  ;;  %v3897_v50 = vpack.c.bf16 %v147_v45, %v139_v44  ;;  %v146_v52 = vld [vmem:[#allocation2 + $0xc0] sm:$0xff]  ;;  %v140_v53 = vld [vmem:[#allocation2 + $0x90] sm:$0xff] }
  0x98   :  { %3886 = vmatprep.subr.bf16.mxu1 %v3885_v19  ;;  %v3945_v54 = vpack.c.bf16 %v149_v47, %v141_v46  ;;  %v148_v55 = vld [vmem:[#allocation2 + $0xd0] sm:$0xff]  ;;  %v155_v56 = vld [vmem:[#allocation2 + $0x108] sm:$0xff]  ;;  %v157_v58 = vld [vmem:[#allocation2 + $0x118] sm:$0xff]  ;;  %v3899_v60 = vpack.c.bf16 %v146_v52, %v138_v51  ;;  %v668_v19 = vlaneseq }
  0x99   :  { %v163_v57 = vld [vmem:[#allocation2 + $0x148] sm:$0xff]  ;;  %v165_v59 = vld [vmem:[#allocation2 + $0x158] sm:$0xff]  ;;  %v3947_v61 = vpack.c.bf16 %v148_v55, %v140_v53  ;;  %v154_v1 = vld [vmem:[#allocation2 + $0x100] sm:$0xff] }
  0x9a   :  { %3872 = vmatpush1.bf16.msra.mxu0 %v3871_v25  ;;  %v3901_v62 = vpack.c.bf16 %v163_v57, %v155_v56  ;;  %v162_v2 = vld [vmem:[#allocation2 + $0x140] sm:$0xff]  ;;  %v156_v3 = vld [vmem:[#allocation2 + $0x110] sm:$0xff]  ;;  %v3949_v4 = vpack.c.bf16 %v165_v59, %v157_v58  ;;  %v171_v6 = vld [vmem:[#allocation2 + $0x188] sm:$0xff]  ;;  %v5630_v32 = vshrl.u32 %v668_v19, 7 }
  0x9b   :  { %3888 = vmatpush1.bf16.msra.mxu1 %v3887_v26  ;;  %3874 = vmatprep.subr.bf16.mxu0 %v3873_v27  ;;  %v164_v5 = vld [vmem:[#allocation2 + $0x150] sm:$0xff]  ;;  %v179_v7 = vld [vmem:[#allocation2 + $0x1c8] sm:$0xff]  ;;  %v173_v8 = vld [vmem:[#allocation2 + $0x198] sm:$0xff]  ;;  %v3903_v10 = vpack.c.bf16 %v162_v2, %v154_v1 }
  0x9c   :  { %3890 = vmatprep.subr.bf16.mxu1 %v3889_v31  ;;  %v181_v9 = vld [vmem:[#allocation2 + $0x1d8] sm:$0xff]  ;;  %v3905_v11 = vpack.c.bf16 %v179_v7, %v171_v6  ;;  %v170_v12 = vld [vmem:[#allocation2 + $0x180] sm:$0xff]  ;;  %v172_v14 = vld [vmem:[#allocation2 + $0x190] sm:$0xff]  ;;  %v5633_v44 = vsub.s32 1, %v5630_v32 }
  0x9d   :  { %v178_v13 = vld [vmem:[#allocation2 + $0x1c0] sm:$0xff]  ;;  %v3953_v15 = vpack.c.bf16 %v181_v9, %v173_v8  ;;  %v180_v16 = vld [vmem:[#allocation2 + $0x1d0] sm:$0xff]  ;;  %v187_v17 = vld [vmem:[#allocation2 + $0x208] sm:$0xff] }
  0x9e   :  { %3876 = vmatpush1.bf16.msra.mxu0 %v3875_v37  ;;  %v195_v18 = vld [vmem:[#allocation2 + $0x248] sm:$0xff]  ;;  %v189_v20 = vld [vmem:[#allocation2 + $0x218] sm:$0xff]  ;;  %v3907_v22 = vpack.c.bf16 %v178_v13, %v170_v12  ;;  %v3955_v23 = vpack.c.bf16 %v180_v16, %v172_v14  ;;  %v186_v25 = vld [vmem:[#allocation2 + $0x200] sm:$0xff] }
  0x9f   :  { %3892 = vmatpush1.bf16.msra.mxu1 %v3891_v0  ;;  %3894 = vmatprep.subr.bf16.mxu0 %v3893_v38  ;;  %v197_v21 = vld [vmem:[#allocation2 + $0x258] sm:$0xff]  ;;  %v3909_v24 = vpack.c.bf16 %v195_v18, %v187_v17  ;;  %v194_v26 = vld [vmem:[#allocation2 + $0x240] sm:$0xff]  ;;  %v188_v27 = vld [vmem:[#allocation2 + $0x210] sm:$0xff] }
  0xa0   :  { %3942 = vmatprep.subr.bf16.mxu1 %v3941_v42  ;;  %v3957_v28 = vpack.c.bf16 %v197_v21, %v189_v20  ;;  %v196_v29 = vld [vmem:[#allocation2 + $0x250] sm:$0xff]  ;;  %v203_v30 = vld [vmem:[#allocation2 + $0x288] sm:$0xff]  ;;  %v205_v33 = vld [vmem:[#allocation2 + $0x298] sm:$0xff]  ;;  %v3911_v35 = vpack.c.bf16 %v194_v26, %v186_v25 }
  0xa1   :  { %3683 = vmatmul.mubr.msk.f32.vlgmr.msra.gmra.mrb[2].mxu0 %vm379_vm0, %v5618_v63  ;;  %v211_v31 = vld [vmem:[#allocation2 + $0x2c8] sm:$0xff]  ;;  %v213_v34 = vld [vmem:[#allocation2 + $0x2d8] sm:$0xff]  ;;  %v3959_v36 = vpack.c.bf16 %v196_v29, %v188_v27  ;;  %v202_v0 = vld [vmem:[#allocation2 + $0x280] sm:$0xff] }
  0xa2   :  { %3684 = vmatmul.mubr.msk.f32.vlgmr.msra.gmra.mrb[2].mxu1 %vm379_vm0, %v5618_v63  ;;  %3896 = vmatpush1.bf16.msra.mxu0 %v3895_v48  ;;  %v3951_v63 = vpack.c.bf16 %v164_v5, %v156_v3  ;;  %v3913_v37 = vpack.c.bf16 %v211_v31, %v203_v30  ;;  %v210_v38 = vld [vmem:[#allocation2 + $0x2c0] sm:$0xff]  ;;  %v204_v39 = vld [vmem:[#allocation2 + $0x290] sm:$0xff]  ;;  %v3961_v40 = vpack.c.bf16 %v213_v34, %v205_v33  ;;  %v219_v42 = vld [vmem:[#allocation2 + $0x308] sm:$0xff] }
  0xa3   :  { %3944 = vmatpush1.bf16.msra.mxu1 %v3943_v49  ;;  %3898 = vmatprep.subr.bf16.mxu0 %v3897_v50  ;;  %v212_v41 = vld [vmem:[#allocation2 + $0x2d0] sm:$0xff]  ;;  %v227_v43 = vld [vmem:[#allocation2 + $0x348] sm:$0xff]  ;;  %v221_v45 = vld [vmem:[#allocation2 + $0x318] sm:$0xff]  ;;  %v3915_v47 = vpack.c.bf16 %v210_v38, %v202_v0 }
  0xa4   :  { %3946 = vmatprep.subr.bf16.mxu1 %v3945_v54  ;;  %v229_v46 = vld [vmem:[#allocation2 + $0x358] sm:$0xff]  ;;  %v218_v48 = vld [vmem:[#allocation2 + $0x300] sm:$0xff]  ;;  %v3963_v49 = vpack.c.bf16 %v212_v41, %v204_v39  ;;  %v3917_v50 = vpack.c.bf16 %v227_v43, %v219_v42  ;;  %v220_v52 = vld [vmem:[#allocation2 + $0x310] sm:$0xff] }
  0xa5   :  { %v226_v51 = vld [vmem:[#allocation2 + $0x340] sm:$0xff]  ;;  %v3965_v54 = vpack.c.bf16 %v229_v46, %v221_v45  ;;  %v228_v55 = vld [vmem:[#allocation2 + $0x350] sm:$0xff]  ;;  %v235_v56 = vld [vmem:[#allocation2 + $0x388] sm:$0xff] }
  0xa6   :  { %3900 = vmatpush1.bf16.msra.mxu0 %v3899_v60  ;;  %v5638_v53 = vld [vmem:[%s5813_s0] sm:$0x3]  ;;  %v243_v57 = vld [vmem:[#allocation2 + $0x3c8] sm:$0xff]  ;;  %v237_v59 = vld [vmem:[#allocation2 + $0x398] sm:$0xff] }
  0xa7   :  { %3948 = vmatpush1.bf16.msra.mxu1 %v3947_v61  ;;  %3902 = vmatprep.subr.bf16.mxu0 %v3901_v62  ;;  %v5642_v58 = vrot.slane %v5638_v53, %v5633_v44  ;;  %v245_v60 = vld [vmem:[#allocation2 + $0x3d8] sm:$0xff]  ;;  %v3919_v61 = vpack.c.bf16 %v226_v51, %v218_v48  ;;  %v3967_v62 = vpack.c.bf16 %v228_v55, %v220_v52  ;;  %v234_v2 = vld [vmem:[#allocation2 + $0x380] sm:$0xff]  ;;  %v244_v6 = vld [vmem:[#allocation2 + $0x3d0] sm:$0xff] }
  0xa8   :  { %3950 = vmatprep.subr.bf16.mxu1 %v3949_v4  ;;  %v3921_v1 = vpack.c.bf16 %v243_v57, %v235_v56  ;;  %v242_v3 = vld [vmem:[#allocation2 + $0x3c0] sm:$0xff]  ;;  %v236_v4 = vld [vmem:[#allocation2 + $0x390] sm:$0xff]  ;;  %v3969_v5 = vpack.c.bf16 %v245_v60, %v237_v59  ;;  %v251_v7 = vld [vmem:[#allocation2 + $0x408] sm:$0xff]  ;;  %v5649_v59 = vsub.s32 0, %v5630_v32 }
  0xa9   :  { %3685 = vmatprep.mubr.msk.f32.mxu0 %vm379_vm0, %v5642_v58  ;;  %v259_v8 = vld [vmem:[#allocation2 + $0x448] sm:$0xff]  ;;  %3686 = vmatprep.mubr.msk.f32.mxu1 %vm379_vm0, %v5642_v58  ;;  %v253_v9 = vld [vmem:[#allocation2 + $0x418] sm:$0xff]  ;;  %v250_v13 = vld [vmem:[#allocation2 + $0x400] sm:$0xff] }
  0xaa   :  { %3904 = vmatpush1.bf16.msra.mxu0 %v3903_v10  ;;  %v261_v10 = vld [vmem:[#allocation2 + $0x458] sm:$0xff]  ;;  %v3925_v12 = vpack.c.bf16 %v259_v8, %v251_v7  ;;  %v258_v14 = vld [vmem:[#allocation2 + $0x440] sm:$0xff]  ;;  %v260_v17 = vld [vmem:[#allocation2 + $0x450] sm:$0xff] }
  0xab   :  { %3952 = vmatpush1.bf16.msra.mxu1 %v3951_v63  ;;  %3906 = vmatprep.subr.bf16.mxu0 %v3905_v11  ;;  %v3923_v63 = vpack.c.bf16 %v242_v3, %v234_v2  ;;  %v3971_v11 = vpack.c.bf16 %v244_v6, %v236_v4  ;;  %v3973_v16 = vpack.c.bf16 %v261_v10, %v253_v9  ;;  %v267_v18 = vld [vmem:[#allocation2 + $0x488] sm:$0xff]  ;;  %v269_v20 = vld [vmem:[#allocation2 + $0x498] sm:$0xff]  ;;  %v266_v25 = vld [vmem:[#allocation2 + $0x480] sm:$0xff] }
  0xac   :  { %3954 = vmatprep.subr.bf16.mxu1 %v3953_v15  ;;  %v252_v15 = vld [vmem:[#allocation2 + $0x410] sm:$0xff]  ;;  %v275_v19 = vld [vmem:[#allocation2 + $0x4c8] sm:$0xff]  ;;  %v277_v21 = vld [vmem:[#allocation2 + $0x4d8] sm:$0xff]  ;;  %v5653_v10 = vrot.slane %v5638_v53, %v5649_v59 }
  0xad   :  { %v274_v26 = vld [vmem:[#allocation2 + $0x4c0] sm:$0xff]  ;;  %v268_v27 = vld [vmem:[#allocation2 + $0x490] sm:$0xff]  ;;  %v283_v30 = vld [vmem:[#allocation2 + $0x508] sm:$0xff] }
  0xae   :  { %3908 = vmatpush1.bf16.msra.mxu0 %v3907_v22  ;;  %v3927_v22 = vpack.c.bf16 %v258_v14, %v250_v13  ;;  %v276_v29 = vld [vmem:[#allocation2 + $0x4d0] sm:$0xff]  ;;  %v291_v31 = vld [vmem:[#allocation2 + $0x548] sm:$0xff]  ;;  %v285_v33 = vld [vmem:[#allocation2 + $0x518] sm:$0xff] }
  0xaf   :  { %3956 = vmatpush1.bf16.msra.mxu1 %v3955_v23  ;;  %3910 = vmatprep.subr.bf16.mxu0 %v3909_v24  ;;  %v3975_v23 = vpack.c.bf16 %v260_v17, %v252_v15  ;;  %v3929_v24 = vpack.c.bf16 %v275_v19, %v267_v18  ;;  %v293_v34 = vld [vmem:[#allocation2 + $0x558] sm:$0xff]  ;;  %v282_v0 = vld [vmem:[#allocation2 + $0x500] sm:$0xff]  ;;  %v284_v39 = vld [vmem:[#allocation2 + $0x510] sm:$0xff] }
  0xb0   :  { %3958 = vmatprep.subr.bf16.mxu1 %v3957_v28  ;;  %v3977_v28 = vpack.c.bf16 %v277_v21, %v269_v20  ;;  %v290_v38 = vld [vmem:[#allocation2 + $0x540] sm:$0xff]  ;;  %v292_v41 = vld [vmem:[#allocation2 + $0x550] sm:$0xff]  ;;  %v299_v42 = vld [vmem:[#allocation2 + $0x588] sm:$0xff] }
  0xb1   :  { %v307_v43 = vld [vmem:[#allocation2 + $0x5c8] sm:$0xff]  ;;  %v301_v45 = vld [vmem:[#allocation2 + $0x598] sm:$0xff]  ;;  %v3983_v48 = vpack.c.bf16 %v292_v41, %v284_v39  ;;  %v306_v51 = vld [vmem:[#allocation2 + $0x5c0] sm:$0xff] }
  0xb2   :  { %3912 = vmatpush1.bf16.msra.mxu0 %v3911_v35  ;;  %v3931_v35 = vpack.c.bf16 %v274_v26, %v266_v25  ;;  %v309_v46 = vld [vmem:[#allocation2 + $0x5d8] sm:$0xff]  ;;  %v300_v52 = vld [vmem:[#allocation2 + $0x590] sm:$0xff]  ;;  %v127_v56 = vld [vmem:[#allocation2 + $0x28] sm:$0xff] }
  0xb3   :  { %3960 = vmatpush1.bf16.msra.mxu1 %v3959_v36  ;;  %3914 = vmatprep.subr.bf16.mxu0 %v3913_v37  ;;  %v3979_v36 = vpack.c.bf16 %v276_v29, %v268_v27  ;;  %v3933_v37 = vpack.c.bf16 %v291_v31, %v283_v30  ;;  %v308_v55 = vld [vmem:[#allocation2 + $0x5d0] sm:$0xff]  ;;  %v135_v57 = vld [vmem:[#allocation2 + $0x68] sm:$0xff]  ;;  %v129_v60 = vld [vmem:[#allocation2 + $0x38] sm:$0xff] }
  0xb4   :  { %3962 = vmatprep.subr.bf16.mxu1 %v3961_v40  ;;  %v3981_v40 = vpack.c.bf16 %v293_v34, %v285_v33  ;;  %v3989_v2 = vpack.c.bf16 %v135_v57, %v127_v56  ;;  %v126_v3 = vld [vmem:[#allocation2 + $0x20] sm:$0xff]  ;;  %v136_v7 = vld [vmem:[#allocation2 + $0x70] sm:$0xff]  ;;  %v143_v8 = vld [vmem:[#allocation2 + $0xa8] sm:$0xff] }
  0xb5   :  { %v134_v4 = vld [vmem:[#allocation2 + $0x60] sm:$0xff]  ;;  %v151_v9 = vld [vmem:[#allocation2 + $0xe8] sm:$0xff]  ;;  %v144_v17 = vld [vmem:[#allocation2 + $0xb0] sm:$0xff] }
  0xb6   :  { %3916 = vmatpush1.bf16.msra.mxu0 %v3915_v47  ;;  %v3935_v47 = vpack.c.bf16 %v290_v38, %v282_v0  ;;  %v3993_v14 = vpack.c.bf16 %v151_v9, %v143_v8  ;;  %v142_v15 = vld [vmem:[#allocation2 + $0xa0] sm:$0xff]  ;;  %v152_v19 = vld [vmem:[#allocation2 + $0xf0] sm:$0xff]  ;;  %v159_v20 = vld [vmem:[#allocation2 + $0x128] sm:$0xff] }
  0xb7   :  { %3964 = vmatpush1.bf16.msra.mxu1 %v3963_v49  ;;  %3918 = vmatprep.subr.bf16.mxu0 %v3917_v50  ;;  %v3937_v49 = vpack.c.bf16 %v307_v43, %v299_v42  ;;  %v298_v50 = vld [vmem:[#allocation2 + $0x580] sm:$0xff]  ;;  %v167_v21 = vld [vmem:[#allocation2 + $0x168] sm:$0xff]  ;;  %v161_v53 = vld [vmem:[#allocation2 + $0x138] sm:$0xff] }
  0xb8   :  { %3966 = vmatprep.subr.bf16.mxu1 %v3965_v54  ;;  %v3985_v54 = vpack.c.bf16 %v309_v46, %v301_v45  ;;  %v3997_v25 = vpack.c.bf16 %v167_v21, %v159_v20  ;;  %v158_v26 = vld [vmem:[#allocation2 + $0x120] sm:$0xff]  ;;  %v168_v30 = vld [vmem:[#allocation2 + $0x170] sm:$0xff]  ;;  %v175_v31 = vld [vmem:[#allocation2 + $0x1a8] sm:$0xff] }
  0xb9   :  { %v166_v27 = vld [vmem:[#allocation2 + $0x160] sm:$0xff]  ;;  %v183_v33 = vld [vmem:[#allocation2 + $0x1e8] sm:$0xff]  ;;  %v177_v34 = vld [vmem:[#allocation2 + $0x1b8] sm:$0xff] }
  0xba   :  { %3920 = vmatpush1.bf16.msra.mxu0 %v3919_v61  ;;  %v137_v61 = vld [vmem:[#allocation2 + $0x78] sm:$0xff]  ;;  %v4001_v0 = vpack.c.bf16 %v183_v33, %v175_v31  ;;  %v174_v38 = vld [vmem:[#allocation2 + $0x1a0] sm:$0xff]  ;;  %v184_v42 = vld [vmem:[#allocation2 + $0x1f0] sm:$0xff] }
  0xbb   :  { %3968 = vmatpush1.bf16.msra.mxu1 %v3967_v62  ;;  %3922 = vmatprep.subr.bf16.mxu0 %v3921_v1  ;;  %v3939_v62 = vpack.c.bf16 %v306_v51, %v298_v50  ;;  %v3987_v1 = vpack.c.bf16 %v308_v55, %v300_v52  ;;  %v4037_v6 = vpack.c.bf16 %v137_v61, %v129_v60  ;;  %v182_v39 = vld [vmem:[#allocation2 + $0x1e0] sm:$0xff]  ;;  %v191_v43 = vld [vmem:[#allocation2 + $0x228] sm:$0xff]  ;;  %v193_v46 = vld [vmem:[#allocation2 + $0x238] sm:$0xff] }
  0xbc   :  { %3970 = vmatprep.subr.bf16.mxu1 %v3969_v5  ;;  %v128_v5 = vld [vmem:[#allocation2 + $0x30] sm:$0xff]  ;;  %v199_v45 = vld [vmem:[#allocation2 + $0x268] sm:$0xff]  ;;  %v190_v50 = vld [vmem:[#allocation2 + $0x220] sm:$0xff] }
  0xbd   :  { %v4039_v13 = vpack.c.bf16 %v136_v7, %v128_v5  ;;  %v198_v51 = vld [vmem:[#allocation2 + $0x260] sm:$0xff]  ;;  %v192_v52 = vld [vmem:[#allocation2 + $0x230] sm:$0xff]  ;;  %v207_v56 = vld [vmem:[#allocation2 + $0x2a8] sm:$0xff] }
  0xbe   :  { %3924 = vmatpush1.bf16.msra.mxu0 %v3923_v63  ;;  %v145_v63 = vld [vmem:[#allocation2 + $0xb8] sm:$0xff]  ;;  %v200_v55 = vld [vmem:[#allocation2 + $0x270] sm:$0xff]  ;;  %v215_v57 = vld [vmem:[#allocation2 + $0x2e8] sm:$0xff] }
  0xbf   :  { %3972 = vmatpush1.bf16.msra.mxu1 %v3971_v11  ;;  %3926 = vmatprep.subr.bf16.mxu0 %v3925_v12  ;;  %v153_v11 = vld [vmem:[#allocation2 + $0xf8] sm:$0xff]  ;;  %v3991_v12 = vpack.c.bf16 %v134_v4, %v126_v3  ;;  %v206_v3 = vld [vmem:[#allocation2 + $0x2a0] sm:$0xff]  ;;  %v208_v5 = vld [vmem:[#allocation2 + $0x2b0] sm:$0xff] }
  0xc0   :  { %3974 = vmatprep.subr.bf16.mxu1 %v3973_v16  ;;  %v150_v16 = vld [vmem:[#allocation2 + $0xe0] sm:$0xff]  ;;  %v4041_v18 = vpack.c.bf16 %v153_v11, %v145_v63  ;;  %v209_v60 = vld [vmem:[#allocation2 + $0x2b8] sm:$0xff]  ;;  %v216_v7 = vld [vmem:[#allocation2 + $0x2f0] sm:$0xff] }
  0xc1   :  { %v217_v61 = vld [vmem:[#allocation2 + $0x2f8] sm:$0xff]  ;;  %v214_v4 = vld [vmem:[#allocation2 + $0x2e0] sm:$0xff]  ;;  %v223_v8 = vld [vmem:[#allocation2 + $0x328] sm:$0xff] }
  0xc2   :  { %3928 = vmatpush1.bf16.msra.mxu0 %v3927_v22  ;;  %v169_v22 = vld [vmem:[#allocation2 + $0x178] sm:$0xff]  ;;  %v231_v9 = vld [vmem:[#allocation2 + $0x368] sm:$0xff] }
  0xc3   :  { %3976 = vmatpush1.bf16.msra.mxu1 %v3975_v23  ;;  %3930 = vmatprep.subr.bf16.mxu0 %v3929_v24  ;;  %v3995_v23 = vpack.c.bf16 %v150_v16, %v142_v15  ;;  %v4043_v24 = vpack.c.bf16 %v152_v19, %v144_v17  ;;  %v4045_v29 = vpack.c.bf16 %v169_v22, %v161_v53  ;;  %v225_v63 = vld [vmem:[#allocation2 + $0x338] sm:$0xff]  ;;  %v222_v15 = vld [vmem:[#allocation2 + $0x320] sm:$0xff]  ;;  %v224_v17 = vld [vmem:[#allocation2 + $0x330] sm:$0xff] }
  0xc4   :  { %3978 = vmatprep.subr.bf16.mxu1 %v3977_v28  ;;  %v160_v28 = vld [vmem:[#allocation2 + $0x130] sm:$0xff]  ;;  %v233_v11 = vld [vmem:[#allocation2 + $0x378] sm:$0xff]  ;;  %v230_v16 = vld [vmem:[#allocation2 + $0x360] sm:$0xff] }
  0xc5   :  { %v232_v19 = vld [vmem:[#allocation2 + $0x370] sm:$0xff]  ;;  %v239_v20 = vld [vmem:[#allocation2 + $0x3a8] sm:$0xff]  ;;  %v241_v53 = vld [vmem:[#allocation2 + $0x3b8] sm:$0xff] }
  0xc6   :  { %3932 = vmatpush1.bf16.msra.mxu0 %v3931_v35  ;;  %v185_v35 = vld [vmem:[#allocation2 + $0x1f8] sm:$0xff]  ;;  %v247_v21 = vld [vmem:[#allocation2 + $0x3e8] sm:$0xff] }
  0xc7   :  { %3980 = vmatpush1.bf16.msra.mxu1 %v3979_v36  ;;  %3934 = vmatprep.subr.bf16.mxu0 %v3933_v37  ;;  %v3999_v36 = vpack.c.bf16 %v166_v27, %v158_v26  ;;  %v4047_v37 = vpack.c.bf16 %v168_v30, %v160_v28  ;;  %v4049_v41 = vpack.c.bf16 %v185_v35, %v177_v34  ;;  %v249_v22 = vld [vmem:[#allocation2 + $0x3f8] sm:$0xff]  ;;  %v238_v26 = vld [vmem:[#allocation2 + $0x3a0] sm:$0xff]  ;;  %v240_v28 = vld [vmem:[#allocation2 + $0x3b0] sm:$0xff] }
  0xc8   :  { %3982 = vmatprep.subr.bf16.mxu1 %v3981_v40  ;;  %v176_v40 = vld [vmem:[#allocation2 + $0x1b0] sm:$0xff]  ;;  %v246_v27 = vld [vmem:[#allocation2 + $0x3e0] sm:$0xff]  ;;  %v255_v31 = vld [vmem:[#allocation2 + $0x428] sm:$0xff] }
  0xc9   :  { %v248_v30 = vld [vmem:[#allocation2 + $0x3f0] sm:$0xff]  ;;  %v263_v33 = vld [vmem:[#allocation2 + $0x468] sm:$0xff]  ;;  %v257_v34 = vld [vmem:[#allocation2 + $0x438] sm:$0xff] }
  0xca   :  { %3936 = vmatpush1.bf16.msra.mxu0 %v3935_v47  ;;  %v201_v47 = vld [vmem:[#allocation2 + $0x278] sm:$0xff] }
  0xcb   :  { %3984 = vmatpush1.bf16.msra.mxu1 %v3983_v48  ;;  %3938 = vmatprep.subr.bf16.mxu0 %v3937_v49  ;;  %v4003_v48 = vpack.c.bf16 %v182_v39, %v174_v38  ;;  %v4005_v49 = vpack.c.bf16 %v199_v45, %v191_v43  ;;  %v265_v35 = vld [vmem:[#allocation2 + $0x478] sm:$0xff]  ;;  %v254_v38 = vld [vmem:[#allocation2 + $0x420] sm:$0xff]  ;;  %v271_v43 = vld [vmem:[#allocation2 + $0x4a8] sm:$0xff] }
  0xcc   :  { %3986 = vmatprep.subr.bf16.mxu1 %v3985_v54  ;;  %v4053_v54 = vpack.c.bf16 %v201_v47, %v193_v46  ;;  %v262_v39 = vld [vmem:[#allocation2 + $0x460] sm:$0xff]  ;;  %v279_v45 = vld [vmem:[#allocation2 + $0x4e8] sm:$0xff]  ;;  %v273_v46 = vld [vmem:[#allocation2 + $0x4b8] sm:$0xff] }
  0xcd   :  { %v281_v47 = vld [vmem:[#allocation2 + $0x4f8] sm:$0xff] }
  0xce   :  { %3940 = vmatpush1.bf16.msra.mxu0 %v3939_v62  ;;  %v4007_v62 = vpack.c.bf16 %v198_v51, %v190_v50  ;;  %v270_v50 = vld [vmem:[#allocation2 + $0x4a0] sm:$0xff] }
  0xcf   :  { %3988 = vmatpush1.bf16.msra.mxu1 %v3987_v1  ;;  %3990 = vmatprep.subr.bf16.mxu0 %v3989_v2  ;;  %v4055_v1 = vpack.c.bf16 %v200_v55, %v192_v52  ;;  %v4009_v2 = vpack.c.bf16 %v215_v57, %v207_v56  ;;  %v278_v51 = vld [vmem:[#allocation2 + $0x4e0] sm:$0xff]  ;;  %v272_v52 = vld [vmem:[#allocation2 + $0x4b0] sm:$0xff]  ;;  %v287_v56 = vld [vmem:[#allocation2 + $0x528] sm:$0xff] }
  0xd0   :  { %4038 = vmatprep.subr.bf16.mxu1 %v4037_v6  ;;  %v4057_v6 = vpack.c.bf16 %v217_v61, %v209_v60  ;;  %v280_v55 = vld [vmem:[#allocation2 + $0x4f0] sm:$0xff]  ;;  %v295_v57 = vld [vmem:[#allocation2 + $0x568] sm:$0xff]  ;;  %v289_v60 = vld [vmem:[#allocation2 + $0x538] sm:$0xff] }
  0xd1   :  { %744 = vmatmul.mubr.f32.vlgmr.msra.gmra.mrb[0].mxu0 %v5653_v10  ;;  %v297_v61 = vld [vmem:[#allocation2 + $0x578] sm:$0xff] }
  0xd2   :  { %815 = vmatmul.mubr.f32.vlgmr.msra.gmra.mrb[0].mxu1 %v5653_v10  ;;  %3992 = vmatpush1.bf16.msra.mxu0 %v3991_v12  ;;  %v4011_v12 = vpack.c.bf16 %v214_v4, %v206_v3  ;;  %v286_v3 = vld [vmem:[#allocation2 + $0x520] sm:$0xff] }
  0xd3   :  { %4040 = vmatpush1.bf16.msra.mxu1 %v4039_v13  ;;  %3994 = vmatprep.subr.bf16.mxu0 %v3993_v14  ;;  %v4059_v13 = vpack.c.bf16 %v216_v7, %v208_v5  ;;  %v4013_v14 = vpack.c.bf16 %v231_v9, %v223_v8  ;;  %v294_v4 = vld [vmem:[#allocation2 + $0x560] sm:$0xff]  ;;  %v288_v5 = vld [vmem:[#allocation2 + $0x530] sm:$0xff]  ;;  %v303_v8 = vld [vmem:[#allocation2 + $0x5a8] sm:$0xff] }
  0xd4   :  { %4042 = vmatprep.subr.bf16.mxu1 %v4041_v18  ;;  %3687 = vmatprep.mubr.msk.f32.mxu0 %vm379_vm0, %v5642_v58  ;;  %v4061_v18 = vpack.c.bf16 %v233_v11, %v225_v63  ;;  %v296_v7 = vld [vmem:[#allocation2 + $0x570] sm:$0xff]  ;;  %v311_v9 = vld [vmem:[#allocation2 + $0x5e8] sm:$0xff]  ;;  %v305_v63 = vld [vmem:[#allocation2 + $0x5b8] sm:$0xff] }
  0xd5   :  { %3688 = vmatprep.mubr.msk.f32.mxu1 %vm379_vm0, %v5642_v58  ;;  %v4051_v58 = vpack.c.bf16 %v184_v42, %v176_v40  ;;  %v256_v40 = vld [vmem:[#allocation2 + $0x430] sm:$0xff]  ;;  %v313_v11 = vld [vmem:[#allocation2 + $0x5f8] sm:$0xff] }
  0xd6   :  { %3996 = vmatpush1.bf16.msra.mxu0 %v3995_v23  ;;  %v4015_v23 = vpack.c.bf16 %v230_v16, %v222_v15  ;;  %v264_v42 = vld [vmem:[#allocation2 + $0x470] sm:$0xff]  ;;  %v302_v15 = vld [vmem:[#allocation2 + $0x5a0] sm:$0xff] }
  0xd7   :  { %4044 = vmatpush1.bf16.msra.mxu1 %v4043_v24  ;;  %3998 = vmatprep.subr.bf16.mxu0 %v3997_v25  ;;  %v4063_v24 = vpack.c.bf16 %v232_v19, %v224_v17  ;;  %v4017_v25 = vpack.c.bf16 %v247_v21, %v239_v20  ;;  %v310_v16 = vld [vmem:[#allocation2 + $0x5e0] sm:$0xff]  ;;  %v304_v17 = vld [vmem:[#allocation2 + $0x5b0] sm:$0xff] }
  0xd8   :  { %4046 = vmatprep.subr.bf16.mxu1 %v4045_v29  ;;  %v4065_v29 = vpack.c.bf16 %v249_v22, %v241_v53  ;;  %v312_v19 = vld [vmem:[#allocation2 + $0x5f0] sm:$0xff]  ;;  %v1040_v53 = vld [vmem:[#allocation7 + $0x18] sm:$0xff] }
  0xd9   :  { %v1038_v20 = vld [vmem:[#allocation7 + $0x8] sm:$0xff]  ;;  %v1048_v22 = vld [vmem:[#allocation7 + $0x58] sm:$0xff] }
  0xda   :  { %4000 = vmatpush1.bf16.msra.mxu0 %v3999_v36  ;;  %v4019_v36 = vpack.c.bf16 %v246_v27, %v238_v26  ;;  %v1046_v21 = vld [vmem:[#allocation7 + $0x48] sm:$0xff]  ;;  %v1037_v26 = vld [vmem:[#allocation7] sm:$0xff] }
  0xdb   :  { %4048 = vmatpush1.bf16.msra.mxu1 %v4047_v37  ;;  %4002 = vmatprep.subr.bf16.mxu0 %v4001_v0  ;;  %v4067_v37 = vpack.c.bf16 %v248_v30, %v240_v28  ;;  %v4021_v0 = vpack.c.bf16 %v263_v33, %v255_v31  ;;  %v1045_v27 = vld [vmem:[#allocation7 + $0x40] sm:$0xff]  ;;  %v1039_v28 = vld [vmem:[#allocation7 + $0x10] sm:$0xff]  ;;  %v1054_v31 = vld [vmem:[#allocation7 + $0x88] sm:$0xff] }
  0xdc   :  { %4050 = vmatprep.subr.bf16.mxu1 %v4049_v41  ;;  %v4069_v41 = vpack.c.bf16 %v265_v35, %v257_v34  ;;  %v1047_v30 = vld [vmem:[#allocation7 + $0x50] sm:$0xff]  ;;  %v1062_v33 = vld [vmem:[#allocation7 + $0xc8] sm:$0xff]  ;;  %v1056_v34 = vld [vmem:[#allocation7 + $0x98] sm:$0xff] }
  0xdd   :  { %v1064_v35 = vld [vmem:[#allocation7 + $0xd8] sm:$0xff] }
  0xde   :  { %4004 = vmatpush1.bf16.msra.mxu0 %v4003_v48  ;;  %v4023_v48 = vpack.c.bf16 %v262_v39, %v254_v38  ;;  %v1053_v38 = vld [vmem:[#allocation7 + $0x80] sm:$0xff] }
  0xdf   :  { %4052 = vmatpush1.bf16.msra.mxu1 %v4051_v58  ;;  %4006 = vmatprep.subr.bf16.mxu0 %v4005_v49  ;;  %v4071_v58 = vpack.c.bf16 %v264_v42, %v256_v40  ;;  %v4025_v49 = vpack.c.bf16 %v279_v45, %v271_v43  ;;  %v1061_v39 = vld [vmem:[#allocation7 + $0xc0] sm:$0xff]  ;;  %v1055_v40 = vld [vmem:[#allocation7 + $0x90] sm:$0xff]  ;;  %v1070_v43 = vld [vmem:[#allocation7 + $0x108] sm:$0xff] }
  0xe0   :  { %4054 = vmatprep.subr.bf16.mxu1 %v4053_v54  ;;  %v4073_v54 = vpack.c.bf16 %v281_v47, %v273_v46  ;;  %v1063_v42 = vld [vmem:[#allocation7 + $0xd0] sm:$0xff]  ;;  %v1078_v45 = vld [vmem:[#allocation7 + $0x148] sm:$0xff]  ;;  %v1072_v46 = vld [vmem:[#allocation7 + $0x118] sm:$0xff] }
  0xe1   :  { %v1080_v47 = vld [vmem:[#allocation7 + $0x158] sm:$0xff] }
  0xe2   :  { %4008 = vmatpush1.bf16.msra.mxu0 %v4007_v62  ;;  %v4027_v62 = vpack.c.bf16 %v278_v51, %v270_v50  ;;  %v1069_v50 = vld [vmem:[#allocation7 + $0x100] sm:$0xff] }
  0xe3   :  { %4056 = vmatpush1.bf16.msra.mxu1 %v4055_v1  ;;  %4010 = vmatprep.subr.bf16.mxu0 %v4009_v2  ;;  %v4075_v1 = vpack.c.bf16 %v280_v55, %v272_v52  ;;  %v4029_v2 = vpack.c.bf16 %v295_v57, %v287_v56  ;;  %v1077_v51 = vld [vmem:[#allocation7 + $0x140] sm:$0xff]  ;;  %v1071_v52 = vld [vmem:[#allocation7 + $0x110] sm:$0xff]  ;;  %v1086_v56 = vld [vmem:[#allocation7 + $0x188] sm:$0xff] }
  0xe4   :  { %4058 = vmatprep.subr.bf16.mxu1 %v4057_v6  ;;  %v4077_v6 = vpack.c.bf16 %v297_v61, %v289_v60  ;;  %v1079_v55 = vld [vmem:[#allocation7 + $0x150] sm:$0xff]  ;;  %v1094_v57 = vld [vmem:[#allocation7 + $0x1c8] sm:$0xff]  ;;  %v1088_v60 = vld [vmem:[#allocation7 + $0x198] sm:$0xff] }
  0xe5   :  { %v1096_v61 = vld [vmem:[#allocation7 + $0x1d8] sm:$0xff] }
  0xe6   :  { %4012 = vmatpush1.bf16.msra.mxu0 %v4011_v12  ;;  %v4031_v12 = vpack.c.bf16 %v294_v4, %v286_v3  ;;  %v1093_v3 = vld [vmem:[#allocation7 + $0x1c0] sm:$0xff]  ;;  %v1087_v4 = vld [vmem:[#allocation7 + $0x190] sm:$0xff] }
  0xe7   :  { %4060 = vmatpush1.bf16.msra.mxu1 %v4059_v13  ;;  %4014 = vmatprep.subr.bf16.mxu0 %v4013_v14  ;;  %v4079_v13 = vpack.c.bf16 %v296_v7, %v288_v5  ;;  %v4033_v14 = vpack.c.bf16 %v311_v9, %v303_v8  ;;  %v4353_v5 = vpack.c.bf16 %v1096_v61, %v1088_v60  ;;  %v1102_v7 = vld [vmem:[#allocation7 + $0x208] sm:$0xff]  ;;  %v1104_v9 = vld [vmem:[#allocation7 + $0x218] sm:$0xff] }
  0xe8   :  { %4062 = vmatprep.subr.bf16.mxu1 %v4061_v18  ;;  %v4081_v18 = vpack.c.bf16 %v313_v11, %v305_v63  ;;  %v1110_v8 = vld [vmem:[#allocation7 + $0x248] sm:$0xff]  ;;  %v1112_v63 = vld [vmem:[#allocation7 + $0x258] sm:$0xff] }
  0xe9   :  { %v1176_v60 = vld [vmem:[#allocation7 + $0x458] sm:$0xff] }
  0xea   :  { %4016 = vmatpush1.bf16.msra.mxu0 %v4015_v23  ;;  %v4035_v23 = vpack.c.bf16 %v310_v16, %v302_v15  ;;  %v1109_v15 = vld [vmem:[#allocation7 + $0x240] sm:$0xff]  ;;  %v1103_v16 = vld [vmem:[#allocation7 + $0x210] sm:$0xff] }
  0xeb   :  { %4064 = vmatpush1.bf16.msra.mxu1 %v4063_v24  ;;  %4018 = vmatprep.subr.bf16.mxu0 %v4017_v25  ;;  %v4083_v24 = vpack.c.bf16 %v312_v19, %v304_v17  ;;  %v4085_v25 = vpack.c.bf16 %v1046_v21, %v1038_v20  ;;  %v4357_v17 = vpack.c.bf16 %v1112_v63, %v1104_v9  ;;  %v1118_v19 = vld [vmem:[#allocation7 + $0x288] sm:$0xff]  ;;  %v1120_v21 = vld [vmem:[#allocation7 + $0x298] sm:$0xff] }
  0xec   :  { %4066 = vmatprep.subr.bf16.mxu1 %v4065_v29  ;;  %v4341_v29 = vpack.c.bf16 %v1048_v22, %v1040_v53  ;;  %v1126_v20 = vld [vmem:[#allocation7 + $0x2c8] sm:$0xff]  ;;  %v1128_v53 = vld [vmem:[#allocation7 + $0x2d8] sm:$0xff] }
  0xed   :  { %v1192_v9 = vld [vmem:[#allocation7 + $0x4d8] sm:$0xff] }
  0xee   :  { %4020 = vmatpush1.bf16.msra.mxu0 %v4019_v36  ;;  %v4087_v36 = vpack.c.bf16 %v1045_v27, %v1037_v26  ;;  %v1125_v26 = vld [vmem:[#allocation7 + $0x2c0] sm:$0xff]  ;;  %v1119_v27 = vld [vmem:[#allocation7 + $0x290] sm:$0xff] }
  0xef   :  { %4068 = vmatpush1.bf16.msra.mxu1 %v4067_v37  ;;  %4022 = vmatprep.subr.bf16.mxu0 %v4021_v0  ;;  %v4343_v37 = vpack.c.bf16 %v1047_v30, %v1039_v28  ;;  %v4089_v0 = vpack.c.bf16 %v1062_v33, %v1054_v31  ;;  %v4361_v28 = vpack.c.bf16 %v1128_v53, %v1120_v21  ;;  %v1134_v30 = vld [vmem:[#allocation7 + $0x308] sm:$0xff]  ;;  %v1136_v33 = vld [vmem:[#allocation7 + $0x318] sm:$0xff] }
  0xf0   :  { %4070 = vmatprep.subr.bf16.mxu1 %v4069_v41  ;;  %v4345_v41 = vpack.c.bf16 %v1064_v35, %v1056_v34  ;;  %v1142_v31 = vld [vmem:[#allocation7 + $0x348] sm:$0xff]  ;;  %v1144_v34 = vld [vmem:[#allocation7 + $0x358] sm:$0xff] }
  0xf1   :  { %v1208_v21 = vld [vmem:[#allocation7 + $0x558] sm:$0xff] }
  0xf2   :  { %4024 = vmatpush1.bf16.msra.mxu0 %v4023_v48  ;;  %v4091_v48 = vpack.c.bf16 %v1061_v39, %v1053_v38  ;;  %v1141_v38 = vld [vmem:[#allocation7 + $0x340] sm:$0xff]  ;;  %v1135_v39 = vld [vmem:[#allocation7 + $0x310] sm:$0xff] }
  0xf3   :  { %4072 = vmatpush1.bf16.msra.mxu1 %v4071_v58  ;;  %4026 = vmatprep.subr.bf16.mxu0 %v4025_v49  ;;  %v4347_v58 = vpack.c.bf16 %v1063_v42, %v1055_v40  ;;  %v4093_v49 = vpack.c.bf16 %v1078_v45, %v1070_v43  ;;  %v4365_v40 = vpack.c.bf16 %v1144_v34, %v1136_v33  ;;  %v1150_v42 = vld [vmem:[#allocation7 + $0x388] sm:$0xff]  ;;  %v1152_v45 = vld [vmem:[#allocation7 + $0x398] sm:$0xff] }
  0xf4   :  { %4074 = vmatprep.subr.bf16.mxu1 %v4073_v54  ;;  %v4349_v54 = vpack.c.bf16 %v1080_v47, %v1072_v46  ;;  %v1158_v43 = vld [vmem:[#allocation7 + $0x3c8] sm:$0xff]  ;;  %v1160_v46 = vld [vmem:[#allocation7 + $0x3d8] sm:$0xff] }
  0xf5   :  { %v1224_v33 = vld [vmem:[#allocation7 + $0x5d8] sm:$0xff] }
  0xf6   :  { %4028 = vmatpush1.bf16.msra.mxu0 %v4027_v62  ;;  %v4095_v62 = vpack.c.bf16 %v1077_v51, %v1069_v50  ;;  %v1157_v50 = vld [vmem:[#allocation7 + $0x3c0] sm:$0xff]  ;;  %v1151_v51 = vld [vmem:[#allocation7 + $0x390] sm:$0xff] }
  0xf7   :  { %4076 = vmatpush1.bf16.msra.mxu1 %v4075_v1  ;;  %4030 = vmatprep.subr.bf16.mxu0 %v4029_v2  ;;  %v4097_v1 = vpack.c.bf16 %v1094_v57, %v1086_v56  ;;  %v1085_v2 = vld [vmem:[#allocation7 + $0x180] sm:$0xff]  ;;  %v1174_v56 = vld [vmem:[#allocation7 + $0x448] sm:$0xff]  ;;  %v1168_v57 = vld [vmem:[#allocation7 + $0x418] sm:$0xff] }
  0xf8   :  { %4078 = vmatprep.subr.bf16.mxu1 %v4077_v6  ;;  %v1095_v6 = vld [vmem:[#allocation7 + $0x1d0] sm:$0xff]  ;;  %v4099_v11 = vpack.c.bf16 %v1093_v3, %v1085_v2  ;;  %v1173_v2 = vld [vmem:[#allocation7 + $0x440] sm:$0xff] }
  0xf9   :  { %v1167_v3 = vld [vmem:[#allocation7 + $0x410] sm:$0xff] }
  0xfa   :  { %4032 = vmatpush1.bf16.msra.mxu0 %v4031_v12  ;;  %v4355_v12 = vpack.c.bf16 %v1095_v6, %v1087_v4  ;;  %v4373_v4 = vpack.c.bf16 %v1176_v60, %v1168_v57  ;;  %v1182_v6 = vld [vmem:[#allocation7 + $0x488] sm:$0xff]  ;;  %v1256_v57 = vld [vmem:[#allocation7 + $0x6d8] sm:$0xff] }
  0xfb   :  { %4080 = vmatpush1.bf16.msra.mxu1 %v4079_v13  ;;  %4034 = vmatprep.subr.bf16.mxu0 %v4033_v14  ;;  %v4101_v13 = vpack.c.bf16 %v1110_v8, %v1102_v7  ;;  %v1101_v14 = vld [vmem:[#allocation7 + $0x200] sm:$0xff]  ;;  %v1190_v7 = vld [vmem:[#allocation7 + $0x4c8] sm:$0xff]  ;;  %v1184_v8 = vld [vmem:[#allocation7 + $0x498] sm:$0xff] }
  0xfc   :  { %4082 = vmatprep.subr.bf16.mxu1 %v4081_v18  ;;  %v1111_v18 = vld [vmem:[#allocation7 + $0x250] sm:$0xff]  ;;  %v4103_v22 = vpack.c.bf16 %v1109_v15, %v1101_v14  ;;  %v1189_v14 = vld [vmem:[#allocation7 + $0x4c0] sm:$0xff] }
  0xfd   :  { %v1183_v15 = vld [vmem:[#allocation7 + $0x490] sm:$0xff] }
  0xfe   :  { %4036 = vmatpush1.bf16.msra.mxu0 %v4035_v23  ;;  %v4359_v23 = vpack.c.bf16 %v1111_v18, %v1103_v16  ;;  %v4377_v16 = vpack.c.bf16 %v1192_v9, %v1184_v8  ;;  %v1198_v18 = vld [vmem:[#allocation7 + $0x508] sm:$0xff]  ;;  %v1272_v8 = vld [vmem:[#allocation7 + $0x758] sm:$0xff] }
  0xff   :  { %4084 = vmatpush1.bf16.msra.mxu1 %v4083_v24  ;;  %4086 = vmatprep.subr.bf16.mxu0 %v4085_v25  ;;  %v4105_v24 = vpack.c.bf16 %v1126_v20, %v1118_v19  ;;  %v1117_v25 = vld [vmem:[#allocation7 + $0x280] sm:$0xff]  ;;  %v1206_v19 = vld [vmem:[#allocation7 + $0x548] sm:$0xff]  ;;  %v1200_v20 = vld [vmem:[#allocation7 + $0x518] sm:$0xff] }
 0x100   :  { %4342 = vmatprep.subr.bf16.mxu1 %v4341_v29  ;;  %v1127_v29 = vld [vmem:[#allocation7 + $0x2d0] sm:$0xff]  ;;  %v4107_v35 = vpack.c.bf16 %v1125_v26, %v1117_v25  ;;  %v1205_v25 = vld [vmem:[#allocation7 + $0x540] sm:$0xff] }
 0x101   :  { %886 = vmatmul.mubr.f32.vlgmr.msra.gmra.mrb[2].mxu0 %v5653_v10  ;;  %v1199_v26 = vld [vmem:[#allocation7 + $0x510] sm:$0xff] }
 0x102   :  { %957 = vmatmul.mubr.f32.vlgmr.msra.gmra.mrb[2].mxu1 %v5653_v10  ;;  %4088 = vmatpush1.bf16.msra.mxu0 %v4087_v36  ;;  %v4351_v10 = vpack.c.bf16 %v1079_v55, %v1071_v52  ;;  %v4363_v36 = vpack.c.bf16 %v1127_v29, %v1119_v27  ;;  %v4369_v52 = vpack.c.bf16 %v1160_v46, %v1152_v45  ;;  %v1166_v55 = vld [vmem:[#allocation7 + $0x408] sm:$0xff]  ;;  %v1240_v45 = vld [vmem:[#allocation7 + $0x658] sm:$0xff] }
 0x103   :  { %4344 = vmatpush1.bf16.msra.mxu1 %v4343_v37  ;;  %4090 = vmatprep.subr.bf16.mxu0 %v4089_v0  ;;  %v4109_v37 = vpack.c.bf16 %v1142_v31, %v1134_v30  ;;  %v1133_v0 = vld [vmem:[#allocation7 + $0x300] sm:$0xff]  ;;  %v4381_v27 = vpack.c.bf16 %v1208_v21, %v1200_v20  ;;  %v1214_v29 = vld [vmem:[#allocation7 + $0x588] sm:$0xff]  ;;  %v1216_v31 = vld [vmem:[#allocation7 + $0x598] sm:$0xff] }
 0x104   :  { %4346 = vmatprep.subr.bf16.mxu1 %v4345_v41  ;;  %v1143_v41 = vld [vmem:[#allocation7 + $0x350] sm:$0xff]  ;;  %v4111_v47 = vpack.c.bf16 %v1141_v38, %v1133_v0  ;;  %v1222_v30 = vld [vmem:[#allocation7 + $0x5c8] sm:$0xff]  ;;  %v1221_v0 = vld [vmem:[#allocation7 + $0x5c0] sm:$0xff] }
 0x105   :  { %v1215_v38 = vld [vmem:[#allocation7 + $0x590] sm:$0xff]  ;;  %v1288_v20 = vld [vmem:[#allocation7 + $0x7d8] sm:$0xff] }
 0x106   :  { %4092 = vmatpush1.bf16.msra.mxu0 %v4091_v48  ;;  %v4367_v48 = vpack.c.bf16 %v1143_v41, %v1135_v39  ;;  %v4385_v39 = vpack.c.bf16 %v1224_v33, %v1216_v31  ;;  %v1230_v41 = vld [vmem:[#allocation7 + $0x608] sm:$0xff]  ;;  %v1304_v31 = vld [vmem:[#allocation7 + $0x858] sm:$0xff] }
 0x107   :  { %4348 = vmatpush1.bf16.msra.mxu1 %v4347_v58  ;;  %4094 = vmatprep.subr.bf16.mxu0 %v4093_v49  ;;  %v4113_v58 = vpack.c.bf16 %v1158_v43, %v1150_v42  ;;  %v1149_v49 = vld [vmem:[#allocation7 + $0x380] sm:$0xff]  ;;  %v1238_v42 = vld [vmem:[#allocation7 + $0x648] sm:$0xff]  ;;  %v1232_v43 = vld [vmem:[#allocation7 + $0x618] sm:$0xff] }
 0x108   :  { %4350 = vmatprep.subr.bf16.mxu1 %v4349_v54  ;;  %v1159_v54 = vld [vmem:[#allocation7 + $0x3d0] sm:$0xff]  ;;  %v4115_v61 = vpack.c.bf16 %v1157_v50, %v1149_v49  ;;  %v1237_v49 = vld [vmem:[#allocation7 + $0x640] sm:$0xff] }
 0x109   :  { %v1231_v50 = vld [vmem:[#allocation7 + $0x610] sm:$0xff] }
 0x10a   :  { %4096 = vmatpush1.bf16.msra.mxu0 %v4095_v62  ;;  %v4371_v62 = vpack.c.bf16 %v1159_v54, %v1151_v51  ;;  %v4389_v51 = vpack.c.bf16 %v1240_v45, %v1232_v43  ;;  %v1246_v54 = vld [vmem:[#allocation7 + $0x688] sm:$0xff] }
 0x10b   :  { %4352 = vmatpush1.bf16.msra.mxu1 %v4351_v10  ;;  %4098 = vmatprep.subr.bf16.mxu0 %v4097_v1  ;;  %v4117_v10 = vpack.c.bf16 %v1174_v56, %v1166_v55  ;;  %v1165_v1 = vld [vmem:[#allocation7 + $0x400] sm:$0xff]  ;;  %v1254_v55 = vld [vmem:[#allocation7 + $0x6c8] sm:$0xff]  ;;  %v1248_v56 = vld [vmem:[#allocation7 + $0x698] sm:$0xff] }
 0x10c   :  { %4354 = vmatprep.subr.bf16.mxu1 %v4353_v5  ;;  %v1175_v5 = vld [vmem:[#allocation7 + $0x450] sm:$0xff]  ;;  %v4119_v63 = vpack.c.bf16 %v1173_v2, %v1165_v1  ;;  %v1253_v1 = vld [vmem:[#allocation7 + $0x6c0] sm:$0xff] }
 0x10d   :  { %v1247_v2 = vld [vmem:[#allocation7 + $0x690] sm:$0xff] }
 0x10e   :  { %4100 = vmatpush1.bf16.msra.mxu0 %v4099_v11  ;;  %v4375_v11 = vpack.c.bf16 %v1175_v5, %v1167_v3  ;;  %v4393_v3 = vpack.c.bf16 %v1256_v57, %v1248_v56  ;;  %v1262_v5 = vld [vmem:[#allocation7 + $0x708] sm:$0xff] }
 0x10f   :  { %4356 = vmatpush1.bf16.msra.mxu1 %v4355_v12  ;;  %4102 = vmatprep.subr.bf16.mxu0 %v4101_v13  ;;  %v4121_v12 = vpack.c.bf16 %v1190_v7, %v1182_v6  ;;  %v1181_v13 = vld [vmem:[#allocation7 + $0x480] sm:$0xff]  ;;  %v1270_v6 = vld [vmem:[#allocation7 + $0x748] sm:$0xff]  ;;  %v1264_v7 = vld [vmem:[#allocation7 + $0x718] sm:$0xff] }
 0x110   :  { %4358 = vmatprep.subr.bf16.mxu1 %v4357_v17  ;;  %v1191_v17 = vld [vmem:[#allocation7 + $0x4d0] sm:$0xff]  ;;  %v4123_v53 = vpack.c.bf16 %v1189_v14, %v1181_v13  ;;  %v1269_v13 = vld [vmem:[#allocation7 + $0x740] sm:$0xff]  ;;  %v1310_v57 = vld [vmem:[#allocation7 + $0x888] sm:$0xff] }
 0x111   :  { %v1263_v14 = vld [vmem:[#allocation7 + $0x710] sm:$0xff] }
 0x112   :  { %4104 = vmatpush1.bf16.msra.mxu0 %v4103_v22  ;;  %v4379_v22 = vpack.c.bf16 %v1191_v17, %v1183_v15  ;;  %v4397_v15 = vpack.c.bf16 %v1272_v8, %v1264_v7  ;;  %v1278_v17 = vld [vmem:[#allocation7 + $0x788] sm:$0xff]  ;;  %v1311_v7 = vld [vmem:[#allocation7 + $0x890] sm:$0xff] }
 0x113   :  { %4360 = vmatpush1.bf16.msra.mxu1 %v4359_v23  ;;  %4106 = vmatprep.subr.bf16.mxu0 %v4105_v24  ;;  %v4125_v23 = vpack.c.bf16 %v1206_v19, %v1198_v18  ;;  %v1197_v24 = vld [vmem:[#allocation7 + $0x500] sm:$0xff]  ;;  %v1286_v18 = vld [vmem:[#allocation7 + $0x7c8] sm:$0xff]  ;;  %v1280_v19 = vld [vmem:[#allocation7 + $0x798] sm:$0xff] }
 0x114   :  { %4362 = vmatprep.subr.bf16.mxu1 %v4361_v28  ;;  %v1207_v28 = vld [vmem:[#allocation7 + $0x550] sm:$0xff]  ;;  %v4127_v34 = vpack.c.bf16 %v1205_v25, %v1197_v24  ;;  %v1285_v24 = vld [vmem:[#allocation7 + $0x7c0] sm:$0xff] }
 0x115   :  { %v1279_v25 = vld [vmem:[#allocation7 + $0x790] sm:$0xff] }
 0x116   :  { %4108 = vmatpush1.bf16.msra.mxu0 %v4107_v35  ;;  %v4383_v35 = vpack.c.bf16 %v1207_v28, %v1199_v26  ;;  %v4401_v26 = vpack.c.bf16 %v1288_v20, %v1280_v19  ;;  %v1294_v28 = vld [vmem:[#allocation7 + $0x808] sm:$0xff]  ;;  %v1319_v8 = vld [vmem:[#allocation7 + $0x8d0] sm:$0xff]  ;;  %v1325_v19 = vld [vmem:[#allocation7 + $0x900] sm:$0xff] }
 0x117   :  { %4364 = vmatpush1.bf16.msra.mxu1 %v4363_v36  ;;  %4110 = vmatprep.subr.bf16.mxu0 %v4109_v37  ;;  %v4129_v36 = vpack.c.bf16 %v1222_v30, %v1214_v29  ;;  %v1213_v37 = vld [vmem:[#allocation7 + $0x580] sm:$0xff]  ;;  %v1302_v29 = vld [vmem:[#allocation7 + $0x848] sm:$0xff]  ;;  %v1296_v30 = vld [vmem:[#allocation7 + $0x818] sm:$0xff] }
 0x118   :  { %4366 = vmatprep.subr.bf16.mxu1 %v4365_v40  ;;  %v1223_v40 = vld [vmem:[#allocation7 + $0x5d0] sm:$0xff]  ;;  %v4131_v46 = vpack.c.bf16 %v1221_v0, %v1213_v37  ;;  %v5663_v37 = vld [vmem:[#allocation6] sm:$0xff]  ;;  %v975_v0 = vsub.s32 2, %v5630_v32  ;;  %v1333_v20 = vld [vmem:[#allocation7 + $0x940] sm:$0xff] }
 0x11a   :  { %4112 = vmatpush1.bf16.msra.mxu0 %v4111_v47  ;;  %v4387_v47 = vpack.c.bf16 %v1223_v40, %v1215_v38  ;;  %v979_v38 = vsub.s32 3, %v5630_v32  ;;  %v976_v40 = vrot.slane %v5663_v37, %v975_v0 }
 0x11b   :  { %4368 = vmatpush1.bf16.msra.mxu1 %v4367_v48  ;;  %4114 = vmatprep.subr.bf16.mxu0 %v4113_v58  ;;  %v4133_v48 = vpack.c.bf16 %v1238_v42, %v1230_v41  ;;  %v1229_v58 = vld [vmem:[#allocation7 + $0x600] sm:$0xff]  ;;  %v972_v41 = vrot.slane %v5663_v37, %v5633_v44 }
 0x11c   :  { %4370 = vmatprep.subr.bf16.mxu1 %v4369_v52  ;;  %v1239_v52 = vld [vmem:[#allocation7 + $0x650] sm:$0xff]  ;;  %v4135_v60 = vpack.c.bf16 %v1237_v49, %v1229_v58  ;;  %v980_v42 = vrot.slane %v5663_v37, %v979_v38 }
 0x11e   :  { %4116 = vmatpush1.bf16.msra.mxu0 %v4115_v61  ;;  %v4391_v61 = vpack.c.bf16 %v1239_v52, %v1231_v50  ;;  %v1295_v52 = vld [vmem:[#allocation7 + $0x810] sm:$0xff] }
 0x11f   :  { %4372 = vmatpush1.bf16.msra.mxu1 %v4371_v62  ;;  %4118 = vmatprep.subr.bf16.mxu0 %v4117_v10  ;;  %v4137_v62 = vpack.c.bf16 %v1254_v55, %v1246_v54  ;;  %v1245_v10 = vld [vmem:[#allocation7 + $0x680] sm:$0xff]  ;;  %v1303_v54 = vld [vmem:[#allocation7 + $0x850] sm:$0xff] }
 0x120   :  { %4374 = vmatprep.subr.bf16.mxu1 %v4373_v4  ;;  %v1255_v4 = vld [vmem:[#allocation7 + $0x6d0] sm:$0xff]  ;;  %v4139_v9 = vpack.c.bf16 %v1253_v1, %v1245_v10  ;;  %v1320_v10 = vld [vmem:[#allocation7 + $0x8d8] sm:$0xff] }
 0x122   :  { %4120 = vmatpush1.bf16.msra.mxu0 %v4119_v63  ;;  %v4395_v63 = vpack.c.bf16 %v1255_v4, %v1247_v2  ;;  %v1309_v4 = vld [vmem:[#allocation7 + $0x880] sm:$0xff] }
 0x123   :  { %4376 = vmatpush1.bf16.msra.mxu1 %v4375_v11  ;;  %4122 = vmatprep.subr.bf16.mxu0 %v4121_v12  ;;  %v4141_v11 = vpack.c.bf16 %v1270_v6, %v1262_v5  ;;  %v1261_v12 = vld [vmem:[#allocation7 + $0x700] sm:$0xff] }
 0x124   :  { %4378 = vmatprep.subr.bf16.mxu1 %v4377_v16  ;;  %v1271_v16 = vld [vmem:[#allocation7 + $0x750] sm:$0xff]  ;;  %v4143_v21 = vpack.c.bf16 %v1269_v13, %v1261_v12  ;;  %v1317_v5 = vld [vmem:[#allocation7 + $0x8c0] sm:$0xff]  ;;  %v1334_v13 = vld [vmem:[#allocation7 + $0x948] sm:$0xff] }
 0x126   :  { %4124 = vmatpush1.bf16.msra.mxu0 %v4123_v53  ;;  %v4399_v53 = vpack.c.bf16 %v1271_v16, %v1263_v14  ;;  %v1328_v14 = vld [vmem:[#allocation7 + $0x918] sm:$0xff] }
 0x127   :  { %4380 = vmatpush1.bf16.msra.mxu1 %v4379_v22  ;;  %4126 = vmatprep.subr.bf16.mxu0 %v4125_v23  ;;  %v4145_v22 = vpack.c.bf16 %v1286_v18, %v1278_v17  ;;  %v1277_v23 = vld [vmem:[#allocation7 + $0x780] sm:$0xff]  ;;  %v4155_v17 = vpack.c.bf16 %v1317_v5, %v1309_v4  ;;  %v4411_v18 = vpack.c.bf16 %v1319_v8, %v1311_v7  ;;  %v1390_v4 = vld [vmem:[#allocation7 + $0xb08] sm:$0xff]  ;;  %v1392_v7 = vld [vmem:[#allocation7 + $0xb18] sm:$0xff] }
 0x128   :  { %4382 = vmatprep.subr.bf16.mxu1 %v4381_v27  ;;  %v1287_v27 = vld [vmem:[#allocation7 + $0x7d0] sm:$0xff]  ;;  %v4147_v33 = vpack.c.bf16 %v1285_v24, %v1277_v23  ;;  %v1342_v24 = vld [vmem:[#allocation7 + $0x988] sm:$0xff]  ;;  %v1400_v8 = vld [vmem:[#allocation7 + $0xb58] sm:$0xff] }
 0x129   :  { %v1335_v23 = vld [vmem:[#allocation7 + $0x950] sm:$0xff]  ;;  %v1398_v5 = vld [vmem:[#allocation7 + $0xb48] sm:$0xff] }
 0x12a   :  { %4128 = vmatpush1.bf16.msra.mxu0 %v4127_v34  ;;  %v4403_v34 = vpack.c.bf16 %v1287_v27, %v1279_v25  ;;  %v1350_v25 = vld [vmem:[#allocation7 + $0x9c8] sm:$0xff]  ;;  %v1352_v27 = vld [vmem:[#allocation7 + $0x9d8] sm:$0xff] }
 0x12b   :  { %4384 = vmatpush1.bf16.msra.mxu1 %v4383_v35  ;;  %4130 = vmatprep.subr.bf16.mxu0 %v4129_v36  ;;  %v4149_v35 = vpack.c.bf16 %v1302_v29, %v1294_v28  ;;  %v4405_v36 = vpack.c.bf16 %v1304_v31, %v1296_v30  ;;  %v4159_v28 = vpack.c.bf16 %v1333_v20, %v1325_v19  ;;  %v1341_v30 = vld [vmem:[#allocation7 + $0x980] sm:$0xff]  ;;  %v1406_v19 = vld [vmem:[#allocation7 + $0xb88] sm:$0xff] }
 0x12c   :  { %4386 = vmatprep.subr.bf16.mxu1 %v4385_v39  ;;  %v968_v39 = vrot.slane %v5663_v37, %v5649_v59  ;;  %v1349_v31 = vld [vmem:[#allocation7 + $0x9c0] sm:$0xff]  ;;  %v1414_v20 = vld [vmem:[#allocation7 + $0xbc8] sm:$0xff] }
 0x12e   :  { %4132 = vmatpush1.bf16.msra.mxu0 %v4131_v46 }
 0x12f   :  { %4388 = vmatpush1.bf16.msra.mxu1 %v4387_v47  ;;  %4134 = vmatprep.subr.bf16.mxu0 %v4133_v48  ;;  %v1293_v48 = vld [vmem:[#allocation7 + $0x800] sm:$0xff] }
 0x130   :  { %4390 = vmatprep.subr.bf16.mxu1 %v4389_v51  ;;  %v1301_v51 = vld [vmem:[#allocation7 + $0x840] sm:$0xff] }
 0x131   :  { %v4151_v2 = vpack.c.bf16 %v1301_v51, %v1293_v48  ;;  %v1367_v51 = vld [vmem:[#allocation7 + $0xa50] sm:$0xff] }
 0x132   :  { %4136 = vmatpush1.bf16.msra.mxu0 %v4135_v60  ;;  %v1318_v60 = vld [vmem:[#allocation7 + $0x8c8] sm:$0xff] }
 0x133   :  { %4392 = vmatpush1.bf16.msra.mxu1 %v4391_v61  ;;  %4138 = vmatprep.subr.bf16.mxu0 %v4137_v62  ;;  %v1312_v62 = vld [vmem:[#allocation7 + $0x898] sm:$0xff] }
 0x134   :  { %4394 = vmatprep.subr.bf16.mxu1 %v4393_v3  ;;  %v4407_v3 = vpack.c.bf16 %v1303_v54, %v1295_v52  ;;  %v4409_v12 = vpack.c.bf16 %v1320_v10, %v1312_v62  ;;  %v1374_v52 = vld [vmem:[#allocation7 + $0xa88] sm:$0xff]  ;;  %v1381_v62 = vld [vmem:[#allocation7 + $0xac0] sm:$0xff] }
 0x135   :  { %v1382_v54 = vld [vmem:[#allocation7 + $0xac8] sm:$0xff] }
 0x136   :  { %4140 = vmatpush1.bf16.msra.mxu0 %v4139_v9  ;;  %v1326_v9 = vld [vmem:[#allocation7 + $0x908] sm:$0xff]  ;;  %v4169_v10 = vpack.c.bf16 %v1382_v54, %v1374_v52  ;;  %v1437_v52 = vld [vmem:[#allocation7 + $0xc80] sm:$0xff] }
 0x137   :  { %4396 = vmatpush1.bf16.msra.mxu1 %v4395_v63  ;;  %4142 = vmatprep.subr.bf16.mxu0 %v4141_v11  ;;  %v4153_v11 = vpack.c.bf16 %v1318_v60, %v1310_v57  ;;  %v1445_v54 = vld [vmem:[#allocation7 + $0xcc0] sm:$0xff] }
 0x138   :  { %4398 = vmatprep.subr.bf16.mxu1 %v4397_v15  ;;  %v1336_v15 = vld [vmem:[#allocation7 + $0x958] sm:$0xff] }
 0x13a   :  { %4144 = vmatpush1.bf16.msra.mxu0 %v4143_v21  ;;  %v4157_v21 = vpack.c.bf16 %v1334_v13, %v1326_v9  ;;  %v1397_v13 = vld [vmem:[#allocation7 + $0xb40] sm:$0xff] }
 0x13b   :  { %4400 = vmatpush1.bf16.msra.mxu1 %v4399_v53  ;;  %4146 = vmatprep.subr.bf16.mxu0 %v4145_v22  ;;  %v4413_v53 = vpack.c.bf16 %v1336_v15, %v1328_v14  ;;  %v1327_v22 = vld [vmem:[#allocation7 + $0x910] sm:$0xff]  ;;  %v4173_v14 = vpack.c.bf16 %v1398_v5, %v1390_v4  ;;  %v4429_v15 = vpack.c.bf16 %v1400_v8, %v1392_v7  ;;  %v983_v4 = vsub.s32 4, %v5630_v32  ;;  %v1453_v7 = vld [vmem:[#allocation7 + $0xd00] sm:$0xff] }
 0x13c   :  { %4402 = vmatprep.subr.bf16.mxu1 %v4401_v26  ;;  %v1344_v26 = vld [vmem:[#allocation7 + $0x998] sm:$0xff]  ;;  %v4415_v29 = vpack.c.bf16 %v1335_v23, %v1327_v22  ;;  %v991_v5 = vsub.s32 6, %v5630_v32  ;;  %v1461_v8 = vld [vmem:[#allocation7 + $0xd40] sm:$0xff] }
 0x13e   :  { %4148 = vmatpush1.bf16.msra.mxu0 %v4147_v33  ;;  %v4161_v33 = vpack.c.bf16 %v1350_v25, %v1342_v24  ;;  %v1405_v24 = vld [vmem:[#allocation7 + $0xb80] sm:$0xff] }
 0x13f   :  { %4404 = vmatpush1.bf16.msra.mxu1 %v4403_v34  ;;  %4150 = vmatprep.subr.bf16.mxu0 %v4149_v35  ;;  %v4417_v34 = vpack.c.bf16 %v1352_v27, %v1344_v26  ;;  %v1343_v35 = vld [vmem:[#allocation7 + $0x990] sm:$0xff]  ;;  %v1413_v25 = vld [vmem:[#allocation7 + $0xbc0] sm:$0xff]  ;;  %v4177_v26 = vpack.c.bf16 %v1414_v20, %v1406_v19  ;;  %v1472_v19 = vld [vmem:[#allocation7 + $0xd98] sm:$0xff] }
 0x140   :  { %4406 = vmatprep.subr.bf16.mxu1 %v4405_v36  ;;  %v1351_v36 = vld [vmem:[#allocation7 + $0x9d0] sm:$0xff]  ;;  %v1480_v20 = vld [vmem:[#allocation7 + $0xdd8] sm:$0xff] }
 0x1a4   :  { %v745_v43 = vpop.f32.mrb[0].mxu0 }
 0x1a5   :  { %v1005_v45 = vadd.f32 %v968_v39, %v745_v43  ;;  %v816_v46 = vpop.f32.mrb[0].mxu1  ;;  %v747_v47 = vpop.f32.mrb[1].mxu0  ;;  %v1358_v39 = vld [vmem:[#allocation7 + $0xa08] sm:$0xff]  ;;  %v4163_v43 = vpack.c.bf16 %v1349_v31, %v1341_v30 }
 0x1a6   :  { %v5677_v58 = vadd.f32 %v976_v40, %v816_v46  ;;  %v1006_v49 = vadd.f32 %v972_v41, %v747_v47  ;;  %v818_v50 = vpop.f32.mrb[1].mxu1  ;;  %v1366_v40 = vld [vmem:[#allocation7 + $0xa48] sm:$0xff]  ;;  %v1360_v41 = vld [vmem:[#allocation7 + $0xa18] sm:$0xff]  ;;  %v1357_v46 = vld [vmem:[#allocation7 + $0xa00] sm:$0xff] }
 0x1a7   :  { %v1021_v55 = vmul.f32 0.01, %v1005_v45  ;;  %v1008_v56 = vadd.f32 %v980_v42, %v818_v50  ;;  %vm1013_vm1 = vcmp.gt.f32.partialorder %v1005_v45, 0.0  ;;  %v1368_v42 = vld [vmem:[#allocation7 + $0xa58] sm:$0xff]  ;;  %v1365_v47 = vld [vmem:[#allocation7 + $0xa40] sm:$0xff]  ;;  %v4165_v48 = vpack.c.bf16 %v1366_v40, %v1358_v39  ;;  %v1359_v50 = vld [vmem:[#allocation7 + $0xa10] sm:$0xff] }
 0x1a8   :  { %vm1014_vm2 = vcmp.gt.f32.partialorder %v1006_v49, 0.0  ;;  %v1022_v61 = vmul.f32 0.01, %v1006_v49  ;;  %v4167_v57 = vpack.c.bf16 %v1365_v47, %v1357_v46  ;;  %v4423_v60 = vpack.c.bf16 %v1367_v51, %v1359_v50  ;;  %v1422_v30 = vld [vmem:[#allocation7 + $0xc08] sm:$0xff]  ;;  %v1421_v39 = vld [vmem:[#allocation7 + $0xc00] sm:$0xff] }
 0x1a9   :  { %v1024_v1 = vmul.f32 0.01, %v1008_v56  ;;  %vm1016_vm3 = vcmp.gt.f32.partialorder %v1008_v56, 0.0  ;;  %v5684_v63 = vsel %vm1013_vm1, %v1005_v45, %v1021_v55  ;;  %v4419_v45 = vpack.c.bf16 %v1351_v36, %v1343_v35  ;;  %v1376_v55 = vld [vmem:[#allocation7 + $0xa98] sm:$0xff]  ;;  %v1430_v31 = vld [vmem:[#allocation7 + $0xc48] sm:$0xff]  ;;  %v1429_v40 = vld [vmem:[#allocation7 + $0xc40] sm:$0xff] }
 0x1aa   :  { %v5679_v6 = vsel %vm1014_vm2, %v1006_v49, %v1022_v61  ;;  %v4421_v49 = vpack.c.bf16 %v1368_v42, %v1360_v41  ;;  %v1373_v61 = vld [vmem:[#allocation7 + $0xa80] sm:$0xff]  ;;  %v4179_v35 = vpack.c.bf16 %v1413_v25, %v1405_v24  ;;  %v4181_v41 = vpack.c.bf16 %v1430_v31, %v1422_v30  ;;  %v1438_v46 = vld [vmem:[#allocation7 + $0xc88] sm:$0xff]  ;;  %v1479_v30 = vld [vmem:[#allocation7 + $0xdd0] sm:$0xff] }
 0x1ab   :  { %2167 = vmatprep.mubr.f32.mxu0 %v5679_v6  ;;  %2451 = vmatprep.mubr.f32.mxu1 %v5679_v6  ;;  %v5689_v16 = vsel %vm1016_vm3, %v1008_v56, %v1024_v1  ;;  %v1384_v56 = vld [vmem:[#allocation7 + $0xad8] sm:$0xff]  ;;  %v4171_v9 = vpack.c.bf16 %v1381_v62, %v1373_v61  ;;  %v1446_v47 = vld [vmem:[#allocation7 + $0xcc8] sm:$0xff]  ;;  %v4183_v50 = vpack.c.bf16 %v1429_v40, %v1421_v39  ;;  %v1469_v24 = vld [vmem:[#allocation7 + $0xd80] sm:$0xff]  ;;  %vm1015_vm4 = vcmp.gt.f32.partialorder %v5677_v58, 0.0 }
 0x1ac   :  { %2168 = vmatmul.mubr.f32.vlgmr.msra.gmra.mrb[4].mxu0 %v5684_v63  ;;  %2452 = vmatmul.mubr.f32.vlgmr.msra.gmra.mrb[4].mxu1 %v5684_v63  ;;  %v4425_v1 = vpack.c.bf16 %v1384_v56, %v1376_v55  ;;  %v4185_v55 = vpack.c.bf16 %v1446_v47, %v1438_v46  ;;  %v1454_v61 = vld [vmem:[#allocation7 + $0xd08] sm:$0xff]  ;;  %v1477_v25 = vld [vmem:[#allocation7 + $0xdc0] sm:$0xff] }
 0x1ad   :  { %4152 = vmatpush1.bf16.msra.mxu0 %v4151_v2  ;;  %4408 = vmatpush1.bf16.msra.mxu1 %v4407_v3  ;;  %v1375_v2 = vld [vmem:[#allocation7 + $0xa90] sm:$0xff]  ;;  %v1462_v62 = vld [vmem:[#allocation7 + $0xd48] sm:$0xff]  ;;  %v4195_v40 = vpack.c.bf16 %v1477_v25, %v1469_v24  ;;  %v1485_v47 = vld [vmem:[#allocation7 + $0xe00] sm:$0xff] }
 0x1ae   :  { %2238 = vmatprep.mubr.f32.mxu0 %v5689_v16  ;;  %2522 = vmatprep.mubr.f32.mxu1 %v5689_v16  ;;  %v1383_v3 = vld [vmem:[#allocation7 + $0xad0] sm:$0xff]  ;;  %v1486_v31 = vld [vmem:[#allocation7 + $0xe08] sm:$0xff] }
 0x1af   :  { %4154 = vmatprep.subr.bf16.mxu0 %v4153_v11  ;;  %4410 = vmatprep.subr.bf16.mxu1 %v4409_v12  ;;  %v4427_v11 = vpack.c.bf16 %v1383_v3, %v1375_v2  ;;  %v1389_v12 = vld [vmem:[#allocation7 + $0xb00] sm:$0xff]  ;;  %v4187_v2 = vpack.c.bf16 %v1445_v54, %v1437_v52  ;;  %v1487_v52 = vld [vmem:[#allocation7 + $0xe10] sm:$0xff]  ;;  %v1534_v25 = vld [vmem:[#allocation7 + $0xf88] sm:$0xff] }
 0x1b0   :  { %v4175_v22 = vpack.c.bf16 %v1397_v13, %v1389_v12  ;;  %v1455_v12 = vld [vmem:[#allocation7 + $0xd10] sm:$0xff] }
 0x1b1   :  { %4156 = vmatpush1.bf16.msra.mxu0 %v4155_v17  ;;  %4412 = vmatpush1.bf16.msra.mxu1 %v4411_v18  ;;  %v1391_v17 = vld [vmem:[#allocation7 + $0xb10] sm:$0xff] }
 0x1b2   :  { %4158 = vmatprep.subr.bf16.mxu0 %v4157_v21  ;;  %4414 = vmatprep.subr.bf16.mxu1 %v4413_v53  ;;  %v1399_v18 = vld [vmem:[#allocation7 + $0xb50] sm:$0xff]  ;;  %v1408_v21 = vld [vmem:[#allocation7 + $0xb98] sm:$0xff] }
 0x1b3   :  { %v1416_v53 = vld [vmem:[#allocation7 + $0xbd8] sm:$0xff]  ;;  %v4431_v23 = vpack.c.bf16 %v1399_v18, %v1391_v17  ;;  %v1463_v13 = vld [vmem:[#allocation7 + $0xd50] sm:$0xff]  ;;  %v995_v17 = vsub.s32 7, %v5630_v32  ;;  %v1478_v18 = vld [vmem:[#allocation7 + $0xdc8] sm:$0xff] }
 0x1b4   :  { %v4433_v27 = vpack.c.bf16 %v1416_v53, %v1408_v21  ;;  %v4191_v21 = vpack.c.bf16 %v1461_v8, %v1453_v7  ;;  %v984_v53 = vrot.slane %v5663_v37, %v983_v4  ;;  %v1495_v54 = vld [vmem:[#allocation7 + $0xe50] sm:$0xff] }
 0x1b5   :  { %4160 = vmatpush1.bf16.msra.mxu0 %v4159_v28  ;;  %4416 = vmatpush1.bf16.msra.mxu1 %v4415_v29  ;;  %v1407_v28 = vld [vmem:[#allocation7 + $0xb90] sm:$0xff] }
 0x1b6   :  { %4162 = vmatprep.subr.bf16.mxu0 %v4161_v33  ;;  %4418 = vmatprep.subr.bf16.mxu1 %v4417_v34  ;;  %v1415_v29 = vld [vmem:[#allocation7 + $0xbd0] sm:$0xff]  ;;  %v1424_v33 = vld [vmem:[#allocation7 + $0xc18] sm:$0xff] }
 0x1b7   :  { %v1432_v34 = vld [vmem:[#allocation7 + $0xc58] sm:$0xff]  ;;  %v4435_v36 = vpack.c.bf16 %v1415_v29, %v1407_v28  ;;  %v4449_v29 = vpack.c.bf16 %v1480_v20, %v1472_v19  ;;  %v1503_v8 = vld [vmem:[#allocation7 + $0xe90] sm:$0xff]  ;;  %v1517_v20 = vld [vmem:[#allocation7 + $0xf00] sm:$0xff] }
 0x1b8   :  { %v4437_v42 = vpack.c.bf16 %v1432_v34, %v1424_v33  ;;  %v1494_v33 = vld [vmem:[#allocation7 + $0xe48] sm:$0xff]  ;;  %v996_v34 = vrot.slane %v5663_v37, %v995_v17  ;;  %v1527_v24 = vld [vmem:[#allocation7 + $0xf50] sm:$0xff] }
 0x1b9   :  { %4164 = vmatpush1.bf16.msra.mxu0 %v4163_v43  ;;  %4420 = vmatpush1.bf16.msra.mxu1 %v4419_v45  ;;  %v1423_v43 = vld [vmem:[#allocation7 + $0xc10] sm:$0xff]  ;;  %v4197_v46 = vpack.c.bf16 %v1494_v33, %v1486_v31  ;;  %v1533_v31 = vld [vmem:[#allocation7 + $0xf80] sm:$0xff] }
 0x1ba   :  { %4166 = vmatprep.subr.bf16.mxu0 %v4165_v48  ;;  %4422 = vmatprep.subr.bf16.mxu1 %v4421_v49  ;;  %v1431_v45 = vld [vmem:[#allocation7 + $0xc50] sm:$0xff]  ;;  %v1440_v48 = vld [vmem:[#allocation7 + $0xc98] sm:$0xff]  ;;  %v1541_v33 = vld [vmem:[#allocation7 + $0xfc0] sm:$0xff] }
 0x1bb   :  { %v1448_v49 = vld [vmem:[#allocation7 + $0xcd8] sm:$0xff]  ;;  %v4439_v51 = vpack.c.bf16 %v1431_v45, %v1423_v43 }
 0x1bc   :  { %v4441_v56 = vpack.c.bf16 %v1448_v49, %v1440_v48  ;;  %v1493_v48 = vld [vmem:[#allocation7 + $0xe40] sm:$0xff] }
 0x1bd   :  { %4168 = vmatpush1.bf16.msra.mxu0 %v4167_v57  ;;  %4424 = vmatpush1.bf16.msra.mxu1 %v4423_v60  ;;  %v1439_v57 = vld [vmem:[#allocation7 + $0xc90] sm:$0xff] }
 0x1be   :  { %4170 = vmatprep.subr.bf16.mxu0 %v4169_v10  ;;  %4426 = vmatprep.subr.bf16.mxu1 %v4425_v1  ;;  %v1447_v60 = vld [vmem:[#allocation7 + $0xcd0] sm:$0xff]  ;;  %v1456_v10 = vld [vmem:[#allocation7 + $0xd18] sm:$0xff] }
 0x1bf   :  { %v1464_v1 = vld [vmem:[#allocation7 + $0xd58] sm:$0xff]  ;;  %v4443_v3 = vpack.c.bf16 %v1447_v60, %v1439_v57  ;;  %v1510_v57 = vld [vmem:[#allocation7 + $0xec8] sm:$0xff] }
 0x1c0   :  { %v1504_v60 = vld [vmem:[#allocation7 + $0xe98] sm:$0xff] }
 0x1c1   :  { %4172 = vmatpush1.bf16.msra.mxu0 %v4171_v9  ;;  %4428 = vmatpush1.bf16.msra.mxu1 %v4427_v11  ;;  %v4189_v9 = vpack.c.bf16 %v1462_v62, %v1454_v61  ;;  %v4445_v11 = vpack.c.bf16 %v1464_v1, %v1456_v10  ;;  %v1512_v61 = vld [vmem:[#allocation7 + $0xed8] sm:$0xff]  ;;  %v4199_v62 = vpack.c.bf16 %v1493_v48, %v1485_v47  ;;  %v1501_v1 = vld [vmem:[#allocation7 + $0xe80] sm:$0xff] }
 0x1c2   :  { %4174 = vmatprep.subr.bf16.mxu0 %v4173_v14  ;;  %4430 = vmatprep.subr.bf16.mxu1 %v4429_v15  ;;  %v987_v14 = vsub.s32 5, %v5630_v32  ;;  %v1470_v15 = vld [vmem:[#allocation7 + $0xd88] sm:$0xff]  ;;  %v4455_v10 = vpack.c.bf16 %v1495_v54, %v1487_v52  ;;  %v4457_v7 = vpack.c.bf16 %v1512_v61, %v1504_v60  ;;  %v1557_v52 = vld [vmem:[#allocation7 + $0x1040] sm:$0xff]  ;;  %v1023_v54 = vmul.f32 0.01, %v5677_v58 }
 0x1c3   :  { %v4193_v28 = vpack.c.bf16 %v1478_v18, %v1470_v15  ;;  %v1528_v15 = vld [vmem:[#allocation7 + $0xf58] sm:$0xff]  ;;  %v1566_v60 = vld [vmem:[#allocation7 + $0x1088] sm:$0xff] }
 0x1c5   :  { %4176 = vmatpush1.bf16.msra.mxu0 %v4175_v22  ;;  %4432 = vmatpush1.bf16.msra.mxu1 %v4431_v23  ;;  %v992_v22 = vrot.slane %v5663_v37, %v991_v5  ;;  %v4447_v23 = vpack.c.bf16 %v1463_v13, %v1455_v12  ;;  %v1526_v12 = vld [vmem:[#allocation7 + $0xf48] sm:$0xff]  ;;  %v1520_v13 = vld [vmem:[#allocation7 + $0xf18] sm:$0xff] }
 0x1c6   :  { %4178 = vmatprep.subr.bf16.mxu0 %v4177_v26  ;;  %4434 = vmatprep.subr.bf16.mxu1 %v4433_v27  ;;  %v1471_v26 = vld [vmem:[#allocation7 + $0xd90] sm:$0xff]  ;;  %v988_v27 = vrot.slane %v5663_v37, %v987_v14 }
 0x1c7   :  { %v4451_v45 = vpack.c.bf16 %v1479_v30, %v1471_v26  ;;  %v1542_v26 = vld [vmem:[#allocation7 + $0xfc8] sm:$0xff] }
 0x1c9   :  { %4180 = vmatpush1.bf16.msra.mxu0 %v4179_v35  ;;  %4436 = vmatpush1.bf16.msra.mxu1 %v4435_v36  ;;  %v1488_v35 = vld [vmem:[#allocation7 + $0xe18] sm:$0xff] }
 0x1ca   :  { %4182 = vmatprep.subr.bf16.mxu0 %v4181_v41  ;;  %4438 = vmatprep.subr.bf16.mxu1 %v4437_v42  ;;  %v1496_v36 = vld [vmem:[#allocation7 + $0xe58] sm:$0xff] }
 0x1cb   :  { %v4453_v37 = vpack.c.bf16 %v1496_v36, %v1488_v35  ;;  %v1535_v36 = vld [vmem:[#allocation7 + $0xf90] sm:$0xff] }
 0x1cd   :  { %4184 = vmatpush1.bf16.msra.mxu0 %v4183_v50  ;;  %4440 = vmatpush1.bf16.msra.mxu1 %v4439_v51 }
 0x1ce   :  { %4186 = vmatprep.subr.bf16.mxu0 %v4185_v55  ;;  %4442 = vmatprep.subr.bf16.mxu1 %v4441_v56  ;;  %v1502_v55 = vld [vmem:[#allocation7 + $0xe88] sm:$0xff] }
 0x1d1   :  { %4188 = vmatpush1.bf16.msra.mxu0 %v4187_v2  ;;  %4444 = vmatpush1.bf16.msra.mxu1 %v4443_v3  ;;  %v1509_v2 = vld [vmem:[#allocation7 + $0xec0] sm:$0xff]  ;;  %v4201_v3 = vpack.c.bf16 %v1510_v57, %v1502_v55  ;;  %v1551_v55 = vld [vmem:[#allocation7 + $0x1010] sm:$0xff] }
 0x1d2   :  { %4190 = vmatprep.subr.bf16.mxu0 %v4189_v9  ;;  %4446 = vmatprep.subr.bf16.mxu1 %v4445_v11  ;;  %v1511_v9 = vld [vmem:[#allocation7 + $0xed0] sm:$0xff]  ;;  %v1518_v11 = vld [vmem:[#allocation7 + $0xf08] sm:$0xff]  ;;  %v4203_v18 = vpack.c.bf16 %v1509_v2, %v1501_v1  ;;  %v1576_v1 = vld [vmem:[#allocation7 + $0x10d8] sm:$0xff] }
 0x1d3   :  { %v4459_v19 = vpack.c.bf16 %v1511_v9, %v1503_v8  ;;  %v1559_v57 = vld [vmem:[#allocation7 + $0x1050] sm:$0xff]  ;;  %v1573_v8 = vld [vmem:[#allocation7 + $0x10c0] sm:$0xff] }
 0x1d4   :  { %v887_v39 = vpop.f32.mrb[2].mxu0  ;;  %v1567_v9 = vld [vmem:[#allocation7 + $0x1090] sm:$0xff] }
 0x1d5   :  { %v5709_v41 = vadd.f32 %v984_v53, %v887_v39  ;;  %v958_v42 = vpop.f32.mrb[2].mxu1  ;;  %4192 = vmatpush1.bf16.msra.mxu0 %v4191_v21  ;;  %4448 = vmatpush1.bf16.msra.mxu1 %v4447_v23  ;;  %v889_v43 = vpop.f32.mrb[3].mxu0  ;;  %v1525_v21 = vld [vmem:[#allocation7 + $0xf40] sm:$0xff]  ;;  %v4205_v53 = vpack.c.bf16 %v1526_v12, %v1518_v11  ;;  %v1519_v23 = vld [vmem:[#allocation7 + $0xf10] sm:$0xff]  ;;  %v5722_v11 = vsel %vm1015_vm4, %v5677_v58, %v1023_v54 }
 0x1d6   :  { %v5711_v49 = vadd.f32 %v992_v22, %v958_v42  ;;  %v5713_v50 = vadd.f32 %v988_v27, %v889_v43  ;;  %v960_v51 = vpop.f32.mrb[3].mxu1  ;;  %4194 = vmatprep.subr.bf16.mxu0 %v4193_v28  ;;  %4450 = vmatprep.subr.bf16.mxu1 %v4449_v29  ;;  %v4461_v22 = vpack.c.bf16 %v1528_v15, %v1520_v13  ;;  %v1536_v27 = vld [vmem:[#allocation7 + $0xf98] sm:$0xff]  ;;  %v1543_v39 = vld [vmem:[#allocation7 + $0xfd0] sm:$0xff]  ;;  %v1558_v42 = vld [vmem:[#allocation7 + $0x1048] sm:$0xff] }
 0x1d7   :  { %v5715_v56 = vadd.f32 %v996_v34, %v960_v51  ;;  %v1544_v28 = vld [vmem:[#allocation7 + $0xfd8] sm:$0xff]  ;;  %v4207_v29 = vpack.c.bf16 %v1525_v21, %v1517_v20  ;;  %v4463_v30 = vpack.c.bf16 %v1527_v24, %v1519_v23  ;;  %v4209_v34 = vpack.c.bf16 %v1542_v26, %v1534_v25  ;;  %v1575_v15 = vld [vmem:[#allocation7 + $0x10d0] sm:$0xff]  ;;  %v1581_v24 = vld [vmem:[#allocation7 + $0x1100] sm:$0xff] }
 0x1d8   :  { %v4465_v35 = vpack.c.bf16 %v1544_v28, %v1536_v27  ;;  %v1552_v43 = vld [vmem:[#allocation7 + $0x1018] sm:$0xff]  ;;  %v4467_v47 = vpack.c.bf16 %v1543_v39, %v1535_v36  ;;  %v1026_v61 = vmul.f32 0.01, %v5713_v50  ;;  %vm1018_vm5 = vcmp.gt.f32.partialorder %v5713_v50, 0.0  ;;  %v1589_v25 = vld [vmem:[#allocation7 + $0x1140] sm:$0xff]  ;;  %v1583_v26 = vld [vmem:[#allocation7 + $0x1110] sm:$0xff] }
 0x1d9   :  { %4196 = vmatpush1.bf16.msra.mxu0 %v4195_v40  ;;  %4452 = vmatpush1.bf16.msra.mxu1 %v4451_v45  ;;  %v1550_v40 = vld [vmem:[#allocation7 + $0x1008] sm:$0xff]  ;;  %v1560_v45 = vld [vmem:[#allocation7 + $0x1058] sm:$0xff]  ;;  %v1591_v28 = vld [vmem:[#allocation7 + $0x1150] sm:$0xff]  ;;  %vm1017_vm6 = vcmp.gt.f32.partialorder %v5709_v41, 0.0  ;;  %vm1020_vm7 = vcmp.gt.f32.partialorder %v5715_v56, 0.0  ;;  %vm1019_vm8 = vcmp.gt.f32.partialorder %v5711_v49, 0.0 }
 0x1da   :  { %4198 = vmatprep.subr.bf16.mxu0 %v4197_v46  ;;  %4454 = vmatprep.subr.bf16.mxu1 %v4453_v37  ;;  %v4211_v46 = vpack.c.bf16 %v1541_v33, %v1533_v31  ;;  %v4213_v48 = vpack.c.bf16 %v1558_v42, %v1550_v40  ;;  %v4469_v51 = vpack.c.bf16 %v1560_v45, %v1552_v43  ;;  %v1549_v37 = vld [vmem:[#allocation7 + $0x1000] sm:$0xff]  ;;  %v1584_v21 = vld [vmem:[#allocation7 + $0x1118] sm:$0xff]  ;;  %v1599_v40 = vld [vmem:[#allocation7 + $0x1190] sm:$0xff] }
 0x1db   :  { %v4215_v2 = vpack.c.bf16 %v1557_v52, %v1549_v37  ;;  %v5729_v20 = vsel %vm1018_vm5, %v5713_v50, %v1026_v61  ;;  %v1598_v50 = vld [vmem:[#allocation7 + $0x1188] sm:$0xff]  ;;  %v1608_v31 = vld [vmem:[#allocation7 + $0x11d8] sm:$0xff]  ;;  %v4223_v33 = vpack.c.bf16 %v1589_v25, %v1581_v24  ;;  %v1597_v36 = vld [vmem:[#allocation7 + $0x1180] sm:$0xff] }
 0x1dc   :  { %v1605_v39 = vld [vmem:[#allocation7 + $0x11c0] sm:$0xff]  ;;  %v1607_v43 = vld [vmem:[#allocation7 + $0x11d0] sm:$0xff]  ;;  %v1614_v45 = vld [vmem:[#allocation7 + $0x1208] sm:$0xff] }
 0x1dd   :  { %4200 = vmatpush1.bf16.msra.mxu0 %v4199_v62  ;;  %4456 = vmatpush1.bf16.msra.mxu1 %v4455_v10  ;;  %v1574_v62 = vld [vmem:[#allocation7 + $0x10c8] sm:$0xff]  ;;  %v1568_v10 = vld [vmem:[#allocation7 + $0x1098] sm:$0xff]  ;;  %v4483_v37 = vpack.c.bf16 %v1607_v43, %v1599_v40  ;;  %v1613_v54 = vld [vmem:[#allocation7 + $0x1200] sm:$0xff] }
 0x1de   :  { %4202 = vmatprep.subr.bf16.mxu0 %v4201_v3  ;;  %4458 = vmatprep.subr.bf16.mxu1 %v4457_v7  ;;  %v4471_v3 = vpack.c.bf16 %v1559_v57, %v1551_v55  ;;  %v1565_v7 = vld [vmem:[#allocation7 + $0x1080] sm:$0xff]  ;;  %v4217_v12 = vpack.c.bf16 %v1574_v62, %v1566_v60  ;;  %v4473_v13 = vpack.c.bf16 %v1576_v1, %v1568_v10  ;;  %v1615_v57 = vld [vmem:[#allocation7 + $0x1210] sm:$0xff]  ;;  %v1630_v62 = vld [vmem:[#allocation7 + $0x1288] sm:$0xff] }
 0x1df   :  { %v4219_v58 = vpack.c.bf16 %v1573_v8, %v1565_v7  ;;  %v1621_v55 = vld [vmem:[#allocation7 + $0x1240] sm:$0xff]  ;;  %v1623_v61 = vld [vmem:[#allocation7 + $0x1250] sm:$0xff]  ;;  %v1638_v10 = vld [vmem:[#allocation7 + $0x12c8] sm:$0xff] }
 0x1e0   :  { %v1632_v1 = vld [vmem:[#allocation7 + $0x1298] sm:$0xff]  ;;  %v4487_v7 = vpack.c.bf16 %v1623_v61, %v1615_v57  ;;  %v4233_v8 = vpack.c.bf16 %v1638_v10, %v1630_v62  ;;  %v1645_v25 = vld [vmem:[#allocation7 + $0x1300] sm:$0xff]  ;;  %v1687_v62 = vld [vmem:[#allocation7 + $0x1450] sm:$0xff] }
 0x1e1   :  { %4204 = vmatpush1.bf16.msra.mxu0 %v4203_v18  ;;  %4460 = vmatpush1.bf16.msra.mxu1 %v4459_v19  ;;  %v1582_v18 = vld [vmem:[#allocation7 + $0x1108] sm:$0xff]  ;;  %v1669_v40 = vld [vmem:[#allocation7 + $0x13c0] sm:$0xff] }
 0x1e2   :  { %4206 = vmatprep.subr.bf16.mxu0 %v4205_v53  ;;  %4462 = vmatprep.subr.bf16.mxu1 %v4461_v22  ;;  %v1590_v19 = vld [vmem:[#allocation7 + $0x1148] sm:$0xff]  ;;  %v1592_v53 = vld [vmem:[#allocation7 + $0x1158] sm:$0xff]  ;;  %v4475_v22 = vpack.c.bf16 %v1575_v15, %v1567_v9  ;;  %v1629_v9 = vld [vmem:[#allocation7 + $0x1280] sm:$0xff] }
 0x1e3   :  { %v4221_v23 = vpack.c.bf16 %v1590_v19, %v1582_v18  ;;  %v4477_v27 = vpack.c.bf16 %v1592_v53, %v1584_v21  ;;  %v1639_v18 = vld [vmem:[#allocation7 + $0x12d0] sm:$0xff]  ;;  %v1646_v19 = vld [vmem:[#allocation7 + $0x1308] sm:$0xff]  ;;  %v1648_v53 = vld [vmem:[#allocation7 + $0x1318] sm:$0xff] }
 0x1e4   :  { %v1654_v21 = vld [vmem:[#allocation7 + $0x1348] sm:$0xff]  ;;  %v1685_v57 = vld [vmem:[#allocation7 + $0x1440] sm:$0xff] }
 0x1e5   :  { %4208 = vmatpush1.bf16.msra.mxu0 %v4207_v29  ;;  %4464 = vmatpush1.bf16.msra.mxu1 %v4463_v30  ;;  %v1606_v29 = vld [vmem:[#allocation7 + $0x11c8] sm:$0xff]  ;;  %v1600_v30 = vld [vmem:[#allocation7 + $0x1198] sm:$0xff]  ;;  %v4237_v24 = vpack.c.bf16 %v1654_v21, %v1646_v19  ;;  %v1703_v19 = vld [vmem:[#allocation7 + $0x14d0] sm:$0xff] }
 0x1e6   :  { %4210 = vmatprep.subr.bf16.mxu0 %v4209_v34  ;;  %4466 = vmatprep.subr.bf16.mxu1 %v4465_v35  ;;  %v4479_v34 = vpack.c.bf16 %v1591_v28, %v1583_v26  ;;  %v4225_v35 = vpack.c.bf16 %v1606_v29, %v1598_v50  ;;  %v4481_v42 = vpack.c.bf16 %v1608_v31, %v1600_v30  ;;  %v1653_v26 = vld [vmem:[#allocation7 + $0x1340] sm:$0xff]  ;;  %v1655_v50 = vld [vmem:[#allocation7 + $0x1350] sm:$0xff]  ;;  %v1662_v29 = vld [vmem:[#allocation7 + $0x1388] sm:$0xff] }
 0x1e7   :  { %v1670_v30 = vld [vmem:[#allocation7 + $0x13c8] sm:$0xff]  ;;  %v1664_v31 = vld [vmem:[#allocation7 + $0x1398] sm:$0xff] }
 0x1e8   :  { %v1694_v10 = vld [vmem:[#allocation7 + $0x1488] sm:$0xff] }
 0x1e9   :  { %4212 = vmatpush1.bf16.msra.mxu0 %v4211_v46  ;;  %4468 = vmatpush1.bf16.msra.mxu1 %v4467_v47  ;;  %v1622_v46 = vld [vmem:[#allocation7 + $0x1248] sm:$0xff]  ;;  %v1616_v47 = vld [vmem:[#allocation7 + $0x1218] sm:$0xff] }
 0x1ea   :  { %4214 = vmatprep.subr.bf16.mxu0 %v4213_v48  ;;  %4470 = vmatprep.subr.bf16.mxu1 %v4469_v51  ;;  %v1624_v48 = vld [vmem:[#allocation7 + $0x1258] sm:$0xff]  ;;  %v4227_v51 = vpack.c.bf16 %v1605_v39, %v1597_v36  ;;  %v4229_v52 = vpack.c.bf16 %v1622_v46, %v1614_v45  ;;  %v4241_v36 = vpack.c.bf16 %v1670_v30, %v1662_v29  ;;  %v1661_v39 = vld [vmem:[#allocation7 + $0x1380] sm:$0xff]  ;;  %v1671_v45 = vld [vmem:[#allocation7 + $0x13d0] sm:$0xff] }
 0x1eb   :  { %v4485_v60 = vpack.c.bf16 %v1624_v48, %v1616_v47  ;;  %v1678_v46 = vld [vmem:[#allocation7 + $0x1408] sm:$0xff]  ;;  %v1680_v48 = vld [vmem:[#allocation7 + $0x1418] sm:$0xff]  ;;  %v1719_v29 = vld [vmem:[#allocation7 + $0x1550] sm:$0xff] }
 0x1ec   :  { %2239 = vmatmul.mubr.f32.vlgmr.msra.gmra.mrb[4].mxu0 %v5722_v11  ;;  %2523 = vmatmul.mubr.f32.vlgmr.msra.gmra.mrb[4].mxu1 %v5722_v11  ;;  %v1686_v47 = vld [vmem:[#allocation7 + $0x1448] sm:$0xff] }
 0x1ed   :  { %4216 = vmatpush1.bf16.msra.mxu0 %v4215_v2  ;;  %2309 = vmatprep.mubr.f32.mxu0 %v5729_v20  ;;  %v1640_v2 = vld [vmem:[#allocation7 + $0x12d8] sm:$0xff]  ;;  %v1710_v21 = vld [vmem:[#allocation7 + $0x1508] sm:$0xff] }
 0x1ee   :  { %4472 = vmatpush1.bf16.msra.mxu1 %v4471_v3  ;;  %2593 = vmatprep.mubr.f32.mxu1 %v5729_v20  ;;  %v4231_v3 = vpack.c.bf16 %v1621_v55, %v1613_v54  ;;  %v4489_v15 = vpack.c.bf16 %v1640_v2, %v1632_v1  ;;  %v4245_v54 = vpack.c.bf16 %v1686_v47, %v1678_v46  ;;  %v1677_v55 = vld [vmem:[#allocation7 + $0x1400] sm:$0xff]  ;;  %v1702_v1 = vld [vmem:[#allocation7 + $0x14c8] sm:$0xff]  ;;  %v1696_v2 = vld [vmem:[#allocation7 + $0x1498] sm:$0xff] }
 0x1ef   :  { %4218 = vmatprep.subr.bf16.mxu0 %v4217_v12  ;;  %4474 = vmatprep.subr.bf16.mxu1 %v4473_v13  ;;  %v1637_v12 = vld [vmem:[#allocation7 + $0x12c0] sm:$0xff]  ;;  %v1631_v13 = vld [vmem:[#allocation7 + $0x1290] sm:$0xff]  ;;  %v1726_v30 = vld [vmem:[#allocation7 + $0x1588] sm:$0xff] }
 0x1f0   :  { %v1735_v46 = vld [vmem:[#allocation7 + $0x15d0] sm:$0xff]  ;;  %v1742_v47 = vld [vmem:[#allocation7 + $0x1608] sm:$0xff] }
 0x1f1   :  { %4220 = vmatpush1.bf16.msra.mxu0 %v4219_v58  ;;  %v1656_v58 = vld [vmem:[#allocation7 + $0x1358] sm:$0xff] }
 0x1f2   :  { %4476 = vmatpush1.bf16.msra.mxu1 %v4475_v22  ;;  %4222 = vmatprep.subr.bf16.mxu0 %v4221_v23  ;;  %v4235_v22 = vpack.c.bf16 %v1637_v12, %v1629_v9  ;;  %v4491_v23 = vpack.c.bf16 %v1639_v18, %v1631_v13  ;;  %v4493_v28 = vpack.c.bf16 %v1656_v58, %v1648_v53  ;;  %v1693_v12 = vld [vmem:[#allocation7 + $0x1480] sm:$0xff]  ;;  %v1718_v53 = vld [vmem:[#allocation7 + $0x1548] sm:$0xff]  ;;  %v1712_v58 = vld [vmem:[#allocation7 + $0x1518] sm:$0xff] }
 0x1f3   :  { %4478 = vmatprep.subr.bf16.mxu1 %v4477_v27  ;;  %v1647_v27 = vld [vmem:[#allocation7 + $0x1310] sm:$0xff]  ;;  %v4249_v9 = vpack.c.bf16 %v1702_v1, %v1694_v10  ;;  %v1701_v13 = vld [vmem:[#allocation7 + $0x14c0] sm:$0xff]  ;;  %v1758_v1 = vld [vmem:[#allocation7 + $0x1688] sm:$0xff] }
 0x1f4   :  { %v1751_v10 = vld [vmem:[#allocation7 + $0x1650] sm:$0xff] }
 0x1f5   :  { %4224 = vmatpush1.bf16.msra.mxu0 %v4223_v33  ;;  %v1672_v33 = vld [vmem:[#allocation7 + $0x13d8] sm:$0xff] }
 0x1f6   :  { %4480 = vmatpush1.bf16.msra.mxu1 %v4479_v34  ;;  %4226 = vmatprep.subr.bf16.mxu0 %v4225_v35  ;;  %v4239_v34 = vpack.c.bf16 %v1653_v26, %v1645_v25  ;;  %v4495_v35 = vpack.c.bf16 %v1655_v50, %v1647_v27  ;;  %v4497_v43 = vpack.c.bf16 %v1672_v33, %v1664_v31  ;;  %v1709_v26 = vld [vmem:[#allocation7 + $0x1500] sm:$0xff]  ;;  %v1734_v31 = vld [vmem:[#allocation7 + $0x15c8] sm:$0xff]  ;;  %v1728_v33 = vld [vmem:[#allocation7 + $0x1598] sm:$0xff] }
 0x1f7   :  { %4482 = vmatprep.subr.bf16.mxu1 %v4481_v42  ;;  %v1663_v42 = vld [vmem:[#allocation7 + $0x1390] sm:$0xff]  ;;  %v4253_v25 = vpack.c.bf16 %v1718_v53, %v1710_v21  ;;  %v1717_v27 = vld [vmem:[#allocation7 + $0x1540] sm:$0xff]  ;;  %v1774_v53 = vld [vmem:[#allocation7 + $0x1708] sm:$0xff] }
 0x1f8   :  { %v1767_v21 = vld [vmem:[#allocation7 + $0x16d0] sm:$0xff] }
 0x1f9   :  { %4228 = vmatpush1.bf16.msra.mxu0 %v4227_v51  ;;  %v1688_v51 = vld [vmem:[#allocation7 + $0x1458] sm:$0xff] }
 0x1fa   :  { %4484 = vmatpush1.bf16.msra.mxu1 %v4483_v37  ;;  %4230 = vmatprep.subr.bf16.mxu0 %v4229_v52  ;;  %v4243_v37 = vpack.c.bf16 %v1669_v40, %v1661_v39  ;;  %v4499_v52 = vpack.c.bf16 %v1671_v45, %v1663_v42  ;;  %v4501_v61 = vpack.c.bf16 %v1688_v51, %v1680_v48  ;;  %v1725_v40 = vld [vmem:[#allocation7 + $0x1580] sm:$0xff]  ;;  %v1750_v48 = vld [vmem:[#allocation7 + $0x1648] sm:$0xff]  ;;  %v1744_v51 = vld [vmem:[#allocation7 + $0x1618] sm:$0xff] }
 0x1fb   :  { %4486 = vmatprep.subr.bf16.mxu1 %v4485_v60  ;;  %v1679_v60 = vld [vmem:[#allocation7 + $0x1410] sm:$0xff]  ;;  %v4257_v39 = vpack.c.bf16 %v1734_v31, %v1726_v30  ;;  %v1733_v42 = vld [vmem:[#allocation7 + $0x15c0] sm:$0xff]  ;;  %v1790_v31 = vld [vmem:[#allocation7 + $0x1788] sm:$0xff] }
 0x1fc   :  { %v1783_v30 = vld [vmem:[#allocation7 + $0x1750] sm:$0xff] }
 0x1fd   :  { %4232 = vmatpush1.bf16.msra.mxu0 %v4231_v3  ;;  %v1704_v3 = vld [vmem:[#allocation7 + $0x14d8] sm:$0xff] }
 0x1fe   :  { %4488 = vmatpush1.bf16.msra.mxu1 %v4487_v7  ;;  %4234 = vmatprep.subr.bf16.mxu0 %v4233_v8  ;;  %v4247_v7 = vpack.c.bf16 %v1685_v57, %v1677_v55  ;;  %v4503_v8 = vpack.c.bf16 %v1687_v62, %v1679_v60  ;;  %v4505_v18 = vpack.c.bf16 %v1704_v3, %v1696_v2  ;;  %v1741_v57 = vld [vmem:[#allocation7 + $0x1600] sm:$0xff]  ;;  %v1766_v2 = vld [vmem:[#allocation7 + $0x16c8] sm:$0xff]  ;;  %v1760_v3 = vld [vmem:[#allocation7 + $0x1698] sm:$0xff] }
 0x1ff   :  { %4490 = vmatprep.subr.bf16.mxu1 %v4489_v15  ;;  %v1695_v15 = vld [vmem:[#allocation7 + $0x1490] sm:$0xff]  ;;  %v4261_v55 = vpack.c.bf16 %v1750_v48, %v1742_v47  ;;  %v1749_v60 = vld [vmem:[#allocation7 + $0x1640] sm:$0xff]  ;;  %v1806_v48 = vld [vmem:[#allocation7 + $0x1808] sm:$0xff] }
 0x200   :  { %v1799_v47 = vld [vmem:[#allocation7 + $0x17d0] sm:$0xff] }
 0x201   :  { %4236 = vmatpush1.bf16.msra.mxu0 %v4235_v22  ;;  %v1720_v22 = vld [vmem:[#allocation7 + $0x1558] sm:$0xff] }
 0x202   :  { %4492 = vmatpush1.bf16.msra.mxu1 %v4491_v23  ;;  %4238 = vmatprep.subr.bf16.mxu0 %v4237_v24  ;;  %v4251_v23 = vpack.c.bf16 %v1701_v13, %v1693_v12  ;;  %v4507_v24 = vpack.c.bf16 %v1703_v19, %v1695_v15  ;;  %v4509_v50 = vpack.c.bf16 %v1720_v22, %v1712_v58  ;;  %v1757_v13 = vld [vmem:[#allocation7 + $0x1680] sm:$0xff]  ;;  %v1782_v58 = vld [vmem:[#allocation7 + $0x1748] sm:$0xff]  ;;  %v1776_v22 = vld [vmem:[#allocation7 + $0x1718] sm:$0xff] }
 0x203   :  { %4494 = vmatprep.subr.bf16.mxu1 %v4493_v28  ;;  %v1711_v28 = vld [vmem:[#allocation7 + $0x1510] sm:$0xff]  ;;  %v4265_v12 = vpack.c.bf16 %v1766_v2, %v1758_v1  ;;  %v1765_v15 = vld [vmem:[#allocation7 + $0x16c0] sm:$0xff] }
 0x204   :  { %v1807_v1 = vld [vmem:[#allocation7 + $0x1810] sm:$0xff] }
 0x205   :  { %4240 = vmatpush1.bf16.msra.mxu0 %v4239_v34  ;;  %v1736_v34 = vld [vmem:[#allocation7 + $0x15d8] sm:$0xff]  ;;  %v1815_v2 = vld [vmem:[#allocation7 + $0x1850] sm:$0xff] }
 0x206   :  { %4496 = vmatpush1.bf16.msra.mxu1 %v4495_v35  ;;  %4242 = vmatprep.subr.bf16.mxu0 %v4241_v36  ;;  %v4255_v35 = vpack.c.bf16 %v1717_v27, %v1709_v26  ;;  %v4511_v36 = vpack.c.bf16 %v1719_v29, %v1711_v28  ;;  %v4513_v45 = vpack.c.bf16 %v1736_v34, %v1728_v33  ;;  %v1773_v27 = vld [vmem:[#allocation7 + $0x1700] sm:$0xff]  ;;  %v1798_v33 = vld [vmem:[#allocation7 + $0x17c8] sm:$0xff]  ;;  %v1792_v34 = vld [vmem:[#allocation7 + $0x1798] sm:$0xff] }
 0x207   :  { %4498 = vmatprep.subr.bf16.mxu1 %v4497_v43  ;;  %v1727_v43 = vld [vmem:[#allocation7 + $0x1590] sm:$0xff]  ;;  %v4269_v26 = vpack.c.bf16 %v1782_v58, %v1774_v53  ;;  %v1781_v28 = vld [vmem:[#allocation7 + $0x1740] sm:$0xff] }
 0x209   :  { %4244 = vmatpush1.bf16.msra.mxu0 %v4243_v37  ;;  %v1752_v37 = vld [vmem:[#allocation7 + $0x1658] sm:$0xff] }
 0x20a   :  { %4500 = vmatpush1.bf16.msra.mxu1 %v4499_v52  ;;  %4246 = vmatprep.subr.bf16.mxu0 %v4245_v54  ;;  %v4259_v52 = vpack.c.bf16 %v1733_v42, %v1725_v40  ;;  %v4515_v54 = vpack.c.bf16 %v1735_v46, %v1727_v43  ;;  %v4517_v62 = vpack.c.bf16 %v1752_v37, %v1744_v51  ;;  %v1789_v42 = vld [vmem:[#allocation7 + $0x1780] sm:$0xff]  ;;  %v1814_v51 = vld [vmem:[#allocation7 + $0x1848] sm:$0xff]  ;;  %v1808_v37 = vld [vmem:[#allocation7 + $0x1818] sm:$0xff] }
 0x20b   :  { %4502 = vmatprep.subr.bf16.mxu1 %v4501_v61  ;;  %v1743_v61 = vld [vmem:[#allocation7 + $0x1610] sm:$0xff]  ;;  %v4273_v40 = vpack.c.bf16 %v1798_v33, %v1790_v31  ;;  %v1797_v43 = vld [vmem:[#allocation7 + $0x17c0] sm:$0xff] }
 0x20c   :  { %v1845_v31 = vld [vmem:[#allocation7 + $0x1940] sm:$0xff]  ;;  %v1839_v33 = vld [vmem:[#allocation7 + $0x1910] sm:$0xff] }
 0x20d   :  { %4248 = vmatpush1.bf16.msra.mxu0 %v4247_v7  ;;  %v1768_v7 = vld [vmem:[#allocation7 + $0x16d8] sm:$0xff] }
 0x20e   :  { %4504 = vmatpush1.bf16.msra.mxu1 %v4503_v8  ;;  %4250 = vmatprep.subr.bf16.mxu0 %v4249_v9  ;;  %v4263_v8 = vpack.c.bf16 %v1749_v60, %v1741_v57  ;;  %v4519_v9 = vpack.c.bf16 %v1751_v10, %v1743_v61  ;;  %v4521_v19 = vpack.c.bf16 %v1768_v7, %v1760_v3  ;;  %v1805_v60 = vld [vmem:[#allocation7 + $0x1800] sm:$0xff]  ;;  %v1822_v3 = vld [vmem:[#allocation7 + $0x1888] sm:$0xff] }
 0x20f   :  { %4506 = vmatprep.subr.bf16.mxu1 %v4505_v18  ;;  %v1759_v18 = vld [vmem:[#allocation7 + $0x1690] sm:$0xff]  ;;  %v4277_v57 = vpack.c.bf16 %v1814_v51, %v1806_v48  ;;  %v1813_v61 = vld [vmem:[#allocation7 + $0x1840] sm:$0xff]  ;;  %v1830_v7 = vld [vmem:[#allocation7 + $0x18c8] sm:$0xff] }
 0x210   :  { %v4281_v58 = vpack.c.bf16 %v1830_v7, %v1822_v3  ;;  %v1855_v48 = vld [vmem:[#allocation7 + $0x1990] sm:$0xff] }
 0x211   :  { %4252 = vmatpush1.bf16.msra.mxu0 %v4251_v23  ;;  %v1784_v23 = vld [vmem:[#allocation7 + $0x1758] sm:$0xff]  ;;  %v1879_v7 = vld [vmem:[#allocation7 + $0x1a50] sm:$0xff] }
 0x212   :  { %4508 = vmatpush1.bf16.msra.mxu1 %v4507_v24  ;;  %4254 = vmatprep.subr.bf16.mxu0 %v4253_v25  ;;  %v4267_v24 = vpack.c.bf16 %v1765_v15, %v1757_v13  ;;  %v4523_v25 = vpack.c.bf16 %v1767_v21, %v1759_v18  ;;  %v4525_v29 = vpack.c.bf16 %v1784_v23, %v1776_v22  ;;  %v1832_v13 = vld [vmem:[#allocation7 + $0x18d8] sm:$0xff]  ;;  %v1821_v18 = vld [vmem:[#allocation7 + $0x1880] sm:$0xff]  ;;  %v1823_v21 = vld [vmem:[#allocation7 + $0x1890] sm:$0xff] }
 0x213   :  { %4510 = vmatprep.subr.bf16.mxu1 %v4509_v50  ;;  %v1775_v50 = vld [vmem:[#allocation7 + $0x1710] sm:$0xff]  ;;  %v4535_v15 = vpack.c.bf16 %v1815_v2, %v1807_v1  ;;  %v1838_v23 = vld [vmem:[#allocation7 + $0x1908] sm:$0xff]  ;;  %v1877_v1 = vld [vmem:[#allocation7 + $0x1a40] sm:$0xff] }
 0x214   :  { %v1831_v22 = vld [vmem:[#allocation7 + $0x18d0] sm:$0xff] }
 0x215   :  { %4256 = vmatpush1.bf16.msra.mxu0 %v4255_v35  ;;  %v1800_v35 = vld [vmem:[#allocation7 + $0x17d8] sm:$0xff]  ;;  %v1871_v2 = vld [vmem:[#allocation7 + $0x1a10] sm:$0xff] }
 0x216   :  { %4512 = vmatpush1.bf16.msra.mxu1 %v4511_v36  ;;  %4258 = vmatprep.subr.bf16.mxu0 %v4257_v39  ;;  %v4271_v36 = vpack.c.bf16 %v1781_v28, %v1773_v27  ;;  %v4527_v39 = vpack.c.bf16 %v1783_v30, %v1775_v50  ;;  %v4529_v46 = vpack.c.bf16 %v1800_v35, %v1792_v34  ;;  %v1848_v27 = vld [vmem:[#allocation7 + $0x1958] sm:$0xff]  ;;  %v1837_v30 = vld [vmem:[#allocation7 + $0x1900] sm:$0xff]  ;;  %v1847_v35 = vld [vmem:[#allocation7 + $0x1950] sm:$0xff] }
 0x217   :  { %4514 = vmatprep.subr.bf16.mxu1 %v4513_v45  ;;  %v1791_v45 = vld [vmem:[#allocation7 + $0x1790] sm:$0xff]  ;;  %v4539_v50 = vpack.c.bf16 %v1831_v22, %v1823_v21  ;;  %v1885_v21 = vld [vmem:[#allocation7 + $0x1a80] sm:$0xff] }
 0x218   :  { %v1887_v22 = vld [vmem:[#allocation7 + $0x1a90] sm:$0xff] }
 0x219   :  { %4260 = vmatpush1.bf16.msra.mxu0 %v4259_v52  ;;  %v1816_v52 = vld [vmem:[#allocation7 + $0x1858] sm:$0xff] }
 0x21a   :  { %4516 = vmatpush1.bf16.msra.mxu1 %v4515_v54  ;;  %4262 = vmatprep.subr.bf16.mxu0 %v4261_v55  ;;  %v4275_v54 = vpack.c.bf16 %v1797_v43, %v1789_v42  ;;  %v4531_v55 = vpack.c.bf16 %v1799_v47, %v1791_v45  ;;  %v4533_v10 = vpack.c.bf16 %v1816_v52, %v1808_v37  ;;  %v1861_v47 = vld [vmem:[#allocation7 + $0x19c0] sm:$0xff]  ;;  %v1863_v37 = vld [vmem:[#allocation7 + $0x19d0] sm:$0xff]  ;;  %v1870_v52 = vld [vmem:[#allocation7 + $0x1a08] sm:$0xff] }
 0x21b   :  { %4518 = vmatprep.subr.bf16.mxu1 %v4517_v62  ;;  %v1025_v62 = vmul.f32 0.01, %v5709_v41  ;;  %v4287_v42 = vpack.c.bf16 %v1845_v31, %v1837_v30  ;;  %v4543_v43 = vpack.c.bf16 %v1847_v35, %v1839_v33  ;;  %v1901_v31 = vld [vmem:[#allocation7 + $0x1b00] sm:$0xff] }
 0x21c   :  { %v1909_v33 = vld [vmem:[#allocation7 + $0x1b40] sm:$0xff] }
 0x21d   :  { %4264 = vmatpush1.bf16.msra.mxu0 %v4263_v8  ;;  %v1028_v8 = vmul.f32 0.01, %v5715_v56  ;;  %v5738_v53 = vsel %vm1017_vm6, %v5709_v41, %v1025_v62 }
 0x21e   :  { %4520 = vmatpush1.bf16.msra.mxu1 %v4519_v9  ;;  %4266 = vmatprep.subr.bf16.mxu0 %v4265_v12  ;;  %v4279_v9 = vpack.c.bf16 %v1813_v61, %v1805_v60  ;;  %v1824_v12 = vld [vmem:[#allocation7 + $0x1898] sm:$0xff]  ;;  %v4547_v61 = vpack.c.bf16 %v1863_v37, %v1855_v48  ;;  %v1925_v48 = vld [vmem:[#allocation7 + $0x1bc0] sm:$0xff] }
 0x21f   :  { %4522 = vmatprep.subr.bf16.mxu1 %v4521_v19  ;;  %v1829_v19 = vld [vmem:[#allocation7 + $0x18c0] sm:$0xff]  ;;  %v5745_v28 = vsel %vm1020_vm7, %v5715_v56, %v1028_v8  ;;  %v1864_v56 = vld [vmem:[#allocation7 + $0x19d8] sm:$0xff]  ;;  %v1886_v8 = vld [vmem:[#allocation7 + $0x1a88] sm:$0xff] }
 0x220   :  { %v4283_v41 = vpack.c.bf16 %v1829_v19, %v1821_v18  ;;  %v4551_v18 = vpack.c.bf16 %v1879_v7, %v1871_v2  ;;  %v1941_v2 = vld [vmem:[#allocation7 + $0x1c40] sm:$0xff] }
 0x221   :  { %4268 = vmatpush1.bf16.msra.mxu0 %v4267_v24  ;;  %v1846_v24 = vld [vmem:[#allocation7 + $0x1948] sm:$0xff] }
 0x222   :  { %4524 = vmatpush1.bf16.msra.mxu1 %v4523_v25  ;;  %4270 = vmatprep.subr.bf16.mxu0 %v4269_v26  ;;  %v4537_v25 = vpack.c.bf16 %v1832_v13, %v1824_v12  ;;  %v1840_v26 = vld [vmem:[#allocation7 + $0x1918] sm:$0xff] }
 0x223   :  { %4526 = vmatprep.subr.bf16.mxu1 %v4525_v29  ;;  %v4285_v29 = vpack.c.bf16 %v1846_v24, %v1838_v23  ;;  %v4541_v34 = vpack.c.bf16 %v1848_v27, %v1840_v26  ;;  %v1888_v12 = vld [vmem:[#allocation7 + $0x1a98] sm:$0xff]  ;;  %v1895_v24 = vld [vmem:[#allocation7 + $0x1ad0] sm:$0xff]  ;;  %v1910_v26 = vld [vmem:[#allocation7 + $0x1b48] sm:$0xff] }
 0x224   :  { %v1896_v13 = vld [vmem:[#allocation7 + $0x1ad8] sm:$0xff] }
 0x225   :  { %4272 = vmatpush1.bf16.msra.mxu0 %v4271_v36  ;;  %v1854_v36 = vld [vmem:[#allocation7 + $0x1988] sm:$0xff]  ;;  %v4553_v23 = vpack.c.bf16 %v1896_v13, %v1888_v12  ;;  %v1904_v27 = vld [vmem:[#allocation7 + $0x1b18] sm:$0xff] }
 0x226   :  { %4528 = vmatpush1.bf16.msra.mxu1 %v4527_v39  ;;  %4274 = vmatprep.subr.bf16.mxu0 %v4273_v40  ;;  %v1862_v39 = vld [vmem:[#allocation7 + $0x19c8] sm:$0xff]  ;;  %v1856_v40 = vld [vmem:[#allocation7 + $0x1998] sm:$0xff] }
 0x227   :  { %4530 = vmatprep.subr.bf16.mxu1 %v4529_v46  ;;  %v4289_v45 = vpack.c.bf16 %v1862_v39, %v1854_v36  ;;  %v1853_v46 = vld [vmem:[#allocation7 + $0x1980] sm:$0xff]  ;;  %v4545_v51 = vpack.c.bf16 %v1864_v56, %v1856_v40  ;;  %v1911_v36 = vld [vmem:[#allocation7 + $0x1b50] sm:$0xff]  ;;  %v1918_v39 = vld [vmem:[#allocation7 + $0x1b88] sm:$0xff] }
 0x228   :  { %v4291_v60 = vpack.c.bf16 %v1861_v47, %v1853_v46  ;;  %v1926_v40 = vld [vmem:[#allocation7 + $0x1bc8] sm:$0xff]  ;;  %v1920_v56 = vld [vmem:[#allocation7 + $0x1b98] sm:$0xff]  ;;  %v1917_v47 = vld [vmem:[#allocation7 + $0x1b80] sm:$0xff] }
 0x229   :  { %4276 = vmatpush1.bf16.msra.mxu0 %v4275_v54  ;;  %v1878_v54 = vld [vmem:[#allocation7 + $0x1a48] sm:$0xff]  ;;  %v4305_v46 = vpack.c.bf16 %v1926_v40, %v1918_v39  ;;  %v1952_v13 = vld [vmem:[#allocation7 + $0x1c98] sm:$0xff]  ;;  %v1975_v39 = vld [vmem:[#allocation7 + $0x1d50] sm:$0xff] }
 0x22a   :  { %4532 = vmatpush1.bf16.msra.mxu1 %v4531_v55  ;;  %4278 = vmatprep.subr.bf16.mxu0 %v4277_v57  ;;  %v1872_v55 = vld [vmem:[#allocation7 + $0x1a18] sm:$0xff]  ;;  %v4293_v62 = vpack.c.bf16 %v1878_v54, %v1870_v52  ;;  %v1927_v52 = vld [vmem:[#allocation7 + $0x1bd0] sm:$0xff]  ;;  %v1934_v54 = vld [vmem:[#allocation7 + $0x1c08] sm:$0xff] }
 0x22b   :  { %4534 = vmatprep.subr.bf16.mxu1 %v4533_v10  ;;  %v1880_v57 = vld [vmem:[#allocation7 + $0x1a58] sm:$0xff]  ;;  %v1869_v10 = vld [vmem:[#allocation7 + $0x1a00] sm:$0xff]  ;;  %v1958_v12 = vld [vmem:[#allocation7 + $0x1cc8] sm:$0xff] }
 0x22c   :  { %2310 = vmatmul.mubr.f32.vlgmr.msra.gmra.mrb[4].mxu0 %v5738_v53  ;;  %v4549_v3 = vpack.c.bf16 %v1880_v57, %v1872_v55  ;;  %v1942_v55 = vld [vmem:[#allocation7 + $0x1c48] sm:$0xff]  ;;  %v1936_v57 = vld [vmem:[#allocation7 + $0x1c18] sm:$0xff] }
 0x22d   :  { %2594 = vmatmul.mubr.f32.vlgmr.msra.gmra.mrb[4].mxu1 %v5738_v53  ;;  %4280 = vmatpush1.bf16.msra.mxu0 %v4279_v9  ;;  %v1894_v9 = vld [vmem:[#allocation7 + $0x1ac8] sm:$0xff] }
 0x22e   :  { %2380 = vmatprep.mubr.f32.mxu0 %v5745_v28  ;;  %4536 = vmatpush1.bf16.msra.mxu1 %v4535_v15  ;;  %v4295_v15 = vpack.c.bf16 %v1877_v1, %v1869_v10  ;;  %v4297_v19 = vpack.c.bf16 %v1894_v9, %v1886_v8  ;;  %v4309_v10 = vpack.c.bf16 %v1942_v55, %v1934_v54  ;;  %v1933_v1 = vld [vmem:[#allocation7 + $0x1c00] sm:$0xff]  ;;  %v1943_v8 = vld [vmem:[#allocation7 + $0x1c50] sm:$0xff]  ;;  %v1950_v9 = vld [vmem:[#allocation7 + $0x1c88] sm:$0xff] }
 0x22f   :  { %2664 = vmatprep.mubr.f32.mxu1 %v5745_v28  ;;  %4282 = vmatprep.subr.bf16.mxu0 %v4281_v58  ;;  %v1893_v58 = vld [vmem:[#allocation7 + $0x1ac0] sm:$0xff]  ;;  %v1982_v40 = vld [vmem:[#allocation7 + $0x1d88] sm:$0xff]  ;;  %v1991_v54 = vld [vmem:[#allocation7 + $0x1dd0] sm:$0xff] }
 0x230   :  { %4538 = vmatprep.subr.bf16.mxu1 %v4537_v25  ;;  %v1902_v25 = vld [vmem:[#allocation7 + $0x1b08] sm:$0xff] }
 0x231   :  { %4284 = vmatpush1.bf16.msra.mxu0 %v4283_v41  ;;  %v1912_v41 = vld [vmem:[#allocation7 + $0x1b58] sm:$0xff]  ;;  %v4301_v30 = vpack.c.bf16 %v1910_v26, %v1902_v25  ;;  %v1959_v25 = vld [vmem:[#allocation7 + $0x1cd0] sm:$0xff]  ;;  %v1966_v26 = vld [vmem:[#allocation7 + $0x1d08] sm:$0xff] }
 0x232   :  { %4540 = vmatpush1.bf16.msra.mxu1 %v4539_v50  ;;  %4286 = vmatprep.subr.bf16.mxu0 %v4285_v29  ;;  %v4299_v50 = vpack.c.bf16 %v1893_v58, %v1885_v21  ;;  %v4555_v29 = vpack.c.bf16 %v1895_v24, %v1887_v22  ;;  %v4557_v35 = vpack.c.bf16 %v1912_v41, %v1904_v27  ;;  %v1949_v58 = vld [vmem:[#allocation7 + $0x1c80] sm:$0xff]  ;;  %v1974_v27 = vld [vmem:[#allocation7 + $0x1d48] sm:$0xff]  ;;  %v1968_v41 = vld [vmem:[#allocation7 + $0x1d18] sm:$0xff] }
 0x233   :  { %4542 = vmatprep.subr.bf16.mxu1 %v4541_v34  ;;  %v1903_v34 = vld [vmem:[#allocation7 + $0x1b10] sm:$0xff]  ;;  %v4313_v21 = vpack.c.bf16 %v1958_v12, %v1950_v9  ;;  %v1957_v22 = vld [vmem:[#allocation7 + $0x1cc0] sm:$0xff]  ;;  %v1998_v55 = vld [vmem:[#allocation7 + $0x1e08] sm:$0xff] }
 0x234   :  { %v2007_v9 = vld [vmem:[#allocation7 + $0x1e50] sm:$0xff]  ;;  %v2014_v12 = vld [vmem:[#allocation7 + $0x1e88] sm:$0xff] }
 0x235   :  { %4288 = vmatpush1.bf16.msra.mxu0 %v4287_v42  ;;  %v1928_v42 = vld [vmem:[#allocation7 + $0x1bd8] sm:$0xff] }
 0x236   :  { %4544 = vmatpush1.bf16.msra.mxu1 %v4543_v43  ;;  %4290 = vmatprep.subr.bf16.mxu0 %v4289_v45  ;;  %v4303_v43 = vpack.c.bf16 %v1909_v33, %v1901_v31  ;;  %v4559_v45 = vpack.c.bf16 %v1911_v36, %v1903_v34  ;;  %v4561_v37 = vpack.c.bf16 %v1928_v42, %v1920_v56  ;;  %v1965_v33 = vld [vmem:[#allocation7 + $0x1d00] sm:$0xff]  ;;  %v1990_v56 = vld [vmem:[#allocation7 + $0x1dc8] sm:$0xff]  ;;  %v1984_v42 = vld [vmem:[#allocation7 + $0x1d98] sm:$0xff] }
 0x237   :  { %4546 = vmatprep.subr.bf16.mxu1 %v4545_v51  ;;  %v1919_v51 = vld [vmem:[#allocation7 + $0x1b90] sm:$0xff]  ;;  %v4317_v31 = vpack.c.bf16 %v1974_v27, %v1966_v26  ;;  %v1973_v34 = vld [vmem:[#allocation7 + $0x1d40] sm:$0xff]  ;;  %v2030_v27 = vld [vmem:[#allocation7 + $0x1f08] sm:$0xff] }
 0x238   :  { %v2023_v26 = vld [vmem:[#allocation7 + $0x1ed0] sm:$0xff] }
 0x239   :  { %4292 = vmatpush1.bf16.msra.mxu0 %v4291_v60  ;;  %v1944_v60 = vld [vmem:[#allocation7 + $0x1c58] sm:$0xff] }
 0x23a   :  { %4548 = vmatpush1.bf16.msra.mxu1 %v4547_v61  ;;  %4294 = vmatprep.subr.bf16.mxu0 %v4293_v62  ;;  %v4307_v61 = vpack.c.bf16 %v1925_v48, %v1917_v47  ;;  %v4563_v62 = vpack.c.bf16 %v1927_v52, %v1919_v51  ;;  %v4565_v7 = vpack.c.bf16 %v1944_v60, %v1936_v57  ;;  %v1981_v48 = vld [vmem:[#allocation7 + $0x1d80] sm:$0xff]  ;;  %v2006_v57 = vld [vmem:[#allocation7 + $0x1e48] sm:$0xff]  ;;  %v2000_v60 = vld [vmem:[#allocation7 + $0x1e18] sm:$0xff] }
 0x23b   :  { %4550 = vmatprep.subr.bf16.mxu1 %v4549_v3  ;;  %v1935_v3 = vld [vmem:[#allocation7 + $0x1c10] sm:$0xff]  ;;  %v4321_v47 = vpack.c.bf16 %v1990_v56, %v1982_v40  ;;  %v1989_v51 = vld [vmem:[#allocation7 + $0x1dc0] sm:$0xff]  ;;  %v2046_v56 = vld [vmem:[#allocation7 + $0x1f88] sm:$0xff] }
 0x23c   :  { %v2039_v40 = vld [vmem:[#allocation7 + $0x1f50] sm:$0xff] }
 0x23d   :  { %4296 = vmatpush1.bf16.msra.mxu0 %v4295_v15  ;;  %v1960_v15 = vld [vmem:[#allocation7 + $0x1cd8] sm:$0xff] }
 0x23e   :  { %4552 = vmatpush1.bf16.msra.mxu1 %v4551_v18  ;;  %4298 = vmatprep.subr.bf16.mxu0 %v4297_v19  ;;  %v4311_v18 = vpack.c.bf16 %v1941_v2, %v1933_v1  ;;  %v4567_v19 = vpack.c.bf16 %v1943_v8, %v1935_v3  ;;  %v4569_v24 = vpack.c.bf16 %v1960_v15, %v1952_v13  ;;  %v1997_v2 = vld [vmem:[#allocation7 + $0x1e00] sm:$0xff]  ;;  %v2022_v13 = vld [vmem:[#allocation7 + $0x1ec8] sm:$0xff]  ;;  %v2016_v15 = vld [vmem:[#allocation7 + $0x1e98] sm:$0xff] }
 0x23f   :  { %4554 = vmatprep.subr.bf16.mxu1 %v4553_v23  ;;  %v1951_v23 = vld [vmem:[#allocation7 + $0x1c90] sm:$0xff]  ;;  %v4325_v1 = vpack.c.bf16 %v2006_v57, %v1998_v55  ;;  %v2005_v3 = vld [vmem:[#allocation7 + $0x1e40] sm:$0xff]  ;;  %v1042_v57 = vld [vmem:[#allocation7 + $0x28] sm:$0xff] }
 0x240   :  { %v2055_v55 = vld [vmem:[#allocation7 + $0x1fd0] sm:$0xff] }
 0x241   :  { %4300 = vmatpush1.bf16.msra.mxu0 %v4299_v50  ;;  %v1976_v50 = vld [vmem:[#allocation7 + $0x1d58] sm:$0xff] }
 0x242   :  { %4556 = vmatpush1.bf16.msra.mxu1 %v4555_v29  ;;  %4302 = vmatprep.subr.bf16.mxu0 %v4301_v30  ;;  %v4315_v29 = vpack.c.bf16 %v1957_v22, %v1949_v58  ;;  %v4571_v30 = vpack.c.bf16 %v1959_v25, %v1951_v23  ;;  %v4573_v36 = vpack.c.bf16 %v1976_v50, %v1968_v41  ;;  %v2013_v22 = vld [vmem:[#allocation7 + $0x1e80] sm:$0xff]  ;;  %v2038_v41 = vld [vmem:[#allocation7 + $0x1f48] sm:$0xff]  ;;  %v2032_v50 = vld [vmem:[#allocation7 + $0x1f18] sm:$0xff] }
 0x243   :  { %4558 = vmatprep.subr.bf16.mxu1 %v4557_v35  ;;  %v1967_v35 = vld [vmem:[#allocation7 + $0x1d10] sm:$0xff]  ;;  %v4329_v58 = vpack.c.bf16 %v2022_v13, %v2014_v12  ;;  %v2021_v23 = vld [vmem:[#allocation7 + $0x1ec0] sm:$0xff] }
 0x244   :  { %v1043_v12 = vld [vmem:[#allocation7 + $0x30] sm:$0xff] }
 0x245   :  { %4304 = vmatpush1.bf16.msra.mxu0 %v4303_v43  ;;  %v1992_v43 = vld [vmem:[#allocation7 + $0x1dd8] sm:$0xff]  ;;  %v1051_v13 = vld [vmem:[#allocation7 + $0x70] sm:$0xff] }
 0x246   :  { %4560 = vmatpush1.bf16.msra.mxu1 %v4559_v45  ;;  %4306 = vmatprep.subr.bf16.mxu0 %v4305_v46  ;;  %v4319_v45 = vpack.c.bf16 %v1973_v34, %v1965_v33  ;;  %v4575_v46 = vpack.c.bf16 %v1975_v39, %v1967_v35  ;;  %v4577_v52 = vpack.c.bf16 %v1992_v43, %v1984_v42  ;;  %v2029_v34 = vld [vmem:[#allocation7 + $0x1f00] sm:$0xff]  ;;  %v2054_v42 = vld [vmem:[#allocation7 + $0x1fc8] sm:$0xff]  ;;  %v2048_v43 = vld [vmem:[#allocation7 + $0x1f98] sm:$0xff] }
 0x247   :  { %4562 = vmatprep.subr.bf16.mxu1 %v4561_v37  ;;  %v1983_v37 = vld [vmem:[#allocation7 + $0x1d90] sm:$0xff]  ;;  %v4333_v33 = vpack.c.bf16 %v2038_v41, %v2030_v27  ;;  %v2037_v35 = vld [vmem:[#allocation7 + $0x1f40] sm:$0xff] }
 0x248   :  { %v1067_v41 = vld [vmem:[#allocation7 + $0xf0] sm:$0xff] }
 0x249   :  { %4308 = vmatpush1.bf16.msra.mxu0 %v4307_v61  ;;  %v2008_v61 = vld [vmem:[#allocation7 + $0x1e58] sm:$0xff] }
 0x24a   :  { %4564 = vmatpush1.bf16.msra.mxu1 %v4563_v62  ;;  %4310 = vmatprep.subr.bf16.mxu0 %v4309_v10  ;;  %v4323_v62 = vpack.c.bf16 %v1989_v51, %v1981_v48  ;;  %v4579_v10 = vpack.c.bf16 %v1991_v54, %v1983_v37  ;;  %v4581_v8 = vpack.c.bf16 %v2008_v61, %v2000_v60  ;;  %v2045_v51 = vld [vmem:[#allocation7 + $0x1f80] sm:$0xff]  ;;  %v1050_v60 = vld [vmem:[#allocation7 + $0x68] sm:$0xff]  ;;  %v1044_v61 = vld [vmem:[#allocation7 + $0x38] sm:$0xff] }
 0x24b   :  { %4566 = vmatprep.subr.bf16.mxu1 %v4565_v7  ;;  %v1999_v7 = vld [vmem:[#allocation7 + $0x1e10] sm:$0xff]  ;;  %v4337_v48 = vpack.c.bf16 %v2054_v42, %v2046_v56  ;;  %v2053_v37 = vld [vmem:[#allocation7 + $0x1fc0] sm:$0xff] }
 0x24c   :  { %v1083_v42 = vld [vmem:[#allocation7 + $0x170] sm:$0xff] }
 0x24d   :  { %4312 = vmatpush1.bf16.msra.mxu0 %v4311_v18  ;;  %v2024_v18 = vld [vmem:[#allocation7 + $0x1ed8] sm:$0xff] }
 0x24e   :  { %4568 = vmatpush1.bf16.msra.mxu1 %v4567_v19  ;;  %4314 = vmatprep.subr.bf16.mxu0 %v4313_v21  ;;  %v4327_v19 = vpack.c.bf16 %v2005_v3, %v1997_v2  ;;  %v4583_v21 = vpack.c.bf16 %v2007_v9, %v1999_v7  ;;  %v4585_v25 = vpack.c.bf16 %v2024_v18, %v2016_v15  ;;  %v1041_v3 = vld [vmem:[#allocation7 + $0x20] sm:$0xff]  ;;  %v1058_v15 = vld [vmem:[#allocation7 + $0xa8] sm:$0xff] }
 0x24f   :  { %4570 = vmatprep.subr.bf16.mxu1 %v4569_v24  ;;  %v2015_v24 = vld [vmem:[#allocation7 + $0x1e90] sm:$0xff]  ;;  %v4597_v2 = vpack.c.bf16 %v1050_v60, %v1042_v57  ;;  %v1049_v7 = vld [vmem:[#allocation7 + $0x60] sm:$0xff]  ;;  %v1066_v18 = vld [vmem:[#allocation7 + $0xe8] sm:$0xff] }
 0x250   :  { %v4601_v27 = vpack.c.bf16 %v1066_v18, %v1058_v15  ;;  %v1106_v60 = vld [vmem:[#allocation7 + $0x228] sm:$0xff] }
 0x251   :  { %4316 = vmatpush1.bf16.msra.mxu0 %v4315_v29  ;;  %v2040_v29 = vld [vmem:[#allocation7 + $0x1f58] sm:$0xff]  ;;  %v1122_v15 = vld [vmem:[#allocation7 + $0x2a8] sm:$0xff] }
 0x252   :  { %4572 = vmatpush1.bf16.msra.mxu1 %v4571_v30  ;;  %4318 = vmatprep.subr.bf16.mxu0 %v4317_v31  ;;  %v4331_v30 = vpack.c.bf16 %v2021_v23, %v2013_v22  ;;  %v4587_v31 = vpack.c.bf16 %v2023_v26, %v2015_v24  ;;  %v4589_v39 = vpack.c.bf16 %v2040_v29, %v2032_v50  ;;  %v1057_v23 = vld [vmem:[#allocation7 + $0xa0] sm:$0xff]  ;;  %v1074_v50 = vld [vmem:[#allocation7 + $0x128] sm:$0xff] }
 0x253   :  { %4574 = vmatprep.subr.bf16.mxu1 %v4573_v36  ;;  %v2031_v36 = vld [vmem:[#allocation7 + $0x1f10] sm:$0xff]  ;;  %v4855_v22 = vpack.c.bf16 %v1051_v13, %v1043_v12  ;;  %v1065_v24 = vld [vmem:[#allocation7 + $0xe0] sm:$0xff]  ;;  %v1082_v29 = vld [vmem:[#allocation7 + $0x168] sm:$0xff] }
 0x254   :  { %v1115_v13 = vld [vmem:[#allocation7 + $0x270] sm:$0xff]  ;;  %v1130_v18 = vld [vmem:[#allocation7 + $0x2e8] sm:$0xff] }
 0x255   :  { %4320 = vmatpush1.bf16.msra.mxu0 %v4319_v45  ;;  %v2056_v45 = vld [vmem:[#allocation7 + $0x1fd8] sm:$0xff] }
 0x256   :  { %4576 = vmatpush1.bf16.msra.mxu1 %v4575_v46  ;;  %4322 = vmatprep.subr.bf16.mxu0 %v4321_v47  ;;  %v4335_v46 = vpack.c.bf16 %v2037_v35, %v2029_v34  ;;  %v4591_v47 = vpack.c.bf16 %v2039_v40, %v2031_v36  ;;  %v4593_v54 = vpack.c.bf16 %v2056_v45, %v2048_v43  ;;  %v1073_v36 = vld [vmem:[#allocation7 + $0x120] sm:$0xff]  ;;  %v1075_v40 = vld [vmem:[#allocation7 + $0x130] sm:$0xff]  ;;  %v1090_v43 = vld [vmem:[#allocation7 + $0x1a8] sm:$0xff] }
 0x257   :  { %4578 = vmatprep.subr.bf16.mxu1 %v4577_v52  ;;  %v2047_v52 = vld [vmem:[#allocation7 + $0x1f90] sm:$0xff]  ;;  %v4603_v34 = vpack.c.bf16 %v1065_v24, %v1057_v23  ;;  %v1098_v45 = vld [vmem:[#allocation7 + $0x1e8] sm:$0xff]  ;;  %v4617_v23 = vpack.c.bf16 %v1130_v18, %v1122_v15  ;;  %v1121_v24 = vld [vmem:[#allocation7 + $0x2a0] sm:$0xff] }
 0x258   :  { %v1186_v15 = vld [vmem:[#allocation7 + $0x4a8] sm:$0xff] }
 0x259   :  { %4324 = vmatpush1.bf16.msra.mxu0 %v4323_v62  ;;  %v1052_v62 = vld [vmem:[#allocation7 + $0x78] sm:$0xff]  ;;  %v1194_v18 = vld [vmem:[#allocation7 + $0x4e8] sm:$0xff] }
 0x25a   :  { %4580 = vmatpush1.bf16.msra.mxu1 %v4579_v10  ;;  %4326 = vmatprep.subr.bf16.mxu0 %v4325_v1  ;;  %v4339_v10 = vpack.c.bf16 %v2053_v37, %v2045_v51  ;;  %v4595_v1 = vpack.c.bf16 %v2055_v55, %v2047_v52  ;;  %v4853_v9 = vpack.c.bf16 %v1052_v62, %v1044_v61  ;;  %v1089_v52 = vld [vmem:[#allocation7 + $0x1a0] sm:$0xff]  ;;  %v1091_v55 = vld [vmem:[#allocation7 + $0x1b0] sm:$0xff]  ;;  %v1114_v61 = vld [vmem:[#allocation7 + $0x268] sm:$0xff] }
 0x25b   :  { %4582 = vmatprep.subr.bf16.mxu1 %v4581_v8  ;;  %v1027_v8 = vmul.f32 0.01, %v5711_v49  ;;  %v4863_v51 = vpack.c.bf16 %v1083_v42, %v1075_v40  ;;  %v4609_v37 = vpack.c.bf16 %v1098_v45, %v1090_v43  ;;  %v1108_v62 = vld [vmem:[#allocation7 + $0x238] sm:$0xff]  ;;  %v1139_v40 = vld [vmem:[#allocation7 + $0x330] sm:$0xff]  ;;  %v1154_v43 = vld [vmem:[#allocation7 + $0x3a8] sm:$0xff] }
 0x25c   :  { %v1147_v42 = vld [vmem:[#allocation7 + $0x370] sm:$0xff]  ;;  %v1162_v45 = vld [vmem:[#allocation7 + $0x3e8] sm:$0xff] }
 0x25d   :  { %4328 = vmatpush1.bf16.msra.mxu0 %v4327_v19  ;;  %v4599_v19 = vpack.c.bf16 %v1049_v7, %v1041_v3  ;;  %v5752_v26 = vsel %vm1019_vm8, %v5711_v49, %v1027_v8  ;;  %v4605_v49 = vpack.c.bf16 %v1082_v29, %v1074_v50  ;;  %v4613_v3 = vpack.c.bf16 %v1114_v61, %v1106_v60  ;;  %v1105_v7 = vld [vmem:[#allocation7 + $0x220] sm:$0xff]  ;;  %v1131_v50 = vld [vmem:[#allocation7 + $0x2f0] sm:$0xff]  ;;  %v1138_v29 = vld [vmem:[#allocation7 + $0x328] sm:$0xff] }
 0x25e   :  { %4584 = vmatpush1.bf16.msra.mxu1 %v4583_v21  ;;  %4330 = vmatprep.subr.bf16.mxu0 %v4329_v58  ;;  %v1060_v21 = vld [vmem:[#allocation7 + $0xb8] sm:$0xff]  ;;  %v1113_v8 = vld [vmem:[#allocation7 + $0x260] sm:$0xff]  ;;  %v1170_v60 = vld [vmem:[#allocation7 + $0x428] sm:$0xff] }
 0x25f   :  { %4586 = vmatprep.subr.bf16.mxu1 %v4585_v25  ;;  %v1068_v58 = vld [vmem:[#allocation7 + $0xf8] sm:$0xff]  ;;  %v1059_v25 = vld [vmem:[#allocation7 + $0xb0] sm:$0xff]  ;;  %v1178_v61 = vld [vmem:[#allocation7 + $0x468] sm:$0xff] }
 0x260   :  { %v4859_v35 = vpack.c.bf16 %v1067_v41, %v1059_v25  ;;  %v1129_v25 = vld [vmem:[#allocation7 + $0x2e0] sm:$0xff] }
 0x261   :  { %4332 = vmatpush1.bf16.msra.mxu0 %v4331_v30  ;;  %v4857_v30 = vpack.c.bf16 %v1068_v58, %v1060_v21  ;;  %v1132_v21 = vld [vmem:[#allocation7 + $0x2f8] sm:$0xff]  ;;  %v4615_v58 = vpack.c.bf16 %v1113_v8, %v1105_v7  ;;  %v1169_v7 = vld [vmem:[#allocation7 + $0x420] sm:$0xff] }
 0x262   :  { %4588 = vmatpush1.bf16.msra.mxu1 %v4587_v31  ;;  %4334 = vmatprep.subr.bf16.mxu0 %v4333_v33  ;;  %v1076_v31 = vld [vmem:[#allocation7 + $0x138] sm:$0xff]  ;;  %v1177_v8 = vld [vmem:[#allocation7 + $0x460] sm:$0xff] }
 0x263   :  { %4590 = vmatprep.subr.bf16.mxu1 %v4589_v39  ;;  %v1084_v33 = vld [vmem:[#allocation7 + $0x178] sm:$0xff]  ;;  %v1081_v39 = vld [vmem:[#allocation7 + $0x160] sm:$0xff] }
 0x264   :  { %v4861_v56 = vpack.c.bf16 %v1084_v33, %v1076_v31  ;;  %v1140_v31 = vld [vmem:[#allocation7 + $0x338] sm:$0xff] }
 0x265   :  { %4336 = vmatpush1.bf16.msra.mxu0 %v4335_v46  ;;  %v1092_v46 = vld [vmem:[#allocation7 + $0x1b8] sm:$0xff] }
 0x266   :  { %4592 = vmatpush1.bf16.msra.mxu1 %v4591_v47  ;;  %4338 = vmatprep.subr.bf16.mxu0 %v4337_v48  ;;  %v1100_v47 = vld [vmem:[#allocation7 + $0x1f8] sm:$0xff]  ;;  %v4607_v48 = vpack.c.bf16 %v1081_v39, %v1073_v36  ;;  %v1137_v36 = vld [vmem:[#allocation7 + $0x320] sm:$0xff] }
 0x267   :  { %4594 = vmatprep.subr.bf16.mxu1 %v4593_v54  ;;  %v1097_v54 = vld [vmem:[#allocation7 + $0x1e0] sm:$0xff]  ;;  %v4865_v57 = vpack.c.bf16 %v1100_v47, %v1092_v46  ;;  %v1148_v33 = vld [vmem:[#allocation7 + $0x378] sm:$0xff] }
 0x268   :  { %v1145_v39 = vld [vmem:[#allocation7 + $0x360] sm:$0xff]  ;;  %v1156_v46 = vld [vmem:[#allocation7 + $0x3b8] sm:$0xff] }
 0x269   :  { %4340 = vmatpush1.bf16.msra.mxu0 %v4339_v10  ;;  %v1116_v10 = vld [vmem:[#allocation7 + $0x278] sm:$0xff] }
 0x26a   :  { %4596 = vmatpush1.bf16.msra.mxu1 %v4595_v1  ;;  %4598 = vmatprep.subr.bf16.mxu0 %v4597_v2  ;;  %v4611_v1 = vpack.c.bf16 %v1097_v54, %v1089_v52  ;;  %v4869_v12 = vpack.c.bf16 %v1116_v10, %v1108_v62  ;;  %v1164_v47 = vld [vmem:[#allocation7 + $0x3f8] sm:$0xff]  ;;  %v1153_v52 = vld [vmem:[#allocation7 + $0x3a0] sm:$0xff] }
 0x26b   :  { %4854 = vmatprep.subr.bf16.mxu1 %v4853_v9  ;;  %v1107_v9 = vld [vmem:[#allocation7 + $0x230] sm:$0xff]  ;;  %v1161_v54 = vld [vmem:[#allocation7 + $0x3e0] sm:$0xff]  ;;  %v1172_v62 = vld [vmem:[#allocation7 + $0x438] sm:$0xff] }
 0x26c   :  { %2381 = vmatmul.mubr.f32.vlgmr.msra.gmra.mrb[4].mxu0 %v5752_v26  ;;  %v1180_v10 = vld [vmem:[#allocation7 + $0x478] sm:$0xff] }
 0x26d   :  { %2665 = vmatmul.mubr.f32.vlgmr.msra.gmra.mrb[4].mxu1 %v5752_v26  ;;  %4600 = vmatpush1.bf16.msra.mxu0 %v4599_v19  ;;  %v1124_v19 = vld [vmem:[#allocation7 + $0x2b8] sm:$0xff] }
 0x26e   :  { %2735 = vmatprep.mubr.f32.mxu0 %v5679_v6  ;;  %4856 = vmatpush1.bf16.msra.mxu1 %v4855_v22  ;;  %v4871_v22 = vpack.c.bf16 %v1115_v13, %v1107_v9  ;;  %v4873_v41 = vpack.c.bf16 %v1132_v21, %v1124_v19  ;;  %v1171_v9 = vld [vmem:[#allocation7 + $0x430] sm:$0xff]  ;;  %v1188_v19 = vld [vmem:[#allocation7 + $0x4b8] sm:$0xff] }
 0x26f   :  { %3019 = vmatprep.mubr.f32.mxu1 %v5679_v6  ;;  %4602 = vmatprep.subr.bf16.mxu0 %v4601_v27  ;;  %v1099_v6 = vld [vmem:[#allocation7 + $0x1f0] sm:$0xff]  ;;  %v1196_v21 = vld [vmem:[#allocation7 + $0x4f8] sm:$0xff] }
 0x270   :  { %4858 = vmatprep.subr.bf16.mxu1 %v4857_v30  ;;  %v4867_v2 = vpack.c.bf16 %v1099_v6, %v1091_v55  ;;  %v1123_v27 = vld [vmem:[#allocation7 + $0x2b0] sm:$0xff]  ;;  %v1146_v30 = vld [vmem:[#allocation7 + $0x368] sm:$0xff] }
 0x271   :  { %4604 = vmatpush1.bf16.msra.mxu0 %v4603_v34  ;;  %v4619_v34 = vpack.c.bf16 %v1129_v25, %v1121_v24  ;;  %v1155_v55 = vld [vmem:[#allocation7 + $0x3b0] sm:$0xff]  ;;  %v1185_v24 = vld [vmem:[#allocation7 + $0x4a0] sm:$0xff] }
 0x272   :  { %4860 = vmatpush1.bf16.msra.mxu1 %v4859_v35  ;;  %4606 = vmatprep.subr.bf16.mxu0 %v4605_v49  ;;  %v4875_v35 = vpack.c.bf16 %v1131_v50, %v1123_v27  ;;  %v4621_v49 = vpack.c.bf16 %v1146_v30, %v1138_v29  ;;  %v1163_v6 = vld [vmem:[#allocation7 + $0x3f0] sm:$0xff]  ;;  %v1193_v25 = vld [vmem:[#allocation7 + $0x4e0] sm:$0xff]  ;;  %v1202_v29 = vld [vmem:[#allocation7 + $0x528] sm:$0xff] }
 0x273   :  { %4862 = vmatprep.subr.bf16.mxu1 %v4861_v56  ;;  %v4877_v56 = vpack.c.bf16 %v1148_v33, %v1140_v31  ;;  %v1179_v13 = vld [vmem:[#allocation7 + $0x470] sm:$0xff]  ;;  %v1210_v30 = vld [vmem:[#allocation7 + $0x568] sm:$0xff]  ;;  %v1204_v31 = vld [vmem:[#allocation7 + $0x538] sm:$0xff] }
 0x274   :  { %v1187_v27 = vld [vmem:[#allocation7 + $0x4b0] sm:$0xff]  ;;  %v1212_v33 = vld [vmem:[#allocation7 + $0x578] sm:$0xff] }
 0x275   :  { %4608 = vmatpush1.bf16.msra.mxu0 %v4607_v48  ;;  %v4623_v48 = vpack.c.bf16 %v1145_v39, %v1137_v36  ;;  %v1195_v50 = vld [vmem:[#allocation7 + $0x4f0] sm:$0xff]  ;;  %v1201_v36 = vld [vmem:[#allocation7 + $0x520] sm:$0xff] }
 0x276   :  { %4864 = vmatpush1.bf16.msra.mxu1 %v4863_v51  ;;  %4610 = vmatprep.subr.bf16.mxu0 %v4609_v37  ;;  %v4879_v51 = vpack.c.bf16 %v1147_v42, %v1139_v40  ;;  %v4625_v37 = vpack.c.bf16 %v1162_v45, %v1154_v43  ;;  %v1209_v39 = vld [vmem:[#allocation7 + $0x560] sm:$0xff]  ;;  %v1203_v40 = vld [vmem:[#allocation7 + $0x530] sm:$0xff]  ;;  %v1218_v43 = vld [vmem:[#allocation7 + $0x5a8] sm:$0xff] }
 0x277   :  { %4866 = vmatprep.subr.bf16.mxu1 %v4865_v57  ;;  %v4881_v57 = vpack.c.bf16 %v1164_v47, %v1156_v46  ;;  %v1211_v42 = vld [vmem:[#allocation7 + $0x570] sm:$0xff]  ;;  %v1226_v45 = vld [vmem:[#allocation7 + $0x5e8] sm:$0xff]  ;;  %v1220_v46 = vld [vmem:[#allocation7 + $0x5b8] sm:$0xff] }
 0x278   :  { %v1228_v47 = vld [vmem:[#allocation7 + $0x5f8] sm:$0xff] }
 0x279   :  { %4612 = vmatpush1.bf16.msra.mxu0 %v4611_v1  ;;  %v4627_v1 = vpack.c.bf16 %v1161_v54, %v1153_v52  ;;  %v1217_v52 = vld [vmem:[#allocation7 + $0x5a0] sm:$0xff] }
 0x27a   :  { %4868 = vmatpush1.bf16.msra.mxu1 %v4867_v2  ;;  %4614 = vmatprep.subr.bf16.mxu0 %v4613_v3  ;;  %v4883_v2 = vpack.c.bf16 %v1163_v6, %v1155_v55  ;;  %v4629_v3 = vpack.c.bf16 %v1178_v61, %v1170_v60  ;;  %v1225_v54 = vld [vmem:[#allocation7 + $0x5e0] sm:$0xff]  ;;  %v1219_v55 = vld [vmem:[#allocation7 + $0x5b0] sm:$0xff]  ;;  %v1234_v60 = vld [vmem:[#allocation7 + $0x628] sm:$0xff] }
 0x27b   :  { %4870 = vmatprep.subr.bf16.mxu1 %v4869_v12  ;;  %v4885_v12 = vpack.c.bf16 %v1180_v10, %v1172_v62  ;;  %v1227_v6 = vld [vmem:[#allocation7 + $0x5f0] sm:$0xff]  ;;  %v1242_v61 = vld [vmem:[#allocation7 + $0x668] sm:$0xff]  ;;  %v1236_v62 = vld [vmem:[#allocation7 + $0x638] sm:$0xff] }
 0x27c   :  { %v1244_v10 = vld [vmem:[#allocation7 + $0x678] sm:$0xff] }
 0x27d   :  { %4616 = vmatpush1.bf16.msra.mxu0 %v4615_v58  ;;  %v4631_v58 = vpack.c.bf16 %v1177_v8, %v1169_v7  ;;  %v1233_v7 = vld [vmem:[#allocation7 + $0x620] sm:$0xff] }
 0x27e   :  { %4872 = vmatpush1.bf16.msra.mxu1 %v4871_v22  ;;  %4618 = vmatprep.subr.bf16.mxu0 %v4617_v23  ;;  %v4887_v22 = vpack.c.bf16 %v1179_v13, %v1171_v9  ;;  %v4633_v23 = vpack.c.bf16 %v1194_v18, %v1186_v15  ;;  %v1241_v8 = vld [vmem:[#allocation7 + $0x660] sm:$0xff]  ;;  %v1235_v9 = vld [vmem:[#allocation7 + $0x630] sm:$0xff]  ;;  %v1250_v15 = vld [vmem:[#allocation7 + $0x6a8] sm:$0xff] }
 0x27f   :  { %4874 = vmatprep.subr.bf16.mxu1 %v4873_v41  ;;  %v4889_v41 = vpack.c.bf16 %v1196_v21, %v1188_v19  ;;  %v1243_v13 = vld [vmem:[#allocation7 + $0x670] sm:$0xff]  ;;  %v1258_v18 = vld [vmem:[#allocation7 + $0x6e8] sm:$0xff]  ;;  %v1252_v19 = vld [vmem:[#allocation7 + $0x6b8] sm:$0xff] }
 0x280   :  { %v1260_v21 = vld [vmem:[#allocation7 + $0x6f8] sm:$0xff] }
 0x281   :  { %4620 = vmatpush1.bf16.msra.mxu0 %v4619_v34  ;;  %v4635_v34 = vpack.c.bf16 %v1193_v25, %v1185_v24  ;;  %v1249_v24 = vld [vmem:[#allocation7 + $0x6a0] sm:$0xff] }
 0x282   :  { %4876 = vmatpush1.bf16.msra.mxu1 %v4875_v35  ;;  %4622 = vmatprep.subr.bf16.mxu0 %v4621_v49  ;;  %v4891_v35 = vpack.c.bf16 %v1195_v50, %v1187_v27  ;;  %v4637_v49 = vpack.c.bf16 %v1210_v30, %v1202_v29  ;;  %v1257_v25 = vld [vmem:[#allocation7 + $0x6e0] sm:$0xff]  ;;  %v1251_v27 = vld [vmem:[#allocation7 + $0x6b0] sm:$0xff]  ;;  %v1266_v29 = vld [vmem:[#allocation7 + $0x728] sm:$0xff] }
 0x283   :  { %4878 = vmatprep.subr.bf16.mxu1 %v4877_v56  ;;  %v4893_v56 = vpack.c.bf16 %v1212_v33, %v1204_v31  ;;  %v1259_v50 = vld [vmem:[#allocation7 + $0x6f0] sm:$0xff]  ;;  %v1274_v30 = vld [vmem:[#allocation7 + $0x768] sm:$0xff]  ;;  %v1268_v31 = vld [vmem:[#allocation7 + $0x738] sm:$0xff] }
 0x284   :  { %v1276_v33 = vld [vmem:[#allocation7 + $0x778] sm:$0xff] }
 0x285   :  { %4624 = vmatpush1.bf16.msra.mxu0 %v4623_v48  ;;  %v4639_v48 = vpack.c.bf16 %v1209_v39, %v1201_v36  ;;  %v1265_v36 = vld [vmem:[#allocation7 + $0x720] sm:$0xff] }
 0x286   :  { %4880 = vmatpush1.bf16.msra.mxu1 %v4879_v51  ;;  %4626 = vmatprep.subr.bf16.mxu0 %v4625_v37  ;;  %v4895_v51 = vpack.c.bf16 %v1211_v42, %v1203_v40  ;;  %v4641_v37 = vpack.c.bf16 %v1226_v45, %v1218_v43  ;;  %v1273_v39 = vld [vmem:[#allocation7 + $0x760] sm:$0xff]  ;;  %v1267_v40 = vld [vmem:[#allocation7 + $0x730] sm:$0xff]  ;;  %v1282_v43 = vld [vmem:[#allocation7 + $0x7a8] sm:$0xff] }
 0x287   :  { %4882 = vmatprep.subr.bf16.mxu1 %v4881_v57  ;;  %v4897_v57 = vpack.c.bf16 %v1228_v47, %v1220_v46  ;;  %v1275_v42 = vld [vmem:[#allocation7 + $0x770] sm:$0xff]  ;;  %v1290_v45 = vld [vmem:[#allocation7 + $0x7e8] sm:$0xff]  ;;  %v1284_v46 = vld [vmem:[#allocation7 + $0x7b8] sm:$0xff] }
 0x288   :  { %v1292_v47 = vld [vmem:[#allocation7 + $0x7f8] sm:$0xff] }
 0x289   :  { %4628 = vmatpush1.bf16.msra.mxu0 %v4627_v1  ;;  %v4643_v1 = vpack.c.bf16 %v1225_v54, %v1217_v52  ;;  %v1281_v52 = vld [vmem:[#allocation7 + $0x7a0] sm:$0xff] }
 0x28a   :  { %4884 = vmatpush1.bf16.msra.mxu1 %v4883_v2  ;;  %4630 = vmatprep.subr.bf16.mxu0 %v4629_v3  ;;  %v4899_v2 = vpack.c.bf16 %v1227_v6, %v1219_v55  ;;  %v4645_v3 = vpack.c.bf16 %v1242_v61, %v1234_v60  ;;  %v1289_v54 = vld [vmem:[#allocation7 + $0x7e0] sm:$0xff]  ;;  %v1283_v55 = vld [vmem:[#allocation7 + $0x7b0] sm:$0xff]  ;;  %v1298_v60 = vld [vmem:[#allocation7 + $0x828] sm:$0xff] }
 0x28b   :  { %4886 = vmatprep.subr.bf16.mxu1 %v4885_v12  ;;  %v4901_v12 = vpack.c.bf16 %v1244_v10, %v1236_v62  ;;  %v1291_v6 = vld [vmem:[#allocation7 + $0x7f0] sm:$0xff]  ;;  %v1306_v61 = vld [vmem:[#allocation7 + $0x868] sm:$0xff]  ;;  %v1300_v62 = vld [vmem:[#allocation7 + $0x838] sm:$0xff] }
 0x28c   :  { %v1308_v10 = vld [vmem:[#allocation7 + $0x878] sm:$0xff] }
 0x28d   :  { %4632 = vmatpush1.bf16.msra.mxu0 %v4631_v58  ;;  %v4647_v58 = vpack.c.bf16 %v1241_v8, %v1233_v7  ;;  %v1297_v7 = vld [vmem:[#allocation7 + $0x820] sm:$0xff] }
 0x28e   :  { %4888 = vmatpush1.bf16.msra.mxu1 %v4887_v22  ;;  %4634 = vmatprep.subr.bf16.mxu0 %v4633_v23  ;;  %v4903_v22 = vpack.c.bf16 %v1243_v13, %v1235_v9  ;;  %v4649_v23 = vpack.c.bf16 %v1258_v18, %v1250_v15  ;;  %v1305_v8 = vld [vmem:[#allocation7 + $0x860] sm:$0xff]  ;;  %v4917_v9 = vpack.c.bf16 %v1308_v10, %v1300_v62  ;;  %v1307_v13 = vld [vmem:[#allocation7 + $0x870] sm:$0xff]  ;;  %v1314_v15 = vld [vmem:[#allocation7 + $0x8a8] sm:$0xff] }
 0x28f   :  { %4890 = vmatprep.subr.bf16.mxu1 %v4889_v41  ;;  %v4905_v41 = vpack.c.bf16 %v1260_v21, %v1252_v19  ;;  %v1322_v18 = vld [vmem:[#allocation7 + $0x8e8] sm:$0xff]  ;;  %v4663_v19 = vpack.c.bf16 %v1305_v8, %v1297_v7  ;;  %v1316_v21 = vld [vmem:[#allocation7 + $0x8b8] sm:$0xff]  ;;  %v1363_v7 = vld [vmem:[#allocation7 + $0xa30] sm:$0xff] }
 0x291   :  { %4636 = vmatpush1.bf16.msra.mxu0 %v4635_v34  ;;  %v4651_v34 = vpack.c.bf16 %v1257_v25, %v1249_v24  ;;  %v1321_v24 = vld [vmem:[#allocation7 + $0x8e0] sm:$0xff]  ;;  %v1315_v25 = vld [vmem:[#allocation7 + $0x8b0] sm:$0xff] }
 0x292   :  { %4892 = vmatpush1.bf16.msra.mxu1 %v4891_v35  ;;  %4638 = vmatprep.subr.bf16.mxu0 %v4637_v49  ;;  %v4907_v35 = vpack.c.bf16 %v1259_v50, %v1251_v27  ;;  %v4653_v49 = vpack.c.bf16 %v1274_v30, %v1266_v29  ;;  %v4665_v27 = vpack.c.bf16 %v1322_v18, %v1314_v15  ;;  %v1330_v50 = vld [vmem:[#allocation7 + $0x928] sm:$0xff]  ;;  %v1380_v15 = vld [vmem:[#allocation7 + $0xab8] sm:$0xff] }
 0x293   :  { %4894 = vmatprep.subr.bf16.mxu1 %v4893_v56  ;;  %v4909_v56 = vpack.c.bf16 %v1276_v33, %v1268_v31  ;;  %v1338_v29 = vld [vmem:[#allocation7 + $0x968] sm:$0xff]  ;;  %v1332_v31 = vld [vmem:[#allocation7 + $0x938] sm:$0xff] }
 0x294   :  { %v1340_v33 = vld [vmem:[#allocation7 + $0x978] sm:$0xff] }
 0x295   :  { %4640 = vmatpush1.bf16.msra.mxu0 %v4639_v48  ;;  %v4655_v48 = vpack.c.bf16 %v1273_v39, %v1265_v36  ;;  %v1329_v36 = vld [vmem:[#allocation7 + $0x920] sm:$0xff]  ;;  %v1388_v18 = vld [vmem:[#allocation7 + $0xaf8] sm:$0xff] }
 0x296   :  { %4896 = vmatpush1.bf16.msra.mxu1 %v4895_v51  ;;  %4642 = vmatprep.subr.bf16.mxu0 %v4641_v37  ;;  %v4911_v51 = vpack.c.bf16 %v1275_v42, %v1267_v40  ;;  %v4657_v37 = vpack.c.bf16 %v1290_v45, %v1282_v43  ;;  %v1337_v39 = vld [vmem:[#allocation7 + $0x960] sm:$0xff]  ;;  %v1331_v40 = vld [vmem:[#allocation7 + $0x930] sm:$0xff]  ;;  %v1346_v43 = vld [vmem:[#allocation7 + $0x9a8] sm:$0xff] }
 0x297   :  { %4898 = vmatprep.subr.bf16.mxu1 %v4897_v57  ;;  %v4913_v57 = vpack.c.bf16 %v1292_v47, %v1284_v46  ;;  %v1339_v42 = vld [vmem:[#allocation7 + $0x970] sm:$0xff]  ;;  %v1354_v45 = vld [vmem:[#allocation7 + $0x9e8] sm:$0xff]  ;;  %v1348_v46 = vld [vmem:[#allocation7 + $0x9b8] sm:$0xff]  ;;  %v4671_v47 = vpack.c.bf16 %v1337_v39, %v1329_v36 }
 0x298   :  { %v1395_v36 = vld [vmem:[#allocation7 + $0xb30] sm:$0xff] }
 0x299   :  { %4644 = vmatpush1.bf16.msra.mxu0 %v4643_v1  ;;  %v4659_v1 = vpack.c.bf16 %v1289_v54, %v1281_v52  ;;  %v1353_v52 = vld [vmem:[#allocation7 + $0x9e0] sm:$0xff]  ;;  %v1347_v54 = vld [vmem:[#allocation7 + $0x9b0] sm:$0xff] }
 0x29a   :  { %4900 = vmatpush1.bf16.msra.mxu1 %v4899_v2  ;;  %4646 = vmatprep.subr.bf16.mxu0 %v4645_v3  ;;  %v4915_v2 = vpack.c.bf16 %v1291_v6, %v1283_v55  ;;  %v4661_v3 = vpack.c.bf16 %v1306_v61, %v1298_v60  ;;  %v1370_v6 = vld [vmem:[#allocation7 + $0xa68] sm:$0xff]  ;;  %v1364_v60 = vld [vmem:[#allocation7 + $0xa38] sm:$0xff] }
 0x29b   :  { %4902 = vmatprep.subr.bf16.mxu1 %v4901_v12  ;;  %v1299_v12 = vld [vmem:[#allocation7 + $0x830] sm:$0xff]  ;;  %v1372_v61 = vld [vmem:[#allocation7 + $0xa78] sm:$0xff] }
 0x29c   :  { %v4933_v8 = vpack.c.bf16 %v1372_v61, %v1364_v60 }
 0x29d   :  { %4648 = vmatpush1.bf16.msra.mxu0 %v4647_v58  ;;  %v1324_v58 = vld [vmem:[#allocation7 + $0x8f8] sm:$0xff] }
 0x29e   :  { %4904 = vmatpush1.bf16.msra.mxu1 %v4903_v22  ;;  %4650 = vmatprep.subr.bf16.mxu0 %v4649_v23  ;;  %v4919_v22 = vpack.c.bf16 %v1307_v13, %v1299_v12  ;;  %v1313_v23 = vld [vmem:[#allocation7 + $0x8a0] sm:$0xff]  ;;  %v4921_v30 = vpack.c.bf16 %v1324_v58, %v1316_v21  ;;  %v1378_v12 = vld [vmem:[#allocation7 + $0xaa8] sm:$0xff] }
 0x29f   :  { %4906 = vmatprep.subr.bf16.mxu1 %v4905_v41  ;;  %v1323_v41 = vld [vmem:[#allocation7 + $0x8f0] sm:$0xff]  ;;  %v1386_v13 = vld [vmem:[#allocation7 + $0xae8] sm:$0xff] }
 0x2a0   :  { %v4681_v58 = vpack.c.bf16 %v1386_v13, %v1378_v12  ;;  %v1444_v12 = vld [vmem:[#allocation7 + $0xcb8] sm:$0xff] }
 0x2a1   :  { %4652 = vmatpush1.bf16.msra.mxu0 %v4651_v34  ;;  %v4667_v34 = vpack.c.bf16 %v1321_v24, %v1313_v23  ;;  %v1385_v23 = vld [vmem:[#allocation7 + $0xae0] sm:$0xff]  ;;  %v1379_v24 = vld [vmem:[#allocation7 + $0xab0] sm:$0xff]  ;;  %v1452_v13 = vld [vmem:[#allocation7 + $0xcf8] sm:$0xff] }
 0x2a2   :  { %4908 = vmatpush1.bf16.msra.mxu1 %v4907_v35  ;;  %4654 = vmatprep.subr.bf16.mxu0 %v4653_v49  ;;  %v4923_v35 = vpack.c.bf16 %v1323_v41, %v1315_v25  ;;  %v4669_v49 = vpack.c.bf16 %v1338_v29, %v1330_v50  ;;  %v4937_v25 = vpack.c.bf16 %v1388_v18, %v1380_v15  ;;  %v1394_v41 = vld [vmem:[#allocation7 + $0xb28] sm:$0xff]  ;;  %v1396_v29 = vld [vmem:[#allocation7 + $0xb38] sm:$0xff] }
 0x2a3   :  { %4910 = vmatprep.subr.bf16.mxu1 %v4909_v56  ;;  %v4925_v56 = vpack.c.bf16 %v1340_v33, %v1332_v31  ;;  %v1402_v50 = vld [vmem:[#allocation7 + $0xb68] sm:$0xff] }
 0x2a5   :  { %4656 = vmatpush1.bf16.msra.mxu0 %v4655_v48  ;;  %v4927_v48 = vpack.c.bf16 %v1339_v42, %v1331_v40  ;;  %v1403_v40 = vld [vmem:[#allocation7 + $0xb70] sm:$0xff]  ;;  %v1418_v42 = vld [vmem:[#allocation7 + $0xbe8] sm:$0xff] }
 0x2a6   :  { %4912 = vmatpush1.bf16.msra.mxu1 %v4911_v51  ;;  %4658 = vmatprep.subr.bf16.mxu0 %v4657_v37  ;;  %v4673_v51 = vpack.c.bf16 %v1354_v45, %v1346_v43  ;;  %v1345_v37 = vld [vmem:[#allocation7 + $0x9a0] sm:$0xff]  ;;  %v1412_v43 = vld [vmem:[#allocation7 + $0xbb8] sm:$0xff] }
 0x2a7   :  { %4914 = vmatprep.subr.bf16.mxu1 %v4913_v57  ;;  %v1362_v57 = vld [vmem:[#allocation7 + $0xa28] sm:$0xff]  ;;  %v4675_v62 = vpack.c.bf16 %v1353_v52, %v1345_v37  ;;  %v1420_v45 = vld [vmem:[#allocation7 + $0xbf8] sm:$0xff]  ;;  %v1411_v37 = vld [vmem:[#allocation7 + $0xbb0] sm:$0xff] }
 0x2a8   :  { %v4945_v52 = vpack.c.bf16 %v1420_v45, %v1412_v43 }
 0x2a9   :  { %4660 = vmatpush1.bf16.msra.mxu0 %v4659_v1  ;;  %v4677_v1 = vpack.c.bf16 %v1370_v6, %v1362_v57  ;;  %v1428_v57 = vld [vmem:[#allocation7 + $0xc38] sm:$0xff] }
 0x2aa   :  { %4916 = vmatpush1.bf16.msra.mxu1 %v4915_v2  ;;  %4662 = vmatprep.subr.bf16.mxu0 %v4661_v3  ;;  %v1361_v2 = vld [vmem:[#allocation7 + $0xa20] sm:$0xff]  ;;  %v1436_v6 = vld [vmem:[#allocation7 + $0xc78] sm:$0xff] }
 0x2ab   :  { %4918 = vmatprep.subr.bf16.mxu1 %v4917_v9  ;;  %v1369_v3 = vld [vmem:[#allocation7 + $0xa60] sm:$0xff]  ;;  %v1371_v9 = vld [vmem:[#allocation7 + $0xa70] sm:$0xff] }
 0x2ac   :  { %2736 = vmatmul.mubr.f32.vlgmr.msra.gmra.mrb[6].mxu0 %v5684_v63  ;;  %v4935_v21 = vpack.c.bf16 %v1371_v9, %v1363_v7  ;;  %v1435_v7 = vld [vmem:[#allocation7 + $0xc70] sm:$0xff]  ;;  %v1450_v9 = vld [vmem:[#allocation7 + $0xce8] sm:$0xff] }
 0x2ad   :  { %3020 = vmatmul.mubr.f32.vlgmr.msra.gmra.mrb[6].mxu1 %v5684_v63  ;;  %4664 = vmatpush1.bf16.msra.mxu0 %v4663_v19  ;;  %v1356_v63 = vld [vmem:[#allocation7 + $0x9f8] sm:$0xff]  ;;  %v4679_v19 = vpack.c.bf16 %v1369_v3, %v1361_v2  ;;  %v1427_v2 = vld [vmem:[#allocation7 + $0xc30] sm:$0xff]  ;;  %v4949_v3 = vpack.c.bf16 %v1436_v6, %v1428_v57 }
 0x2ae   :  { %2806 = vmatprep.mubr.f32.mxu0 %v5689_v16  ;;  %4920 = vmatpush1.bf16.msra.mxu1 %v4919_v22  ;;  %v4929_v55 = vpack.c.bf16 %v1356_v63, %v1348_v46  ;;  %v1377_v22 = vld [vmem:[#allocation7 + $0xaa0] sm:$0xff]  ;;  %v4943_v63 = vpack.c.bf16 %v1403_v40, %v1395_v36  ;;  %v4951_v18 = vpack.c.bf16 %v1435_v7, %v1427_v2  ;;  %v1467_v36 = vld [vmem:[#allocation7 + $0xd70] sm:$0xff]  ;;  %v1482_v40 = vld [vmem:[#allocation7 + $0xde8] sm:$0xff] }
 0x2af   :  { %3090 = vmatprep.mubr.f32.mxu1 %v5689_v16  ;;  %4666 = vmatprep.subr.bf16.mxu0 %v4665_v27  ;;  %v1355_v16 = vld [vmem:[#allocation7 + $0x9f0] sm:$0xff]  ;;  %v4683_v31 = vpack.c.bf16 %v1385_v23, %v1377_v22  ;;  %v4953_v23 = vpack.c.bf16 %v1452_v13, %v1444_v12  ;;  %v1514_v7 = vld [vmem:[#allocation7 + $0xee8] sm:$0xff] }
 0x2b0   :  { %4922 = vmatprep.subr.bf16.mxu1 %v4921_v30  ;;  %v4931_v10 = vpack.c.bf16 %v1355_v16, %v1347_v54  ;;  %v1387_v27 = vld [vmem:[#allocation7 + $0xaf0] sm:$0xff]  ;;  %v1404_v30 = vld [vmem:[#allocation7 + $0xb78] sm:$0xff]  ;;  %v1434_v16 = vld [vmem:[#allocation7 + $0xc68] sm:$0xff] }
 0x2b1   :  { %4668 = vmatpush1.bf16.msra.mxu0 %v4667_v34  ;;  %v4939_v33 = vpack.c.bf16 %v1387_v27, %v1379_v24  ;;  %v4685_v34 = vpack.c.bf16 %v1402_v50, %v1394_v41  ;;  %v4941_v39 = vpack.c.bf16 %v1404_v30, %v1396_v29  ;;  %v1419_v54 = vld [vmem:[#allocation7 + $0xbf0] sm:$0xff]  ;;  %v1466_v27 = vld [vmem:[#allocation7 + $0xd68] sm:$0xff]  ;;  %v1460_v41 = vld [vmem:[#allocation7 + $0xd38] sm:$0xff] }
 0x2b2   :  { %4924 = vmatpush1.bf16.msra.mxu1 %v4923_v35  ;;  %4670 = vmatprep.subr.bf16.mxu0 %v4669_v49  ;;  %v1393_v35 = vld [vmem:[#allocation7 + $0xb20] sm:$0xff]  ;;  %v4947_v61 = vpack.c.bf16 %v1419_v54, %v1411_v37  ;;  %v1443_v22 = vld [vmem:[#allocation7 + $0xcb0] sm:$0xff]  ;;  %v1468_v50 = vld [vmem:[#allocation7 + $0xd78] sm:$0xff] }
 0x2b3   :  { %4926 = vmatprep.subr.bf16.mxu1 %v4925_v56  ;;  %v1401_v49 = vld [vmem:[#allocation7 + $0xb60] sm:$0xff]  ;;  %v1410_v56 = vld [vmem:[#allocation7 + $0xba8] sm:$0xff]  ;;  %v1451_v24 = vld [vmem:[#allocation7 + $0xcf0] sm:$0xff] }
 0x2b4   :  { %v4687_v46 = vpack.c.bf16 %v1401_v49, %v1393_v35  ;;  %v4955_v30 = vpack.c.bf16 %v1451_v24, %v1443_v22  ;;  %v1459_v35 = vld [vmem:[#allocation7 + $0xd30] sm:$0xff]  ;;  %v4957_v49 = vpack.c.bf16 %v1468_v50, %v1460_v41  ;;  %v1498_v54 = vld [vmem:[#allocation7 + $0xe68] sm:$0xff] }
 0x2b5   :  { %4672 = vmatpush1.bf16.msra.mxu0 %v4671_v47  ;;  %v4689_v47 = vpack.c.bf16 %v1418_v42, %v1410_v56  ;;  %v1476_v56 = vld [vmem:[#allocation7 + $0xdb8] sm:$0xff]  ;;  %v4959_v45 = vpack.c.bf16 %v1467_v36, %v1459_v35  ;;  %v1483_v37 = vld [vmem:[#allocation7 + $0xdf0] sm:$0xff]  ;;  %v1530_v24 = vld [vmem:[#allocation7 + $0xf68] sm:$0xff] }
 0x2b6   :  { %4928 = vmatpush1.bf16.msra.mxu1 %v4927_v48  ;;  %4674 = vmatprep.subr.bf16.mxu0 %v4673_v51  ;;  %v1409_v48 = vld [vmem:[#allocation7 + $0xba0] sm:$0xff]  ;;  %v1484_v42 = vld [vmem:[#allocation7 + $0xdf8] sm:$0xff]  ;;  %v1499_v2 = vld [vmem:[#allocation7 + $0xe70] sm:$0xff] }
 0x2b7   :  { %4930 = vmatprep.subr.bf16.mxu1 %v4929_v55  ;;  %v1417_v51 = vld [vmem:[#allocation7 + $0xbe0] sm:$0xff]  ;;  %v1426_v55 = vld [vmem:[#allocation7 + $0xc28] sm:$0xff]  ;;  %v1515_v22 = vld [vmem:[#allocation7 + $0xef0] sm:$0xff] }
 0x2b8   :  { %v4691_v60 = vpack.c.bf16 %v1417_v51, %v1409_v48  ;;  %v1475_v48 = vld [vmem:[#allocation7 + $0xdb0] sm:$0xff]  ;;  %v4961_v51 = vpack.c.bf16 %v1484_v42, %v1476_v56  ;;  %v1546_v36 = vld [vmem:[#allocation7 + $0xfe8] sm:$0xff] }
 0x2b9   :  { %4676 = vmatpush1.bf16.msra.mxu0 %v4675_v62  ;;  %v4693_v62 = vpack.c.bf16 %v1434_v16, %v1426_v55  ;;  %v1492_v55 = vld [vmem:[#allocation7 + $0xe38] sm:$0xff]  ;;  %v4963_v6 = vpack.c.bf16 %v1483_v37, %v1475_v48  ;;  %v1531_v35 = vld [vmem:[#allocation7 + $0xf70] sm:$0xff]  ;;  %v1562_v37 = vld [vmem:[#allocation7 + $0x1068] sm:$0xff] }
 0x2ba   :  { %4932 = vmatpush1.bf16.msra.mxu1 %v4931_v10  ;;  %4678 = vmatprep.subr.bf16.mxu0 %v4677_v1  ;;  %v1425_v10 = vld [vmem:[#allocation7 + $0xc20] sm:$0xff]  ;;  %v1500_v16 = vld [vmem:[#allocation7 + $0xe78] sm:$0xff]  ;;  %v1547_v48 = vld [vmem:[#allocation7 + $0xff0] sm:$0xff] }
 0x2bb   :  { %4934 = vmatprep.subr.bf16.mxu1 %v4933_v8  ;;  %v1433_v1 = vld [vmem:[#allocation7 + $0xc60] sm:$0xff]  ;;  %v1442_v8 = vld [vmem:[#allocation7 + $0xca8] sm:$0xff] }
 0x2bc   :  { %v4695_v15 = vpack.c.bf16 %v1433_v1, %v1425_v10  ;;  %v1491_v10 = vld [vmem:[#allocation7 + $0xe30] sm:$0xff]  ;;  %v4965_v1 = vpack.c.bf16 %v1500_v16, %v1492_v55 }
 0x2bd   :  { %4680 = vmatpush1.bf16.msra.mxu0 %v4679_v19  ;;  %v4697_v19 = vpack.c.bf16 %v1450_v9, %v1442_v8  ;;  %v1508_v8 = vld [vmem:[#allocation7 + $0xeb8] sm:$0xff]  ;;  %v4967_v13 = vpack.c.bf16 %v1499_v2, %v1491_v10  ;;  %v1563_v10 = vld [vmem:[#allocation7 + $0x1070] sm:$0xff]  ;;  %v1578_v2 = vld [vmem:[#allocation7 + $0x10e8] sm:$0xff] }
 0x2be   :  { %4936 = vmatpush1.bf16.msra.mxu1 %v4935_v21  ;;  %4682 = vmatprep.subr.bf16.mxu0 %v4681_v58  ;;  %v1441_v21 = vld [vmem:[#allocation7 + $0xca0] sm:$0xff]  ;;  %v1516_v9 = vld [vmem:[#allocation7 + $0xef8] sm:$0xff] }
 0x2bf   :  { %4938 = vmatprep.subr.bf16.mxu1 %v4937_v25  ;;  %v1449_v58 = vld [vmem:[#allocation7 + $0xce0] sm:$0xff]  ;;  %v1458_v25 = vld [vmem:[#allocation7 + $0xd28] sm:$0xff] }
 0x2c0   :  { %v4699_v29 = vpack.c.bf16 %v1449_v58, %v1441_v21  ;;  %v1507_v21 = vld [vmem:[#allocation7 + $0xeb0] sm:$0xff]  ;;  %v4969_v58 = vpack.c.bf16 %v1516_v9, %v1508_v8  ;;  %v1580_v8 = vld [vmem:[#allocation7 + $0x10f8] sm:$0xff] }
 0x2c1   :  { %4684 = vmatpush1.bf16.msra.mxu0 %v4683_v31  ;;  %v4701_v31 = vpack.c.bf16 %v1466_v27, %v1458_v25  ;;  %v1524_v25 = vld [vmem:[#allocation7 + $0xf38] sm:$0xff]  ;;  %v4971_v50 = vpack.c.bf16 %v1515_v22, %v1507_v21  ;;  %v1586_v21 = vld [vmem:[#allocation7 + $0x1128] sm:$0xff] }
 0x2c2   :  { %4940 = vmatpush1.bf16.msra.mxu1 %v4939_v33  ;;  %4686 = vmatprep.subr.bf16.mxu0 %v4685_v34  ;;  %v1457_v33 = vld [vmem:[#allocation7 + $0xd20] sm:$0xff]  ;;  %v1532_v27 = vld [vmem:[#allocation7 + $0xf78] sm:$0xff] }
 0x2c3   :  { %4942 = vmatprep.subr.bf16.mxu1 %v4941_v39  ;;  %v1465_v34 = vld [vmem:[#allocation7 + $0xd60] sm:$0xff]  ;;  %v1474_v39 = vld [vmem:[#allocation7 + $0xda8] sm:$0xff] }
 0x2c4   :  { %v4703_v43 = vpack.c.bf16 %v1465_v34, %v1457_v33  ;;  %v1523_v33 = vld [vmem:[#allocation7 + $0xf30] sm:$0xff]  ;;  %v4973_v34 = vpack.c.bf16 %v1532_v27, %v1524_v25 }
 0x2c5   :  { %4688 = vmatpush1.bf16.msra.mxu0 %v4687_v46  ;;  %v4705_v46 = vpack.c.bf16 %v1482_v40, %v1474_v39  ;;  %v1540_v39 = vld [vmem:[#allocation7 + $0xfb8] sm:$0xff]  ;;  %v4975_v42 = vpack.c.bf16 %v1531_v35, %v1523_v33  ;;  %v1595_v33 = vld [vmem:[#allocation7 + $0x1170] sm:$0xff]  ;;  %v1610_v35 = vld [vmem:[#allocation7 + $0x11e8] sm:$0xff] }
 0x2c6   :  { %4944 = vmatpush1.bf16.msra.mxu1 %v4943_v63  ;;  %4690 = vmatprep.subr.bf16.mxu0 %v4689_v47  ;;  %v1473_v63 = vld [vmem:[#allocation7 + $0xda0] sm:$0xff]  ;;  %v1548_v40 = vld [vmem:[#allocation7 + $0xff8] sm:$0xff] }
 0x2c7   :  { %4946 = vmatprep.subr.bf16.mxu1 %v4945_v52  ;;  %v1481_v47 = vld [vmem:[#allocation7 + $0xde0] sm:$0xff]  ;;  %v1490_v52 = vld [vmem:[#allocation7 + $0xe28] sm:$0xff] }
 0x2c8   :  { %v4707_v57 = vpack.c.bf16 %v1481_v47, %v1473_v63  ;;  %v1539_v63 = vld [vmem:[#allocation7 + $0xfb0] sm:$0xff]  ;;  %v4977_v47 = vpack.c.bf16 %v1548_v40, %v1540_v39 }
 0x2c9   :  { %4692 = vmatpush1.bf16.msra.mxu0 %v4691_v60  ;;  %v4709_v60 = vpack.c.bf16 %v1498_v54, %v1490_v52  ;;  %v1556_v52 = vld [vmem:[#allocation7 + $0x1038] sm:$0xff]  ;;  %v4979_v16 = vpack.c.bf16 %v1547_v48, %v1539_v63  ;;  %v1626_v63 = vld [vmem:[#allocation7 + $0x1268] sm:$0xff] }
 0x2ca   :  { %4948 = vmatpush1.bf16.msra.mxu1 %v4947_v61  ;;  %4694 = vmatprep.subr.bf16.mxu0 %v4693_v62  ;;  %v1489_v61 = vld [vmem:[#allocation7 + $0xe20] sm:$0xff]  ;;  %v1564_v54 = vld [vmem:[#allocation7 + $0x1078] sm:$0xff] }
 0x2cb   :  { %4950 = vmatprep.subr.bf16.mxu1 %v4949_v3  ;;  %v1497_v62 = vld [vmem:[#allocation7 + $0xe60] sm:$0xff]  ;;  %v1506_v3 = vld [vmem:[#allocation7 + $0xea8] sm:$0xff]  ;;  %v1628_v48 = vld [vmem:[#allocation7 + $0x1278] sm:$0xff] }
 0x2cc   :  { %v4711_v12 = vpack.c.bf16 %v1497_v62, %v1489_v61  ;;  %v4981_v61 = vpack.c.bf16 %v1564_v54, %v1556_v52  ;;  %v1555_v62 = vld [vmem:[#allocation7 + $0x1030] sm:$0xff]  ;;  %v1617_v54 = vld [vmem:[#allocation7 + $0x1220] sm:$0xff] }
 0x2cd   :  { %4696 = vmatpush1.bf16.msra.mxu0 %v4695_v15  ;;  %v4713_v15 = vpack.c.bf16 %v1514_v7, %v1506_v3  ;;  %v1572_v7 = vld [vmem:[#allocation7 + $0x10b8] sm:$0xff]  ;;  %v4983_v9 = vpack.c.bf16 %v1563_v10, %v1555_v62 }
 0x2ce   :  { %4952 = vmatpush1.bf16.msra.mxu1 %v4951_v18  ;;  %4698 = vmatprep.subr.bf16.mxu0 %v4697_v19  ;;  %v1505_v18 = vld [vmem:[#allocation7 + $0xea0] sm:$0xff]  ;;  %v4985_v22 = vpack.c.bf16 %v1580_v8, %v1572_v7  ;;  %v1636_v62 = vld [vmem:[#allocation7 + $0x12b8] sm:$0xff] }
 0x2cf   :  { %4954 = vmatprep.subr.bf16.mxu1 %v4953_v23  ;;  %v1513_v19 = vld [vmem:[#allocation7 + $0xee0] sm:$0xff]  ;;  %v1522_v23 = vld [vmem:[#allocation7 + $0xf28] sm:$0xff]  ;;  %v1644_v10 = vld [vmem:[#allocation7 + $0x12f8] sm:$0xff] }
 0x2d0   :  { %v4715_v41 = vpack.c.bf16 %v1513_v19, %v1505_v18  ;;  %v1579_v19 = vld [vmem:[#allocation7 + $0x10f0] sm:$0xff]  ;;  %v1633_v7 = vld [vmem:[#allocation7 + $0x12a0] sm:$0xff] }
 0x2d1   :  { %4700 = vmatpush1.bf16.msra.mxu0 %v4699_v29  ;;  %v4717_v29 = vpack.c.bf16 %v1530_v24, %v1522_v23  ;;  %v1588_v23 = vld [vmem:[#allocation7 + $0x1138] sm:$0xff]  ;;  %v1641_v8 = vld [vmem:[#allocation7 + $0x12e0] sm:$0xff] }
 0x2d2   :  { %4956 = vmatpush1.bf16.msra.mxu1 %v4955_v30  ;;  %4702 = vmatprep.subr.bf16.mxu0 %v4701_v31  ;;  %v1521_v30 = vld [vmem:[#allocation7 + $0xf20] sm:$0xff]  ;;  %v1596_v24 = vld [vmem:[#allocation7 + $0x1178] sm:$0xff] }
 0x2d3   :  { %4958 = vmatprep.subr.bf16.mxu1 %v4957_v49  ;;  %v1529_v31 = vld [vmem:[#allocation7 + $0xf60] sm:$0xff]  ;;  %v1538_v49 = vld [vmem:[#allocation7 + $0xfa8] sm:$0xff] }
 0x2d4   :  { %v4719_v56 = vpack.c.bf16 %v1529_v31, %v1521_v30  ;;  %v1587_v30 = vld [vmem:[#allocation7 + $0x1130] sm:$0xff]  ;;  %v4989_v31 = vpack.c.bf16 %v1596_v24, %v1588_v23  ;;  %v1649_v24 = vld [vmem:[#allocation7 + $0x1320] sm:$0xff] }
 0x2d5   :  { %4704 = vmatpush1.bf16.msra.mxu0 %v4703_v43  ;;  %v4721_v43 = vpack.c.bf16 %v1546_v36, %v1538_v49  ;;  %v1604_v49 = vld [vmem:[#allocation7 + $0x11b8] sm:$0xff]  ;;  %v4991_v39 = vpack.c.bf16 %v1595_v33, %v1587_v30  ;;  %v1674_v30 = vld [vmem:[#allocation7 + $0x13e8] sm:$0xff] }
 0x2d6   :  { %4960 = vmatpush1.bf16.msra.mxu1 %v4959_v45  ;;  %4706 = vmatprep.subr.bf16.mxu0 %v4705_v46  ;;  %v1537_v45 = vld [vmem:[#allocation7 + $0xfa0] sm:$0xff]  ;;  %v1676_v33 = vld [vmem:[#allocation7 + $0x13f8] sm:$0xff] }
 0x2d7   :  { %4962 = vmatprep.subr.bf16.mxu1 %v4961_v51  ;;  %v1545_v46 = vld [vmem:[#allocation7 + $0xfe0] sm:$0xff]  ;;  %v1554_v51 = vld [vmem:[#allocation7 + $0x1028] sm:$0xff] }
 0x2d8   :  { %v4723_v55 = vpack.c.bf16 %v1545_v46, %v1537_v45  ;;  %v1618_v46 = vld [vmem:[#allocation7 + $0x1228] sm:$0xff] }
 0x2d9   :  { %4708 = vmatpush1.bf16.msra.mxu0 %v4707_v57  ;;  %v4725_v57 = vpack.c.bf16 %v1562_v37, %v1554_v51  ;;  %v4741_v52 = vpack.c.bf16 %v1626_v63, %v1618_v46 }
 0x2da   :  { %4964 = vmatpush1.bf16.msra.mxu1 %v4963_v6  ;;  %4710 = vmatprep.subr.bf16.mxu0 %v4709_v60  ;;  %v1553_v6 = vld [vmem:[#allocation7 + $0x1020] sm:$0xff] }
 0x2db   :  { %4966 = vmatprep.subr.bf16.mxu1 %v4965_v1  ;;  %v1561_v60 = vld [vmem:[#allocation7 + $0x1060] sm:$0xff]  ;;  %v1570_v1 = vld [vmem:[#allocation7 + $0x10a8] sm:$0xff] }
 0x2dc   :  { %v4727_v3 = vpack.c.bf16 %v1561_v60, %v1553_v6  ;;  %v4729_v18 = vpack.c.bf16 %v1578_v2, %v1570_v1  ;;  %v1627_v6 = vld [vmem:[#allocation7 + $0x1270] sm:$0xff]  ;;  %v1634_v60 = vld [vmem:[#allocation7 + $0x12a8] sm:$0xff] }
 0x2dd   :  { %4712 = vmatpush1.bf16.msra.mxu0 %v4711_v12  ;;  %v1569_v12 = vld [vmem:[#allocation7 + $0x10a0] sm:$0xff] }
 0x2de   :  { %4968 = vmatpush1.bf16.msra.mxu1 %v4967_v13  ;;  %4714 = vmatprep.subr.bf16.mxu0 %v4713_v15  ;;  %v1577_v13 = vld [vmem:[#allocation7 + $0x10e0] sm:$0xff]  ;;  %v1571_v15 = vld [vmem:[#allocation7 + $0x10b0] sm:$0xff] }
 0x2df   :  { %4970 = vmatprep.subr.bf16.mxu1 %v4969_v58  ;;  %v1594_v58 = vld [vmem:[#allocation7 + $0x1168] sm:$0xff]  ;;  %v4731_v25 = vpack.c.bf16 %v1577_v13, %v1569_v12  ;;  %v4987_v27 = vpack.c.bf16 %v1579_v19, %v1571_v15  ;;  %v5001_v12 = vpack.c.bf16 %v1644_v10, %v1636_v62  ;;  %v1643_v13 = vld [vmem:[#allocation7 + $0x12f0] sm:$0xff]  ;;  %v1652_v19 = vld [vmem:[#allocation7 + $0x1338] sm:$0xff] }
 0x2e0   :  { %v1650_v15 = vld [vmem:[#allocation7 + $0x1328] sm:$0xff]  ;;  %v1697_v10 = vld [vmem:[#allocation7 + $0x14a0] sm:$0xff] }
 0x2e1   :  { %4716 = vmatpush1.bf16.msra.mxu0 %v4715_v41  ;;  %v4733_v41 = vpack.c.bf16 %v1594_v58, %v1586_v21  ;;  %v1660_v21 = vld [vmem:[#allocation7 + $0x1378] sm:$0xff]  ;;  %v4747_v58 = vpack.c.bf16 %v1641_v8, %v1633_v7  ;;  %v1707_v7 = vld [vmem:[#allocation7 + $0x14f0] sm:$0xff]  ;;  %v1714_v8 = vld [vmem:[#allocation7 + $0x1528] sm:$0xff] }
 0x2e2   :  { %4972 = vmatpush1.bf16.msra.mxu1 %v4971_v50  ;;  %4718 = vmatprep.subr.bf16.mxu0 %v4717_v29  ;;  %v1585_v50 = vld [vmem:[#allocation7 + $0x1120] sm:$0xff] }
 0x2e3   :  { %4974 = vmatprep.subr.bf16.mxu1 %v4973_v34  ;;  %v1593_v29 = vld [vmem:[#allocation7 + $0x1160] sm:$0xff]  ;;  %v1602_v34 = vld [vmem:[#allocation7 + $0x11a8] sm:$0xff] }
 0x2e4   :  { %v4735_v36 = vpack.c.bf16 %v1593_v29, %v1585_v50  ;;  %v4737_v40 = vpack.c.bf16 %v1610_v35, %v1602_v34  ;;  %v1659_v50 = vld [vmem:[#allocation7 + $0x1370] sm:$0xff]  ;;  %v1666_v29 = vld [vmem:[#allocation7 + $0x13a8] sm:$0xff] }
 0x2e5   :  { %4720 = vmatpush1.bf16.msra.mxu0 %v4719_v56  ;;  %v1601_v56 = vld [vmem:[#allocation7 + $0x11a0] sm:$0xff] }
 0x2e6   :  { %4976 = vmatpush1.bf16.msra.mxu1 %v4975_v42  ;;  %4722 = vmatprep.subr.bf16.mxu0 %v4721_v43  ;;  %v1609_v42 = vld [vmem:[#allocation7 + $0x11e0] sm:$0xff]  ;;  %v1603_v43 = vld [vmem:[#allocation7 + $0x11b0] sm:$0xff] }
 0x2e7   :  { %4978 = vmatprep.subr.bf16.mxu1 %v4977_v47  ;;  %v1620_v47 = vld [vmem:[#allocation7 + $0x1238] sm:$0xff]  ;;  %v4739_v51 = vpack.c.bf16 %v1609_v42, %v1601_v56  ;;  %v1675_v56 = vld [vmem:[#allocation7 + $0x13f0] sm:$0xff]  ;;  %v1682_v42 = vld [vmem:[#allocation7 + $0x1428] sm:$0xff] }
 0x2e9   :  { %4724 = vmatpush1.bf16.msra.mxu0 %v4723_v55  ;;  %v1625_v55 = vld [vmem:[#allocation7 + $0x1260] sm:$0xff] }
 0x2ea   :  { %4980 = vmatpush1.bf16.msra.mxu1 %v4979_v16  ;;  %4726 = vmatprep.subr.bf16.mxu0 %v4725_v57  ;;  %v1619_v16 = vld [vmem:[#allocation7 + $0x1230] sm:$0xff]  ;;  %v4997_v57 = vpack.c.bf16 %v1628_v48, %v1620_v47  ;;  %v4743_v1 = vpack.c.bf16 %v1625_v55, %v1617_v54  ;;  %v1681_v48 = vld [vmem:[#allocation7 + $0x1420] sm:$0xff]  ;;  %v1698_v55 = vld [vmem:[#allocation7 + $0x14a8] sm:$0xff] }
 0x2eb   :  { %4982 = vmatprep.subr.bf16.mxu1 %v4981_v61  ;;  %v1642_v61 = vld [vmem:[#allocation7 + $0x12e8] sm:$0xff]  ;;  %v4999_v2 = vpack.c.bf16 %v1627_v6, %v1619_v16  ;;  %v1691_v54 = vld [vmem:[#allocation7 + $0x1470] sm:$0xff]  ;;  %v1708_v6 = vld [vmem:[#allocation7 + $0x14f8] sm:$0xff] }
 0x2ec   :  { %2807 = vmatmul.mubr.f32.vlgmr.msra.gmra.mrb[6].mxu0 %v5722_v11  ;;  %v1706_v16 = vld [vmem:[#allocation7 + $0x14e8] sm:$0xff] }
 0x2ed   :  { %3091 = vmatmul.mubr.f32.vlgmr.msra.gmra.mrb[6].mxu1 %v5722_v11  ;;  %4728 = vmatpush1.bf16.msra.mxu0 %v4727_v3  ;;  %v1612_v11 = vld [vmem:[#allocation7 + $0x11f8] sm:$0xff]  ;;  %v4745_v3 = vpack.c.bf16 %v1642_v61, %v1634_v60  ;;  %v4761_v62 = vpack.c.bf16 %v1706_v16, %v1698_v55 }
 0x2ee   :  { %2877 = vmatprep.mubr.f32.mxu0 %v5729_v20  ;;  %4984 = vmatpush1.bf16.msra.mxu1 %v4983_v9  ;;  %v4993_v45 = vpack.c.bf16 %v1612_v11, %v1604_v49  ;;  %v1635_v9 = vld [vmem:[#allocation7 + $0x12b0] sm:$0xff]  ;;  %v4753_v49 = vpack.c.bf16 %v1674_v30, %v1666_v29  ;;  %v1665_v11 = vld [vmem:[#allocation7 + $0x13a0] sm:$0xff] }
 0x2ef   :  { %3161 = vmatprep.mubr.f32.mxu1 %v5729_v20  ;;  %4730 = vmatprep.subr.bf16.mxu0 %v4729_v18  ;;  %v1611_v20 = vld [vmem:[#allocation7 + $0x11f0] sm:$0xff]  ;;  %v1658_v18 = vld [vmem:[#allocation7 + $0x1368] sm:$0xff] }
 0x2f0   :  { %4986 = vmatprep.subr.bf16.mxu1 %v4985_v22  ;;  %v4995_v37 = vpack.c.bf16 %v1611_v20, %v1603_v43  ;;  %v5003_v22 = vpack.c.bf16 %v1643_v13, %v1635_v9  ;;  %v4749_v23 = vpack.c.bf16 %v1658_v18, %v1650_v15  ;;  %v1690_v43 = vld [vmem:[#allocation7 + $0x1468] sm:$0xff]  ;;  %v1692_v20 = vld [vmem:[#allocation7 + $0x1478] sm:$0xff] }
 0x2f1   :  { %4732 = vmatpush1.bf16.msra.mxu0 %v4731_v25  ;;  %v1657_v25 = vld [vmem:[#allocation7 + $0x1360] sm:$0xff]  ;;  %v4757_v47 = vpack.c.bf16 %v1690_v43, %v1682_v42  ;;  %v1722_v9 = vld [vmem:[#allocation7 + $0x1568] sm:$0xff]  ;;  %v1724_v13 = vld [vmem:[#allocation7 + $0x1578] sm:$0xff] }
 0x2f2   :  { %4988 = vmatpush1.bf16.msra.mxu1 %v4987_v27  ;;  %4734 = vmatprep.subr.bf16.mxu0 %v4733_v41  ;;  %v1651_v27 = vld [vmem:[#allocation7 + $0x1330] sm:$0xff]  ;;  %v5005_v41 = vpack.c.bf16 %v1660_v21, %v1652_v19  ;;  %v4751_v34 = vpack.c.bf16 %v1657_v25, %v1649_v24  ;;  %v4765_v19 = vpack.c.bf16 %v1722_v9, %v1714_v8  ;;  %v1713_v21 = vld [vmem:[#allocation7 + $0x1520] sm:$0xff]  ;;  %v1730_v25 = vld [vmem:[#allocation7 + $0x15a8] sm:$0xff] }
 0x2f3   :  { %4990 = vmatprep.subr.bf16.mxu1 %v4989_v31  ;;  %v1668_v31 = vld [vmem:[#allocation7 + $0x13b8] sm:$0xff]  ;;  %v5007_v35 = vpack.c.bf16 %v1659_v50, %v1651_v27  ;;  %v1723_v24 = vld [vmem:[#allocation7 + $0x1570] sm:$0xff]  ;;  %v1738_v27 = vld [vmem:[#allocation7 + $0x15e8] sm:$0xff] }
 0x2f4   :  { %v1740_v50 = vld [vmem:[#allocation7 + $0x15f8] sm:$0xff] }
 0x2f5   :  { %4736 = vmatpush1.bf16.msra.mxu0 %v4735_v36  ;;  %v1673_v36 = vld [vmem:[#allocation7 + $0x13e0] sm:$0xff] }
 0x2f6   :  { %4992 = vmatpush1.bf16.msra.mxu1 %v4991_v39  ;;  %4738 = vmatprep.subr.bf16.mxu0 %v4737_v40  ;;  %v1667_v39 = vld [vmem:[#allocation7 + $0x13b0] sm:$0xff]  ;;  %v5009_v40 = vpack.c.bf16 %v1676_v33, %v1668_v31  ;;  %v4755_v46 = vpack.c.bf16 %v1673_v36, %v1665_v11  ;;  %v4769_v31 = vpack.c.bf16 %v1738_v27, %v1730_v25  ;;  %v1729_v33 = vld [vmem:[#allocation7 + $0x15a0] sm:$0xff]  ;;  %v1746_v36 = vld [vmem:[#allocation7 + $0x1628] sm:$0xff] }
 0x2f7   :  { %4994 = vmatprep.subr.bf16.mxu1 %v4993_v45  ;;  %v1684_v45 = vld [vmem:[#allocation7 + $0x1438] sm:$0xff]  ;;  %v5011_v63 = vpack.c.bf16 %v1675_v56, %v1667_v39  ;;  %v1739_v11 = vld [vmem:[#allocation7 + $0x15f0] sm:$0xff]  ;;  %v1754_v39 = vld [vmem:[#allocation7 + $0x1668] sm:$0xff] }
 0x2f8   :  { %v1756_v56 = vld [vmem:[#allocation7 + $0x1678] sm:$0xff] }
 0x2f9   :  { %4740 = vmatpush1.bf16.msra.mxu0 %v4739_v51  ;;  %v1689_v51 = vld [vmem:[#allocation7 + $0x1460] sm:$0xff] }
 0x2fa   :  { %4996 = vmatpush1.bf16.msra.mxu1 %v4995_v37  ;;  %4742 = vmatprep.subr.bf16.mxu0 %v4741_v52  ;;  %v1683_v37 = vld [vmem:[#allocation7 + $0x1430] sm:$0xff]  ;;  %v5013_v52 = vpack.c.bf16 %v1692_v20, %v1684_v45  ;;  %v4759_v60 = vpack.c.bf16 %v1689_v51, %v1681_v48  ;;  %v4773_v45 = vpack.c.bf16 %v1754_v39, %v1746_v36  ;;  %v1745_v20 = vld [vmem:[#allocation7 + $0x1620] sm:$0xff]  ;;  %v1762_v51 = vld [vmem:[#allocation7 + $0x16a8] sm:$0xff] }
 0x2fb   :  { %4998 = vmatprep.subr.bf16.mxu1 %v4997_v57  ;;  %v1700_v57 = vld [vmem:[#allocation7 + $0x14b8] sm:$0xff]  ;;  %v5015_v61 = vpack.c.bf16 %v1691_v54, %v1683_v37  ;;  %v1755_v48 = vld [vmem:[#allocation7 + $0x1670] sm:$0xff]  ;;  %v1770_v37 = vld [vmem:[#allocation7 + $0x16e8] sm:$0xff] }
 0x2fc   :  { %v1772_v54 = vld [vmem:[#allocation7 + $0x16f8] sm:$0xff] }
 0x2fd   :  { %4744 = vmatpush1.bf16.msra.mxu0 %v4743_v1  ;;  %v1705_v1 = vld [vmem:[#allocation7 + $0x14e0] sm:$0xff] }
 0x2fe   :  { %5000 = vmatpush1.bf16.msra.mxu1 %v4999_v2  ;;  %4746 = vmatprep.subr.bf16.mxu0 %v4745_v3  ;;  %v1699_v2 = vld [vmem:[#allocation7 + $0x14b0] sm:$0xff]  ;;  %v5017_v3 = vpack.c.bf16 %v1708_v6, %v1700_v57  ;;  %v4763_v15 = vpack.c.bf16 %v1705_v1, %v1697_v10  ;;  %v4777_v57 = vpack.c.bf16 %v1770_v37, %v1762_v51  ;;  %v1761_v6 = vld [vmem:[#allocation7 + $0x16a0] sm:$0xff]  ;;  %v1778_v1 = vld [vmem:[#allocation7 + $0x1728] sm:$0xff] }
 0x2ff   :  { %5002 = vmatprep.subr.bf16.mxu1 %v5001_v12  ;;  %v1716_v12 = vld [vmem:[#allocation7 + $0x1538] sm:$0xff]  ;;  %v5019_v18 = vpack.c.bf16 %v1707_v7, %v1699_v2  ;;  %v1771_v10 = vld [vmem:[#allocation7 + $0x16f0] sm:$0xff]  ;;  %v1786_v2 = vld [vmem:[#allocation7 + $0x1768] sm:$0xff] }
 0x300   :  { %v1788_v7 = vld [vmem:[#allocation7 + $0x1778] sm:$0xff] }
 0x301   :  { %4748 = vmatpush1.bf16.msra.mxu0 %v4747_v58  ;;  %v1721_v58 = vld [vmem:[#allocation7 + $0x1560] sm:$0xff]  ;;  %v1836_v51 = vld [vmem:[#allocation7 + $0x18f8] sm:$0xff] }
 0x302   :  { %5004 = vmatpush1.bf16.msra.mxu1 %v5003_v22  ;;  %4750 = vmatprep.subr.bf16.mxu0 %v4749_v23  ;;  %v1715_v22 = vld [vmem:[#allocation7 + $0x1530] sm:$0xff]  ;;  %v5021_v23 = vpack.c.bf16 %v1724_v13, %v1716_v12  ;;  %v4767_v29 = vpack.c.bf16 %v1721_v58, %v1713_v21  ;;  %v4781_v12 = vpack.c.bf16 %v1786_v2, %v1778_v1  ;;  %v1777_v13 = vld [vmem:[#allocation7 + $0x1720] sm:$0xff]  ;;  %v1794_v58 = vld [vmem:[#allocation7 + $0x17a8] sm:$0xff] }
 0x303   :  { %5006 = vmatprep.subr.bf16.mxu1 %v5005_v41  ;;  %v1732_v41 = vld [vmem:[#allocation7 + $0x15b8] sm:$0xff]  ;;  %v5023_v30 = vpack.c.bf16 %v1723_v24, %v1715_v22  ;;  %v1787_v21 = vld [vmem:[#allocation7 + $0x1770] sm:$0xff]  ;;  %v1802_v22 = vld [vmem:[#allocation7 + $0x17e8] sm:$0xff] }
 0x304   :  { %v1804_v24 = vld [vmem:[#allocation7 + $0x17f8] sm:$0xff] }
 0x305   :  { %4752 = vmatpush1.bf16.msra.mxu0 %v4751_v34  ;;  %v1737_v34 = vld [vmem:[#allocation7 + $0x15e0] sm:$0xff] }
 0x306   :  { %5008 = vmatpush1.bf16.msra.mxu1 %v5007_v35  ;;  %4754 = vmatprep.subr.bf16.mxu0 %v4753_v49  ;;  %v1731_v35 = vld [vmem:[#allocation7 + $0x15b0] sm:$0xff]  ;;  %v5025_v49 = vpack.c.bf16 %v1740_v50, %v1732_v41  ;;  %v4771_v42 = vpack.c.bf16 %v1737_v34, %v1729_v33  ;;  %v4785_v41 = vpack.c.bf16 %v1802_v22, %v1794_v58  ;;  %v1793_v50 = vld [vmem:[#allocation7 + $0x17a0] sm:$0xff]  ;;  %v1810_v34 = vld [vmem:[#allocation7 + $0x1828] sm:$0xff] }
 0x307   :  { %5010 = vmatprep.subr.bf16.mxu1 %v5009_v40  ;;  %v1748_v40 = vld [vmem:[#allocation7 + $0x1638] sm:$0xff]  ;;  %v5027_v43 = vpack.c.bf16 %v1739_v11, %v1731_v35  ;;  %v1803_v33 = vld [vmem:[#allocation7 + $0x17f0] sm:$0xff]  ;;  %v1818_v35 = vld [vmem:[#allocation7 + $0x1868] sm:$0xff] }
 0x308   :  { %v1820_v11 = vld [vmem:[#allocation7 + $0x1878] sm:$0xff] }
 0x309   :  { %4756 = vmatpush1.bf16.msra.mxu0 %v4755_v46  ;;  %v1753_v46 = vld [vmem:[#allocation7 + $0x1660] sm:$0xff] }
 0x30a   :  { %5012 = vmatpush1.bf16.msra.mxu1 %v5011_v63  ;;  %4758 = vmatprep.subr.bf16.mxu0 %v4757_v47  ;;  %v1747_v63 = vld [vmem:[#allocation7 + $0x1630] sm:$0xff]  ;;  %v5029_v47 = vpack.c.bf16 %v1756_v56, %v1748_v40  ;;  %v4775_v55 = vpack.c.bf16 %v1753_v46, %v1745_v20  ;;  %v4789_v40 = vpack.c.bf16 %v1818_v35, %v1810_v34  ;;  %v1809_v56 = vld [vmem:[#allocation7 + $0x1820] sm:$0xff]  ;;  %v1826_v46 = vld [vmem:[#allocation7 + $0x18a8] sm:$0xff] }
 0x30b   :  { %5014 = vmatprep.subr.bf16.mxu1 %v5013_v52  ;;  %v1764_v52 = vld [vmem:[#allocation7 + $0x16b8] sm:$0xff]  ;;  %v5031_v16 = vpack.c.bf16 %v1755_v48, %v1747_v63  ;;  %v1819_v20 = vld [vmem:[#allocation7 + $0x1870] sm:$0xff]  ;;  %v1834_v63 = vld [vmem:[#allocation7 + $0x18e8] sm:$0xff] }
 0x30c   :  { %v1828_v48 = vld [vmem:[#allocation7 + $0x18b8] sm:$0xff]  ;;  %v1873_v35 = vld [vmem:[#allocation7 + $0x1a20] sm:$0xff] }
 0x30d   :  { %4760 = vmatpush1.bf16.msra.mxu0 %v4759_v60  ;;  %v1769_v60 = vld [vmem:[#allocation7 + $0x16e0] sm:$0xff] }
 0x30e   :  { %5016 = vmatpush1.bf16.msra.mxu1 %v5015_v61  ;;  %4762 = vmatprep.subr.bf16.mxu0 %v4761_v62  ;;  %v1763_v61 = vld [vmem:[#allocation7 + $0x16b0] sm:$0xff]  ;;  %v5033_v62 = vpack.c.bf16 %v1772_v54, %v1764_v52  ;;  %v4779_v8 = vpack.c.bf16 %v1769_v60, %v1761_v6  ;;  %v1825_v52 = vld [vmem:[#allocation7 + $0x18a0] sm:$0xff]  ;;  %v1842_v6 = vld [vmem:[#allocation7 + $0x1928] sm:$0xff] }
 0x30f   :  { %5018 = vmatprep.subr.bf16.mxu1 %v5017_v3  ;;  %v1780_v3 = vld [vmem:[#allocation7 + $0x1738] sm:$0xff]  ;;  %v5035_v9 = vpack.c.bf16 %v1771_v10, %v1763_v61  ;;  %v1833_v54 = vld [vmem:[#allocation7 + $0x18e0] sm:$0xff]  ;;  %v1850_v60 = vld [vmem:[#allocation7 + $0x1968] sm:$0xff]  ;;  %v5049_v61 = vpack.c.bf16 %v1836_v51, %v1828_v48 }
 0x310   :  { %v1852_v10 = vld [vmem:[#allocation7 + $0x1978] sm:$0xff]  ;;  %v4795_v1 = vpack.c.bf16 %v1833_v54, %v1825_v52  ;;  %v1891_v48 = vld [vmem:[#allocation7 + $0x1ab0] sm:$0xff]  ;;  %v1906_v52 = vld [vmem:[#allocation7 + $0x1b28] sm:$0xff] }
 0x311   :  { %4764 = vmatpush1.bf16.msra.mxu0 %v4763_v15  ;;  %v1785_v15 = vld [vmem:[#allocation7 + $0x1760] sm:$0xff]  ;;  %v1914_v54 = vld [vmem:[#allocation7 + $0x1b68] sm:$0xff] }
 0x312   :  { %5020 = vmatpush1.bf16.msra.mxu1 %v5019_v18  ;;  %4766 = vmatprep.subr.bf16.mxu0 %v4765_v19  ;;  %v1779_v18 = vld [vmem:[#allocation7 + $0x1730] sm:$0xff]  ;;  %v5037_v19 = vpack.c.bf16 %v1788_v7, %v1780_v3  ;;  %v4783_v25 = vpack.c.bf16 %v1785_v15, %v1777_v13  ;;  %v4797_v3 = vpack.c.bf16 %v1850_v60, %v1842_v6  ;;  %v1841_v7 = vld [vmem:[#allocation7 + $0x1920] sm:$0xff]  ;;  %v1858_v15 = vld [vmem:[#allocation7 + $0x19a8] sm:$0xff] }
 0x313   :  { %5022 = vmatprep.subr.bf16.mxu1 %v5021_v23  ;;  %v1796_v23 = vld [vmem:[#allocation7 + $0x17b8] sm:$0xff]  ;;  %v5039_v27 = vpack.c.bf16 %v1787_v21, %v1779_v18  ;;  %v1851_v13 = vld [vmem:[#allocation7 + $0x1970] sm:$0xff]  ;;  %v1866_v18 = vld [vmem:[#allocation7 + $0x19e8] sm:$0xff]  ;;  %v4813_v60 = vpack.c.bf16 %v1914_v54, %v1906_v52 }
 0x314   :  { %v4801_v22 = vpack.c.bf16 %v1866_v18, %v1858_v15  ;;  %v1932_v15 = vld [vmem:[#allocation7 + $0x1bf8] sm:$0xff] }
 0x315   :  { %4768 = vmatpush1.bf16.msra.mxu0 %v4767_v29  ;;  %v1801_v29 = vld [vmem:[#allocation7 + $0x17e0] sm:$0xff]  ;;  %v1972_v52 = vld [vmem:[#allocation7 + $0x1d38] sm:$0xff] }
 0x316   :  { %5024 = vmatpush1.bf16.msra.mxu1 %v5023_v30  ;;  %4770 = vmatprep.subr.bf16.mxu0 %v4769_v31  ;;  %v1795_v30 = vld [vmem:[#allocation7 + $0x17b0] sm:$0xff]  ;;  %v5041_v31 = vpack.c.bf16 %v1804_v24, %v1796_v23  ;;  %v4787_v36 = vpack.c.bf16 %v1801_v29, %v1793_v50  ;;  %v1857_v23 = vld [vmem:[#allocation7 + $0x19a0] sm:$0xff]  ;;  %v1882_v50 = vld [vmem:[#allocation7 + $0x1a68] sm:$0xff] }
 0x317   :  { %5026 = vmatprep.subr.bf16.mxu1 %v5025_v49  ;;  %v1812_v49 = vld [vmem:[#allocation7 + $0x1838] sm:$0xff]  ;;  %v5043_v39 = vpack.c.bf16 %v1803_v33, %v1795_v30  ;;  %v1865_v24 = vld [vmem:[#allocation7 + $0x19e0] sm:$0xff] }
 0x318   :  { %v1876_v29 = vld [vmem:[#allocation7 + $0x1a38] sm:$0xff] }
 0x319   :  { %4772 = vmatpush1.bf16.msra.mxu0 %v4771_v42  ;;  %v1817_v42 = vld [vmem:[#allocation7 + $0x1860] sm:$0xff]  ;;  %v1884_v30 = vld [vmem:[#allocation7 + $0x1a78] sm:$0xff] }
 0x31a   :  { %5028 = vmatpush1.bf16.msra.mxu1 %v5027_v43  ;;  %4774 = vmatprep.subr.bf16.mxu0 %v4773_v45  ;;  %v5045_v43 = vpack.c.bf16 %v1820_v11, %v1812_v49  ;;  %v1811_v45 = vld [vmem:[#allocation7 + $0x1830] sm:$0xff]  ;;  %v1881_v49 = vld [vmem:[#allocation7 + $0x1a60] sm:$0xff]  ;;  %v1980_v54 = vld [vmem:[#allocation7 + $0x1d78] sm:$0xff] }
 0x31b   :  { %5030 = vmatprep.subr.bf16.mxu1 %v5029_v47  ;;  %v4791_v47 = vpack.c.bf16 %v1817_v42, %v1809_v56  ;;  %v5047_v37 = vpack.c.bf16 %v1819_v20, %v1811_v45  ;;  %v1875_v11 = vld [vmem:[#allocation7 + $0x1a30] sm:$0xff]  ;;  %v1898_v56 = vld [vmem:[#allocation7 + $0x1ae8] sm:$0xff]  ;;  %v1892_v42 = vld [vmem:[#allocation7 + $0x1ab8] sm:$0xff]  ;;  %v4807_v45 = vpack.c.bf16 %v1881_v49, %v1873_v35 }
 0x31c   :  { %v1939_v35 = vld [vmem:[#allocation7 + $0x1c30] sm:$0xff] }
 0x31d   :  { %4776 = vmatpush1.bf16.msra.mxu0 %v4775_v55  ;;  %v1827_v55 = vld [vmem:[#allocation7 + $0x18b0] sm:$0xff] }
 0x31e   :  { %5032 = vmatpush1.bf16.msra.mxu1 %v5031_v16  ;;  %4778 = vmatprep.subr.bf16.mxu0 %v4777_v57  ;;  %v4793_v16 = vpack.c.bf16 %v1834_v63, %v1826_v46  ;;  %v1835_v57 = vld [vmem:[#allocation7 + $0x18f0] sm:$0xff]  ;;  %v1889_v63 = vld [vmem:[#allocation7 + $0x1aa0] sm:$0xff] }
 0x31f   :  { %5034 = vmatprep.subr.bf16.mxu1 %v5033_v62  ;;  %v1844_v62 = vld [vmem:[#allocation7 + $0x1938] sm:$0xff]  ;;  %v5051_v2 = vpack.c.bf16 %v1835_v57, %v1827_v55 }
 0x320   :  { %v1908_v55 = vld [vmem:[#allocation7 + $0x1b38] sm:$0xff] }
 0x321   :  { %4780 = vmatpush1.bf16.msra.mxu0 %v4779_v8  ;;  %v1849_v8 = vld [vmem:[#allocation7 + $0x1960] sm:$0xff] }
 0x322   :  { %5036 = vmatpush1.bf16.msra.mxu1 %v5035_v9  ;;  %4782 = vmatprep.subr.bf16.mxu0 %v4781_v12  ;;  %v1843_v9 = vld [vmem:[#allocation7 + $0x1930] sm:$0xff]  ;;  %v5053_v12 = vpack.c.bf16 %v1852_v10, %v1844_v62  ;;  %v4799_v21 = vpack.c.bf16 %v1849_v8, %v1841_v7  ;;  %v1913_v62 = vld [vmem:[#allocation7 + $0x1b60] sm:$0xff]  ;;  %v1922_v7 = vld [vmem:[#allocation7 + $0x1ba8] sm:$0xff] }
 0x323   :  { %5038 = vmatprep.subr.bf16.mxu1 %v5037_v19  ;;  %v1860_v19 = vld [vmem:[#allocation7 + $0x19b8] sm:$0xff]  ;;  %v5055_v58 = vpack.c.bf16 %v1851_v13, %v1843_v9  ;;  %v1907_v10 = vld [vmem:[#allocation7 + $0x1b30] sm:$0xff]  ;;  %v1930_v8 = vld [vmem:[#allocation7 + $0x1be8] sm:$0xff] }
 0x324   :  { %v1924_v13 = vld [vmem:[#allocation7 + $0x1bb8] sm:$0xff] }
 0x325   :  { %4784 = vmatpush1.bf16.msra.mxu0 %v4783_v25  ;;  %v1859_v25 = vld [vmem:[#allocation7 + $0x19b0] sm:$0xff] }
 0x326   :  { %5040 = vmatpush1.bf16.msra.mxu1 %v5039_v27  ;;  %4786 = vmatprep.subr.bf16.mxu0 %v4785_v41  ;;  %v1874_v41 = vld [vmem:[#allocation7 + $0x1a28] sm:$0xff] }
 0x327   :  { %5042 = vmatprep.subr.bf16.mxu1 %v5041_v31  ;;  %v4803_v31 = vpack.c.bf16 %v1865_v24, %v1857_v23  ;;  %v4805_v34 = vpack.c.bf16 %v1882_v50, %v1874_v41  ;;  %v1923_v23 = vld [vmem:[#allocation7 + $0x1bb0] sm:$0xff]  ;;  %v5073_v24 = vpack.c.bf16 %v1932_v15, %v1924_v13  ;;  %v1940_v41 = vld [vmem:[#allocation7 + $0x1c38] sm:$0xff] }
 0x328   :  { %v1948_v50 = vld [vmem:[#allocation7 + $0x1c78] sm:$0xff] }
 0x329   :  { %4788 = vmatpush1.bf16.msra.mxu0 %v4787_v36  ;;  %v5061_v36 = vpack.c.bf16 %v1884_v30, %v1876_v29  ;;  %v5077_v49 = vpack.c.bf16 %v1948_v50, %v1940_v41 }
 0x32a   :  { %5044 = vmatpush1.bf16.msra.mxu1 %v5043_v39  ;;  %4790 = vmatprep.subr.bf16.mxu0 %v4789_v40  ;;  %v1883_v39 = vld [vmem:[#allocation7 + $0x1a70] sm:$0xff]  ;;  %v1890_v40 = vld [vmem:[#allocation7 + $0x1aa8] sm:$0xff] }
 0x32b   :  { %5046 = vmatprep.subr.bf16.mxu1 %v5045_v43  ;;  %v1900_v43 = vld [vmem:[#allocation7 + $0x1af8] sm:$0xff]  ;;  %v5063_v20 = vpack.c.bf16 %v1883_v39, %v1875_v11  ;;  %v4809_v46 = vpack.c.bf16 %v1898_v56, %v1890_v40  ;;  %v1947_v11 = vld [vmem:[#allocation7 + $0x1c70] sm:$0xff]  ;;  %v1962_v39 = vld [vmem:[#allocation7 + $0x1ce8] sm:$0xff] }
 0x32c   :  { %2878 = vmatmul.mubr.f32.vlgmr.msra.gmra.mrb[6].mxu0 %v5738_v53  ;;  %v5065_v51 = vpack.c.bf16 %v1900_v43, %v1892_v42  ;;  %v1956_v40 = vld [vmem:[#allocation7 + $0x1cb8] sm:$0xff]  ;;  %v5079_v43 = vpack.c.bf16 %v1947_v11, %v1939_v35  ;;  %v2011_v35 = vld [vmem:[#allocation7 + $0x1e70] sm:$0xff]  ;;  %v2026_v11 = vld [vmem:[#allocation7 + $0x1ee8] sm:$0xff] }
 0x32d   :  { %3162 = vmatmul.mubr.f32.vlgmr.msra.gmra.mrb[6].mxu1 %v5738_v53  ;;  %4792 = vmatpush1.bf16.msra.mxu0 %v4791_v47  ;;  %v1868_v53 = vld [vmem:[#allocation7 + $0x19f8] sm:$0xff]  ;;  %v1897_v47 = vld [vmem:[#allocation7 + $0x1ae0] sm:$0xff] }
 0x32e   :  { %2948 = vmatprep.mubr.f32.mxu0 %v5745_v28  ;;  %5048 = vmatpush1.bf16.msra.mxu1 %v5047_v37  ;;  %v5057_v27 = vpack.c.bf16 %v1868_v53, %v1860_v19  ;;  %v1899_v37 = vld [vmem:[#allocation7 + $0x1af0] sm:$0xff]  ;;  %v4811_v57 = vpack.c.bf16 %v1897_v47, %v1889_v63  ;;  %v1964_v56 = vld [vmem:[#allocation7 + $0x1cf8] sm:$0xff] }
 0x32f   :  { %3232 = vmatprep.mubr.f32.mxu1 %v5745_v28  ;;  %4794 = vmatprep.subr.bf16.mxu0 %v4793_v16  ;;  %v1867_v28 = vld [vmem:[#allocation7 + $0x19f0] sm:$0xff]  ;;  %v1916_v16 = vld [vmem:[#allocation7 + $0x1b78] sm:$0xff]  ;;  %v5067_v6 = vpack.c.bf16 %v1899_v37, %v1891_v48  ;;  %v5081_v47 = vpack.c.bf16 %v1964_v56, %v1956_v40  ;;  %v1978_v37 = vld [vmem:[#allocation7 + $0x1d68] sm:$0xff] }
 0x330   :  { %5050 = vmatprep.subr.bf16.mxu1 %v5049_v61  ;;  %v5059_v33 = vpack.c.bf16 %v1867_v28, %v1859_v25  ;;  %v1905_v61 = vld [vmem:[#allocation7 + $0x1b20] sm:$0xff]  ;;  %v1931_v25 = vld [vmem:[#allocation7 + $0x1bf0] sm:$0xff]  ;;  %v1946_v28 = vld [vmem:[#allocation7 + $0x1c68] sm:$0xff] }
 0x331   :  { %4796 = vmatpush1.bf16.msra.mxu0 %v4795_v1  ;;  %v4815_v19 = vpack.c.bf16 %v1913_v62, %v1905_v61  ;;  %v5075_v30 = vpack.c.bf16 %v1931_v25, %v1923_v23  ;;  %v1955_v63 = vld [vmem:[#allocation7 + $0x1cb0] sm:$0xff]  ;;  %v5085_v62 = vpack.c.bf16 %v1980_v54, %v1972_v52  ;;  %v2010_v25 = vld [vmem:[#allocation7 + $0x1e68] sm:$0xff]  ;;  %v5778_v52 = vld [vmem:[#allocation9] sm:$0xff] }
 0x332   :  { %5052 = vmatpush1.bf16.msra.mxu1 %v5051_v2  ;;  %4798 = vmatprep.subr.bf16.mxu0 %v4797_v3  ;;  %v5069_v2 = vpack.c.bf16 %v1916_v16, %v1908_v55  ;;  %v1915_v3 = vld [vmem:[#allocation7 + $0x1b70] sm:$0xff] }
 0x333   :  { %5054 = vmatprep.subr.bf16.mxu1 %v5053_v12  ;;  %v5071_v53 = vpack.c.bf16 %v1915_v3, %v1907_v10  ;;  %v1963_v48 = vld [vmem:[#allocation7 + $0x1cf0] sm:$0xff]  ;;  %v1994_v3 = vld [vmem:[#allocation7 + $0x1de8] sm:$0xff] }
 0x334   :  { %v5083_v16 = vpack.c.bf16 %v1963_v48, %v1955_v63  ;;  %v1971_v61 = vld [vmem:[#allocation7 + $0x1d30] sm:$0xff]  ;;  %v2042_v48 = vld [vmem:[#allocation7 + $0x1f68] sm:$0xff] }
 0x335   :  { %4800 = vmatpush1.bf16.msra.mxu0 %v4799_v21  ;;  %v4817_v21 = vpack.c.bf16 %v1930_v8, %v1922_v7  ;;  %v1979_v10 = vld [vmem:[#allocation7 + $0x1d70] sm:$0xff]  ;;  %v1988_v7 = vld [vmem:[#allocation7 + $0x1db8] sm:$0xff] }
 0x336   :  { %5056 = vmatpush1.bf16.msra.mxu1 %v5055_v58  ;;  %4802 = vmatprep.subr.bf16.mxu0 %v4801_v22  ;;  %v1921_v58 = vld [vmem:[#allocation7 + $0x1ba0] sm:$0xff]  ;;  %v1996_v8 = vld [vmem:[#allocation7 + $0x1df8] sm:$0xff]  ;;  %v5087_v15 = vpack.c.bf16 %v1979_v10, %v1971_v61  ;;  %v1995_v23 = vld [vmem:[#allocation7 + $0x1df0] sm:$0xff] }
 0x337   :  { %5058 = vmatprep.subr.bf16.mxu1 %v5057_v27  ;;  %v1929_v22 = vld [vmem:[#allocation7 + $0x1be0] sm:$0xff]  ;;  %v1938_v27 = vld [vmem:[#allocation7 + $0x1c28] sm:$0xff]  ;;  %v2027_v63 = vld [vmem:[#allocation7 + $0x1ef0] sm:$0xff] }
 0x338   :  { %v4819_v29 = vpack.c.bf16 %v1929_v22, %v1921_v58  ;;  %v1987_v58 = vld [vmem:[#allocation7 + $0x1db0] sm:$0xff]  ;;  %v5089_v22 = vpack.c.bf16 %v1996_v8, %v1988_v7  ;;  %v2050_v10 = vld [vmem:[#allocation7 + $0x1fa8] sm:$0xff]  ;;  %v2060_v7 = vld [vmem:[#allocation7 + $0x1ff8] sm:$0xff]  ;;  %v2070_v8 = vrot.slane %v5778_v52, %v5633_v44 }
 0x339   :  { %4804 = vmatpush1.bf16.msra.mxu0 %v4803_v31  ;;  %v4821_v31 = vpack.c.bf16 %v1946_v28, %v1938_v27  ;;  %v2004_v27 = vld [vmem:[#allocation7 + $0x1e38] sm:$0xff]  ;;  %v5091_v50 = vpack.c.bf16 %v1995_v23, %v1987_v58  ;;  %v2057_v58 = vld [vmem:[#allocation7 + $0x1fe0] sm:$0xff]  ;;  %v3312_v44 = vld [vmem:[#allocation10 + $0x188] sm:$0xff] }
 0x33a   :  { %5060 = vmatpush1.bf16.msra.mxu1 %v5059_v33  ;;  %4806 = vmatprep.subr.bf16.mxu0 %v4805_v34  ;;  %v1937_v33 = vld [vmem:[#allocation7 + $0x1c20] sm:$0xff]  ;;  %v2012_v28 = vld [vmem:[#allocation7 + $0x1e78] sm:$0xff] }
 0x33b   :  { %5062 = vmatprep.subr.bf16.mxu1 %v5061_v36  ;;  %v1945_v34 = vld [vmem:[#allocation7 + $0x1c60] sm:$0xff]  ;;  %v1954_v36 = vld [vmem:[#allocation7 + $0x1ca8] sm:$0xff] }
 0x33c   :  { %v4823_v42 = vpack.c.bf16 %v1945_v34, %v1937_v33  ;;  %v2003_v33 = vld [vmem:[#allocation7 + $0x1e30] sm:$0xff]  ;;  %v5093_v34 = vpack.c.bf16 %v2012_v28, %v2004_v27  ;;  %v3311_v28 = vld [vmem:[#allocation10 + $0x180] sm:$0xff] }
 0x33d   :  { %4808 = vmatpush1.bf16.msra.mxu0 %v4807_v45  ;;  %v4825_v45 = vpack.c.bf16 %v1962_v39, %v1954_v36  ;;  %v2020_v36 = vld [vmem:[#allocation7 + $0x1eb8] sm:$0xff]  ;;  %v5095_v56 = vpack.c.bf16 %v2011_v35, %v2003_v33  ;;  %v3280_v27 = vld [vmem:[#allocation10 + $0x88] sm:$0xff]  ;;  %v3295_v35 = vld [vmem:[#allocation10 + $0x100] sm:$0xff] }
 0x33e   :  { %5064 = vmatpush1.bf16.msra.mxu1 %v5063_v20  ;;  %4810 = vmatprep.subr.bf16.mxu0 %v4809_v46  ;;  %v1953_v20 = vld [vmem:[#allocation7 + $0x1ca0] sm:$0xff]  ;;  %v2028_v39 = vld [vmem:[#allocation7 + $0x1ef8] sm:$0xff]  ;;  %v3264_v33 = vld [vmem:[#allocation10 + $0x8] sm:$0xff] }
 0x33f   :  { %v5770_v1 = vpop.f32.mrb[4].mxu0  ;;  %5066 = vmatprep.subr.bf16.mxu1 %v5065_v51  ;;  %v1961_v46 = vld [vmem:[#allocation7 + $0x1ce0] sm:$0xff]  ;;  %v1970_v51 = vld [vmem:[#allocation7 + $0x1d28] sm:$0xff] }
 0x340   :  { %v5772_v9 = vpop.f32.mrb[4].mxu1  ;;  %v5774_v12 = vpop.f32.mrb[5].mxu0  ;;  %v4827_v55 = vpack.c.bf16 %v1961_v46, %v1953_v20  ;;  %v2019_v20 = vld [vmem:[#allocation7 + $0x1eb0] sm:$0xff]  ;;  %v5097_v46 = vpack.c.bf16 %v2028_v39, %v2020_v36  ;;  %v3282_v36 = vld [vmem:[#allocation10 + $0x98] sm:$0xff] }
 0x341   :  { %v5776_v18 = vpop.f32.mrb[5].mxu1  ;;  %4812 = vmatpush1.bf16.msra.mxu0 %v4811_v57  ;;  %v4829_v57 = vpack.c.bf16 %v1978_v37, %v1970_v51  ;;  %v2036_v51 = vld [vmem:[#allocation7 + $0x1f38] sm:$0xff] }
 0x342   :  { %5068 = vmatpush1.bf16.msra.mxu1 %v5067_v6  ;;  %4814 = vmatprep.subr.bf16.mxu0 %v4813_v60  ;;  %v1969_v6 = vld [vmem:[#allocation7 + $0x1d20] sm:$0xff]  ;;  %v2044_v37 = vld [vmem:[#allocation7 + $0x1f78] sm:$0xff] }
 0x343   :  { %5070 = vmatprep.subr.bf16.mxu1 %v5069_v2  ;;  %v1977_v60 = vld [vmem:[#allocation7 + $0x1d60] sm:$0xff]  ;;  %v1986_v2 = vld [vmem:[#allocation7 + $0x1da8] sm:$0xff]  ;;  %v5101_v61 = vpack.c.bf16 %v2044_v37, %v2036_v51 }
 0x344   :  { %v4831_v13 = vpack.c.bf16 %v1977_v60, %v1969_v6  ;;  %v2041_v6 = vld [vmem:[#allocation7 + $0x1f60] sm:$0xff]  ;;  %v2035_v60 = vld [vmem:[#allocation7 + $0x1f30] sm:$0xff]  ;;  %v3315_v37 = vld [vmem:[#allocation10 + $0x1a0] sm:$0xff] }
 0x345   :  { %4816 = vmatpush1.bf16.msra.mxu0 %v4815_v19  ;;  %v4833_v19 = vpack.c.bf16 %v1994_v3, %v1986_v2  ;;  %v2058_v2 = vld [vmem:[#allocation7 + $0x1fe8] sm:$0xff]  ;;  %v2052_v3 = vld [vmem:[#allocation7 + $0x1fb8] sm:$0xff] }
 0x346   :  { %5072 = vmatpush1.bf16.msra.mxu1 %v5071_v53  ;;  %4818 = vmatprep.subr.bf16.mxu0 %v4817_v21  ;;  %v1985_v53 = vld [vmem:[#allocation7 + $0x1da0] sm:$0xff]  ;;  %v5105_v23 = vpack.c.bf16 %v2060_v7, %v2052_v3  ;;  %v3300_v3 = vld [vmem:[#allocation10 + $0x128] sm:$0xff]  ;;  %v3285_v7 = vld [vmem:[#allocation10 + $0xb0] sm:$0xff] }
 0x347   :  { %5074 = vmatprep.subr.bf16.mxu1 %v5073_v24  ;;  %v1993_v21 = vld [vmem:[#allocation7 + $0x1de0] sm:$0xff]  ;;  %v2002_v24 = vld [vmem:[#allocation7 + $0x1e28] sm:$0xff] }
 0x348   :  { %v4835_v41 = vpack.c.bf16 %v1993_v21, %v1985_v53  ;;  %v4849_v53 = vpack.c.bf16 %v2058_v2, %v2050_v10  ;;  %v2049_v21 = vld [vmem:[#allocation7 + $0x1fa0] sm:$0xff]  ;;  %v3299_v10 = vld [vmem:[#allocation10 + $0x120] sm:$0xff] }
 0x349   :  { %4820 = vmatpush1.bf16.msra.mxu0 %v4819_v29  ;;  %v4837_v29 = vpack.c.bf16 %v2010_v25, %v2002_v24  ;;  %v2059_v24 = vld [vmem:[#allocation7 + $0x1ff0] sm:$0xff]  ;;  %v3279_v25 = vld [vmem:[#allocation10 + $0x80] sm:$0xff] }
 0x34a   :  { %5076 = vmatpush1.bf16.msra.mxu1 %v5075_v30  ;;  %4822 = vmatprep.subr.bf16.mxu0 %v4821_v31  ;;  %v2001_v30 = vld [vmem:[#allocation7 + $0x1e20] sm:$0xff] }
 0x34b   :  { %5078 = vmatprep.subr.bf16.mxu1 %v5077_v49  ;;  %v2009_v31 = vld [vmem:[#allocation7 + $0x1e60] sm:$0xff]  ;;  %v2018_v49 = vld [vmem:[#allocation7 + $0x1ea8] sm:$0xff] }
 0x34c   :  { %v4839_v40 = vpack.c.bf16 %v2009_v31, %v2001_v30  ;;  %v5109_v30 = vpack.c.bf16 %v3280_v27, %v3279_v25  ;;  %v3263_v31 = vld [vmem:[#allocation10] sm:$0xff]  ;;  %v3288_v27 = vld [vmem:[#allocation10 + $0xc8] sm:$0xff] }
 0x34d   :  { %4824 = vmatpush1.bf16.msra.mxu0 %v4823_v42  ;;  %v4841_v42 = vpack.c.bf16 %v2026_v11, %v2018_v49  ;;  %v3296_v49 = vld [vmem:[#allocation10 + $0x108] sm:$0xff]  ;;  %v3281_v11 = vld [vmem:[#allocation10 + $0x90] sm:$0xff]  ;;  %v3287_v25 = vld [vmem:[#allocation10 + $0xc0] sm:$0xff] }
 0x34e   :  { %5080 = vmatpush1.bf16.msra.mxu1 %v5079_v43  ;;  %4826 = vmatprep.subr.bf16.mxu0 %v4825_v45  ;;  %v2017_v43 = vld [vmem:[#allocation7 + $0x1ea0] sm:$0xff] }
 0x34f   :  { %5082 = vmatprep.subr.bf16.mxu1 %v5081_v47  ;;  %v2025_v45 = vld [vmem:[#allocation7 + $0x1ee0] sm:$0xff]  ;;  %v2034_v47 = vld [vmem:[#allocation7 + $0x1f28] sm:$0xff] }
 0x350   :  { %v4843_v54 = vpack.c.bf16 %v2025_v45, %v2017_v43  ;;  %v3265_v43 = vld [vmem:[#allocation10 + $0x10] sm:$0xff]  ;;  %v3266_v45 = vld [vmem:[#allocation10 + $0x18] sm:$0xff] }
 0x351   :  { %4828 = vmatpush1.bf16.msra.mxu0 %v4827_v55  ;;  %v5099_v55 = vpack.c.bf16 %v2027_v63, %v2019_v20  ;;  %v3297_v20 = vld [vmem:[#allocation10 + $0x110] sm:$0xff]  ;;  %v3298_v63 = vld [vmem:[#allocation10 + $0x118] sm:$0xff] }
 0x352   :  { %5084 = vmatpush1.bf16.msra.mxu1 %v5083_v16  ;;  %4830 = vmatprep.subr.bf16.mxu0 %v4829_v57  ;;  %v4845_v16 = vpack.c.bf16 %v2042_v48, %v2034_v47  ;;  %v2033_v57 = vld [vmem:[#allocation7 + $0x1f20] sm:$0xff]  ;;  %v3283_v47 = vld [vmem:[#allocation10 + $0xa0] sm:$0xff]  ;;  %v3284_v48 = vld [vmem:[#allocation10 + $0xa8] sm:$0xff] }
 0x353   :  { %5086 = vmatprep.subr.bf16.mxu1 %v5085_v62  ;;  %v2043_v62 = vld [vmem:[#allocation7 + $0x1f70] sm:$0xff] }
 0x355   :  { %4832 = vmatpush1.bf16.msra.mxu0 %v4831_v13  ;;  %v4847_v13 = vpack.c.bf16 %v2041_v6, %v2033_v57  ;;  %v5147_v6 = vpack.c.bf16 %v3298_v63, %v3297_v20  ;;  %v3291_v20 = vld [vmem:[#allocation10 + $0xe0] sm:$0xff] }
 0x356   :  { %5088 = vmatpush1.bf16.msra.mxu1 %v5087_v15  ;;  %4834 = vmatprep.subr.bf16.mxu0 %v4833_v19  ;;  %v2078_v15 = vrot.slane %v5778_v52, %v979_v38  ;;  %v5103_v19 = vpack.c.bf16 %v2043_v62, %v2035_v60  ;;  %v5117_v60 = vpack.c.bf16 %v3284_v48, %v3283_v47  ;;  %v3268_v62 = vld [vmem:[#allocation10 + $0x28] sm:$0xff]  ;;  %v3323_v63 = vld [vmem:[#allocation10 + $0x1e0] sm:$0xff] }
 0x357   :  { %5090 = vmatprep.subr.bf16.mxu1 %v5089_v22  ;;  %v2051_v22 = vld [vmem:[#allocation7 + $0x1fb0] sm:$0xff] }
 0x358   :  { %v5240_v38 = vadd.f32 %v5776_v18, %v2078_v15  ;;  %v5143_v18 = vpack.c.bf16 %v3296_v49, %v3295_v35  ;;  %v3289_v35 = vld [vmem:[#allocation10 + $0xd0] sm:$0xff]  ;;  %v3290_v49 = vld [vmem:[#allocation10 + $0xd8] sm:$0xff]  ;;  %v3324_v47 = vld [vmem:[#allocation10 + $0x1e8] sm:$0xff] }
 0x359   :  { %4836 = vmatpush1.bf16.msra.mxu0 %v4835_v41  ;;  %v5238_v41 = vadd.f32 %v5774_v12, %v2070_v8  ;;  %v3313_v12 = vld [vmem:[#allocation10 + $0x190] sm:$0xff]  ;;  %v3286_v8 = vld [vmem:[#allocation10 + $0xb8] sm:$0xff] }
 0x35a   :  { %5092 = vmatpush1.bf16.msra.mxu1 %v5091_v50  ;;  %4838 = vmatprep.subr.bf16.mxu0 %v4837_v29  ;;  %v4851_v50 = vpack.c.bf16 %v2057_v58, %v2049_v21  ;;  %v5107_v29 = vpack.c.bf16 %v2059_v24, %v2051_v22  ;;  %vm3242_vm10 = vcmp.gt.f32.partialorder %v5240_v38, 0.0  ;;  %v3269_v21 = vld [vmem:[#allocation10 + $0x30] sm:$0xff]  ;;  %v3270_v58 = vld [vmem:[#allocation10 + $0x38] sm:$0xff] }
 0x35b   :  { %5094 = vmatprep.subr.bf16.mxu1 %v5093_v34  ;;  %v5141_v34 = vpack.c.bf16 %v3312_v44, %v3311_v28  ;;  %v3248_v39 = vmul.f32 0.01, %v5238_v41  ;;  %vm3240_vm9 = vcmp.gt.f32.partialorder %v5238_v41, 0.0  ;;  %v3301_v22 = vld [vmem:[#allocation10 + $0x130] sm:$0xff]  ;;  %v3302_v24 = vld [vmem:[#allocation10 + $0x138] sm:$0xff]  ;;  %v3319_v28 = vld [vmem:[#allocation10 + $0x1c0] sm:$0xff] }
 0x35c   :  { %v3320_v44 = vld [vmem:[#allocation10 + $0x1c8] sm:$0xff] }
 0x35d   :  { %4840 = vmatpush1.bf16.msra.mxu0 %v4839_v40  ;;  %v5111_v40 = vpack.c.bf16 %v3264_v33, %v3263_v31  ;;  %v3303_v31 = vld [vmem:[#allocation10 + $0x140] sm:$0xff]  ;;  %v5157_v33 = vpack.c.bf16 %v3320_v44, %v3319_v28 }
 0x35e   :  { %5096 = vmatpush1.bf16.msra.mxu1 %v5095_v56  ;;  %4842 = vmatprep.subr.bf16.mxu0 %v4841_v42  ;;  %v3314_v56 = vld [vmem:[#allocation10 + $0x198] sm:$0xff]  ;;  %v3250_v42 = vmul.f32 0.01, %v5240_v38  ;;  %v3327_v44 = vld [vmem:[#allocation10 + $0x200] sm:$0xff] }
 0x35f   :  { %5098 = vmatprep.subr.bf16.mxu1 %v5097_v46  ;;  %v5113_v46 = vpack.c.bf16 %v3282_v36, %v3281_v11  ;;  %v5145_v51 = vpack.c.bf16 %v3314_v56, %v3313_v12  ;;  %v3321_v11 = vld [vmem:[#allocation10 + $0x1d0] sm:$0xff]  ;;  %v3322_v36 = vld [vmem:[#allocation10 + $0x1d8] sm:$0xff]  ;;  %v5129_v12 = vpack.c.bf16 %v3290_v49, %v3289_v35 }
 0x360   :  { %v3258_v57 = vsel %vm3242_vm10, %v5240_v38, %v3250_v42  ;;  %v5125_v38 = vpack.c.bf16 %v3288_v27, %v3287_v25  ;;  %v3273_v56 = vld [vmem:[#allocation10 + $0x50] sm:$0xff]  ;;  %v3274_v42 = vld [vmem:[#allocation10 + $0x58] sm:$0xff] }
 0x361   :  { %4844 = vmatpush1.bf16.msra.mxu0 %v4843_v54  ;;  %v3316_v54 = vld [vmem:[#allocation10 + $0x1a8] sm:$0xff]  ;;  %v5131_v48 = vpack.c.bf16 %v3274_v42, %v3273_v56  ;;  %v3362_v42 = vld [vmem:[#allocation10 + $0x318] sm:$0xff] }
 0x362   :  { %5100 = vmatpush1.bf16.msra.mxu1 %v5099_v55  ;;  %4846 = vmatprep.subr.bf16.mxu0 %v4845_v16  ;;  %v3256_v55 = vsel %vm3240_vm9, %v5238_v41, %v3248_v39  ;;  %v5115_v16 = vpack.c.bf16 %v3266_v45, %v3265_v43  ;;  %v5149_v2 = vpack.c.bf16 %v3316_v54, %v3315_v37  ;;  %v3306_v45 = vld [vmem:[#allocation10 + $0x158] sm:$0xff]  ;;  %v3275_v54 = vld [vmem:[#allocation10 + $0x60] sm:$0xff] }
 0x363   :  { %5102 = vmatprep.subr.bf16.mxu1 %v5101_v61  ;;  %v3267_v61 = vld [vmem:[#allocation10 + $0x20] sm:$0xff]  ;;  %v5123_v41 = vpack.c.bf16 %v3270_v58, %v3269_v21  ;;  %v5161_v43 = vpack.c.bf16 %v3322_v36, %v3321_v11  ;;  %v3310_v21 = vld [vmem:[#allocation10 + $0x178] sm:$0xff]  ;;  %v3329_v36 = vld [vmem:[#allocation10 + $0x210] sm:$0xff] }
 0x364   :  { %v5119_v15 = vpack.c.bf16 %v3268_v62, %v3267_v61  ;;  %v3293_v61 = vld [vmem:[#allocation10 + $0xf0] sm:$0xff]  ;;  %v3294_v62 = vld [vmem:[#allocation10 + $0xf8] sm:$0xff]  ;;  %v3343_v58 = vld [vmem:[#allocation10 + $0x280] sm:$0xff] }
 0x365   :  { %4848 = vmatpush1.bf16.msra.mxu0 %v4847_v13  ;;  %v3318_v13 = vld [vmem:[#allocation10 + $0x1b8] sm:$0xff] }
 0x366   :  { %5104 = vmatpush1.bf16.msra.mxu1 %v5103_v19  ;;  %4850 = vmatprep.subr.bf16.mxu0 %v4849_v53  ;;  %v5151_v19 = vpack.c.bf16 %v3300_v3, %v3299_v10  ;;  %v5121_v53 = vpack.c.bf16 %v3286_v8, %v3285_v7  ;;  %v2074_v10 = vrot.slane %v5778_v52, %v975_v0  ;;  %v3326_v3 = vld [vmem:[#allocation10 + $0x1f8] sm:$0xff] }
 0x367   :  { %5106 = vmatprep.subr.bf16.mxu1 %v5105_v23 }
 0x368   :  { %v5239_v0 = vadd.f32 %v5772_v9, %v2074_v10  ;;  %v3377_v9 = vld [vmem:[#allocation10 + $0x390] sm:$0xff] }
 0x369   :  { %4852 = vmatpush1.bf16.msra.mxu0 %v4851_v50  ;;  %v5155_v50 = vpack.c.bf16 %v3302_v24, %v3301_v22  ;;  %v3344_v22 = vld [vmem:[#allocation10 + $0x288] sm:$0xff] }
 0x36a   :  { %5108 = vmatpush1.bf16.msra.mxu1 %v5107_v29  ;;  %5110 = vmatprep.subr.bf16.mxu0 %v5109_v30  ;;  %v3271_v29 = vld [vmem:[#allocation10 + $0x40] sm:$0xff]  ;;  %v3272_v30 = vld [vmem:[#allocation10 + $0x48] sm:$0xff]  ;;  %v5173_v28 = vpack.c.bf16 %v3344_v22, %v3343_v58  ;;  %vm3241_vm12 = vcmp.gt.f32.partialorder %v5239_v0, 0.0 }
 0x36b   :  { %5142 = vmatprep.subr.bf16.mxu1 %v5141_v34  ;;  %v3304_v34 = vld [vmem:[#allocation10 + $0x148] sm:$0xff]  ;;  %v5127_v39 = vpack.c.bf16 %v3272_v30, %v3271_v29  ;;  %v3345_v30 = vld [vmem:[#allocation10 + $0x290] sm:$0xff] }
 0x36c   :  { %2949 = vmatmul.mubr.f32.vlgmr.msra.gmra.mrb[6].mxu0 %v5752_v26  ;;  %v3376_v24 = vld [vmem:[#allocation10 + $0x388] sm:$0xff] }
 0x36d   :  { %3233 = vmatmul.mubr.f32.vlgmr.msra.gmra.mrb[6].mxu1 %v5752_v26  ;;  %5112 = vmatpush3.bf16.msra.mxu0 %v5111_v40  ;;  %v3317_v26 = vld [vmem:[#allocation10 + $0x1b0] sm:$0xff]  ;;  %v5159_v40 = vpack.c.bf16 %v3304_v34, %v3303_v31  ;;  %v3360_v29 = vld [vmem:[#allocation10 + $0x308] sm:$0xff]  ;;  %v3346_v31 = vld [vmem:[#allocation10 + $0x298] sm:$0xff] }
 0x36e   :  { %3456 = vmatprep.mubr.f32.mxu0 %v3256_v55  ;;  %5144 = vmatpush3.bf16.msra.mxu1 %v5143_v18  ;;  %v5153_v23 = vpack.c.bf16 %v3318_v13, %v3317_v26  ;;  %v3305_v18 = vld [vmem:[#allocation10 + $0x150] sm:$0xff]  ;;  %v3276_v55 = vld [vmem:[#allocation10 + $0x68] sm:$0xff]  ;;  %v5137_v26 = vpack.c.bf16 %v3294_v62, %v3293_v61  ;;  %v3378_v34 = vld [vmem:[#allocation10 + $0x398] sm:$0xff]  ;;  %v5177_v11 = vpack.c.bf16 %v3346_v31, %v3345_v30 }
 0x36f   :  { %3526 = vmatprep.mubr.f32.mxu1 %v3258_v57  ;;  %5114 = vmatprep.subr.bf16.mxu0 %v5113_v46  ;;  %v3292_v46 = vld [vmem:[#allocation10 + $0xe8] sm:$0xff]  ;;  %v2066_v57 = vrot.slane %v5778_v52, %v5649_v59  ;;  %v5135_v7 = vpack.c.bf16 %v3276_v55, %v3275_v54  ;;  %v3277_v13 = vld [vmem:[#allocation10 + $0x70] sm:$0xff]  ;;  %v5209_v56 = vpack.c.bf16 %v3378_v34, %v3377_v9  ;;  %v3363_v54 = vld [vmem:[#allocation10 + $0x320] sm:$0xff] }
 0x370   :  { %5146 = vmatprep.subr.bf16.mxu1 %v5145_v51  ;;  %v5163_v51 = vpack.c.bf16 %v3306_v45, %v3305_v18  ;;  %v5133_v37 = vpack.c.bf16 %v3292_v46, %v3291_v20  ;;  %v3309_v59 = vld [vmem:[#allocation10 + $0x170] sm:$0xff]  ;;  %v3347_v18 = vld [vmem:[#allocation10 + $0x2a0] sm:$0xff]  ;;  %v3380_v46 = vld [vmem:[#allocation10 + $0x3a8] sm:$0xff] }
 0x371   :  { %5116 = vmatpush3.bf16.msra.mxu0 %v5115_v16  ;;  %v3307_v16 = vld [vmem:[#allocation10 + $0x160] sm:$0xff]  ;;  %v5171_v27 = vpack.c.bf16 %v3310_v21, %v3309_v59  ;;  %v3382_v61 = vld [vmem:[#allocation10 + $0x3b8] sm:$0xff]  ;;  %v3352_v59 = vld [vmem:[#allocation10 + $0x2c8] sm:$0xff] }
 0x372   :  { %5148 = vmatpush3.bf16.msra.mxu1 %v5147_v6  ;;  %5118 = vmatprep.subr.bf16.mxu0 %v5117_v60  ;;  %v5165_v6 = vpack.c.bf16 %v3324_v47, %v3323_v63  ;;  %v3308_v60 = vld [vmem:[#allocation10 + $0x168] sm:$0xff]  ;;  %v3379_v20 = vld [vmem:[#allocation10 + $0x3a0] sm:$0xff]  ;;  %v3337_v30 = vld [vmem:[#allocation10 + $0x250] sm:$0xff] }
 0x373   :  { %5150 = vmatprep.subr.bf16.mxu1 %v5149_v2  ;;  %v3325_v2 = vld [vmem:[#allocation10 + $0x1f0] sm:$0xff]  ;;  %v5167_v8 = vpack.c.bf16 %v3308_v60, %v3307_v16  ;;  %v5213_v55 = vpack.c.bf16 %v3380_v46, %v3379_v20  ;;  %v3364_v16 = vld [vmem:[#allocation10 + $0x328] sm:$0xff]  ;;  %v3338_v31 = vld [vmem:[#allocation10 + $0x258] sm:$0xff] }
 0x374   :  { %v3381_v60 = vld [vmem:[#allocation10 + $0x3b0] sm:$0xff]  ;;  %v5215_v10 = vpack.c.bf16 %v3364_v16, %v3363_v54  ;;  %v3370_v34 = vld [vmem:[#allocation10 + $0x358] sm:$0xff]  ;;  %v3372_v20 = vld [vmem:[#allocation10 + $0x368] sm:$0xff] }
 0x375   :  { %5120 = vmatpush3.bf16.msra.mxu0 %v5119_v15  ;;  %v3278_v15 = vld [vmem:[#allocation10 + $0x78] sm:$0xff]  ;;  %v3369_v9 = vld [vmem:[#allocation10 + $0x350] sm:$0xff] }
 0x376   :  { %5152 = vmatpush3.bf16.msra.mxu1 %v5151_v19  ;;  %5122 = vmatprep.subr.bf16.mxu0 %v5121_v53  ;;  %v5237_v19 = vadd.f32 %v5770_v1, %v2066_v57  ;;  %v5169_v53 = vpack.c.bf16 %v3326_v3, %v3325_v2  ;;  %v5139_v25 = vpack.c.bf16 %v3278_v15, %v3277_v13  ;;  %v3349_v57 = vld [vmem:[#allocation10 + $0x2b0] sm:$0xff]  ;;  %v3366_v13 = vld [vmem:[#allocation10 + $0x338] sm:$0xff]  ;;  %v3351_v15 = vld [vmem:[#allocation10 + $0x2c0] sm:$0xff] }
 0x377   :  { %5154 = vmatprep.subr.bf16.mxu1 %v5153_v23  ;;  %v3375_v23 = vld [vmem:[#allocation10 + $0x380] sm:$0xff]  ;;  %v3333_v3 = vld [vmem:[#allocation10 + $0x230] sm:$0xff]  ;;  %v5189_v22 = vpack.c.bf16 %v3352_v59, %v3351_v15 }
 0x378   :  { %v5205_v1 = vpack.c.bf16 %v3376_v24, %v3375_v23  ;;  %vm3239_vm11 = vcmp.gt.f32.partialorder %v5237_v19, 0.0  ;;  %v3336_v23 = vld [vmem:[#allocation10 + $0x248] sm:$0xff]  ;;  %v3367_v24 = vld [vmem:[#allocation10 + $0x340] sm:$0xff]  ;;  %v3341_v54 = vld [vmem:[#allocation10 + $0x270] sm:$0xff] }
 0x379   :  { %5124 = vmatpush3.bf16.msra.mxu0 %v5123_v41  ;;  %v3328_v41 = vld [vmem:[#allocation10 + $0x208] sm:$0xff] }
 0x37a   :  { %5156 = vmatpush3.bf16.msra.mxu1 %v5155_v50  ;;  %5126 = vmatprep.subr.bf16.mxu0 %v5125_v38  ;;  %v3359_v50 = vld [vmem:[#allocation10 + $0x300] sm:$0xff]  ;;  %v3247_v38 = vmul.f32 0.01, %v5237_v19  ;;  %v5175_v35 = vpack.c.bf16 %v3328_v41, %v3327_v44  ;;  %v3354_v44 = vld [vmem:[#allocation10 + $0x2d8] sm:$0xff]  ;;  %v3385_v41 = vld [vmem:[#allocation10 + $0x3d0] sm:$0xff] }
 0x37b   :  { %5158 = vmatprep.subr.bf16.mxu1 %v5157_v33  ;;  %v3249_v33 = vmul.f32 0.01, %v5239_v0  ;;  %v5207_v49 = vpack.c.bf16 %v3360_v29, %v3359_v50  ;;  %v3386_v50 = vld [vmem:[#allocation10 + $0x3d8] sm:$0xff] }
 0x37d   :  { %5128 = vmatpush3.bf16.msra.mxu0 %v5127_v39  ;;  %v3330_v39 = vld [vmem:[#allocation10 + $0x218] sm:$0xff]  ;;  %v3257_v45 = vsel %vm3241_vm12, %v5239_v0, %v3249_v33  ;;  %v3335_v0 = vld [vmem:[#allocation10 + $0x240] sm:$0xff]  ;;  %v5225_v33 = vpack.c.bf16 %v3386_v50, %v3385_v41 }
 0x37e   :  { %5160 = vmatpush3.bf16.msra.mxu1 %v5159_v40  ;;  %5130 = vmatprep.subr.bf16.mxu0 %v5129_v12  ;;  %v3361_v40 = vld [vmem:[#allocation10 + $0x310] sm:$0xff]  ;;  %v3255_v12 = vsel %vm3239_vm11, %v5237_v19, %v3247_v38  ;;  %v5179_v63 = vpack.c.bf16 %v3330_v39, %v3329_v36  ;;  %v3383_v19 = vld [vmem:[#allocation10 + $0x3c0] sm:$0xff]  ;;  %v5191_v38 = vpack.c.bf16 %v3336_v23, %v3335_v0  ;;  %v3356_v36 = vld [vmem:[#allocation10 + $0x2e8] sm:$0xff] }
 0x37f   :  { %5162 = vmatprep.subr.bf16.mxu1 %v5161_v43  ;;  %v3348_v43 = vld [vmem:[#allocation10 + $0x2a8] sm:$0xff]  ;;  %v5211_v47 = vpack.c.bf16 %v3362_v42, %v3361_v40  ;;  %v3387_v39 = vld [vmem:[#allocation10 + $0x3e0] sm:$0xff] }
 0x380   :  { %v3340_v42 = vld [vmem:[#allocation10 + $0x268] sm:$0xff]  ;;  %v3391_v23 = vld [vmem:[#allocation12] sm:$0x1] }
 0x381   :  { %5132 = vmatpush3.bf16.msra.mxu0 %v5131_v48  ;;  %v5181_v48 = vpack.c.bf16 %v3348_v43, %v3347_v18 }
 0x382   :  { %5164 = vmatpush3.bf16.msra.mxu1 %v5163_v51  ;;  %5134 = vmatprep.subr.bf16.mxu0 %v5133_v37  ;;  %v3331_v51 = vld [vmem:[#allocation10 + $0x220] sm:$0xff]  ;;  %v3332_v37 = vld [vmem:[#allocation10 + $0x228] sm:$0xff] }
 0x383   :  { %5166 = vmatprep.subr.bf16.mxu1 %v5165_v6  ;;  %v3350_v6 = vld [vmem:[#allocation10 + $0x2b8] sm:$0xff]  ;;  %v5183_v62 = vpack.c.bf16 %v3332_v37, %v3331_v51 }
 0x384   :  { %v5185_v2 = vpack.c.bf16 %v3350_v6, %v3349_v57  ;;  %v3390_v37 = vld [vmem:[#allocation10 + $0x3f8] sm:$0xff]  ;;  %v3373_v6 = vld [vmem:[#allocation10 + $0x370] sm:$0xff] }
 0x385   :  { %5136 = vmatpush3.bf16.msra.mxu0 %v5135_v7  ;;  %v3334_v7 = vld [vmem:[#allocation10 + $0x238] sm:$0xff] }
 0x386   :  { %5168 = vmatpush3.bf16.msra.mxu1 %v5167_v8  ;;  %5138 = vmatprep.subr.bf16.mxu0 %v5137_v26  ;;  %v3365_v8 = vld [vmem:[#allocation10 + $0x330] sm:$0xff]  ;;  %v5217_v26 = vpack.c.bf16 %v3382_v61, %v3381_v60  ;;  %v5187_v21 = vpack.c.bf16 %v3334_v7, %v3333_v3  ;;  %v3374_v60 = vld [vmem:[#allocation10 + $0x378] sm:$0xff]  ;;  %v2094_v3 = vrot.slane %v5778_v52, %v995_v17 }
 0x387   :  { %5170 = vmatprep.subr.bf16.mxu1 %v5169_v53  ;;  %v3384_v53 = vld [vmem:[#allocation10 + $0x3c8] sm:$0xff]  ;;  %v5219_v58 = vpack.c.bf16 %v3366_v13, %v3365_v8  ;;  %v5235_v61 = vpack.c.bf16 %v3374_v60, %v3373_v6 }
 0x389   :  { %5140 = vmatpush3.bf16.msra.mxu0 %v5139_v25  ;;  %v5221_v25 = vpack.c.bf16 %v3384_v53, %v3383_v19 }
 0x38a   :  { %5172 = vmatpush3.bf16.msra.mxu1 %v5171_v27  ;;  %5174 = vmatprep.subr.bf16.mxu0 %v5173_v28  ;;  %v3368_v27 = vld [vmem:[#allocation10 + $0x348] sm:$0xff]  ;;  %v3353_v28 = vld [vmem:[#allocation10 + $0x2d0] sm:$0xff] }
 0x38b   :  { %5206 = vmatprep.subr.bf16.mxu1 %v5205_v1  ;;  %v5223_v1 = vpack.c.bf16 %v3368_v27, %v3367_v24  ;;  %v5193_v29 = vpack.c.bf16 %v3354_v44, %v3353_v28 }
 0x38c   :  { %3457 = vmatmul.mubr.f32.vlgmr.msra.gmra.mrb[8].mxu0 %v3255_v12  ;;  %v3388_v12 = vld [vmem:[#allocation10 + $0x3e8] sm:$0xff] }
 0x38d   :  { %3527 = vmatmul.mubr.f32.vlgmr.msra.gmra.mrb[8].mxu1 %v3257_v45  ;;  %5176 = vmatpush3.bf16.msra.mxu0 %v5175_v35  ;;  %v5195_v35 = vpack.c.bf16 %v3338_v31, %v3337_v30  ;;  %v5229_v18 = vpack.c.bf16 %v3388_v12, %v3387_v39  ;;  %v3371_v45 = vld [vmem:[#allocation10 + $0x360] sm:$0xff] }
 0x38e   :  { %5208 = vmatpush3.bf16.msra.mxu1 %v5207_v49  ;;  %5178 = vmatprep.subr.bf16.mxu0 %v5177_v11  ;;  %v5227_v49 = vpack.c.bf16 %v3370_v34, %v3369_v9  ;;  %v3355_v11 = vld [vmem:[#allocation10 + $0x2e0] sm:$0xff]  ;;  %v5231_v46 = vpack.c.bf16 %v3372_v20, %v3371_v45 }
 0x38f   :  { %5210 = vmatprep.subr.bf16.mxu1 %v5209_v56  ;;  %v5197_v40 = vpack.c.bf16 %v3356_v36, %v3355_v11  ;;  %v3339_v56 = vld [vmem:[#allocation10 + $0x260] sm:$0xff] }
 0x390   :  { %v5199_v43 = vpack.c.bf16 %v3340_v42, %v3339_v56 }
 0x391   :  { %5180 = vmatpush3.bf16.msra.mxu0 %v5179_v63  ;;  %v3357_v63 = vld [vmem:[#allocation10 + $0x2f0] sm:$0xff] }
 0x392   :  { %5212 = vmatpush3.bf16.msra.mxu1 %v5211_v47  ;;  %5182 = vmatprep.subr.bf16.mxu0 %v5181_v48  ;;  %v3358_v47 = vld [vmem:[#allocation10 + $0x2f8] sm:$0xff]  ;;  %v3389_v48 = vld [vmem:[#allocation10 + $0x3f0] sm:$0xff] }
 0x393   :  { %5214 = vmatprep.subr.bf16.mxu1 %v5213_v55  ;;  %v5201_v51 = vpack.c.bf16 %v3358_v47, %v3357_v63  ;;  %v3342_v55 = vld [vmem:[#allocation10 + $0x278] sm:$0xff]  ;;  %v5233_v16 = vpack.c.bf16 %v3390_v37, %v3389_v48 }
 0x394   :  { %v5203_v57 = vpack.c.bf16 %v3342_v55, %v3341_v54 }
 0x395   :  { %5184 = vmatpush3.bf16.msra.mxu0 %v5183_v62  ;;  %v2082_v62 = vrot.slane %v5778_v52, %v983_v4 }
 0x396   :  { %5216 = vmatpush3.bf16.msra.mxu1 %v5215_v10  ;;  %5186 = vmatprep.subr.bf16.mxu0 %v5185_v2  ;;  %v2090_v10 = vrot.slane %v5778_v52, %v991_v5  ;;  %v2086_v2 = vrot.slane %v5778_v52, %v987_v14 }
 0x397   :  { %5218 = vmatprep.subr.bf16.mxu1 %v5217_v26 }
 0x399   :  { %5188 = vmatpush3.bf16.msra.mxu0 %v5187_v21 }
 0x39a   :  { %5220 = vmatpush3.bf16.msra.mxu1 %v5219_v58  ;;  %5190 = vmatprep.subr.bf16.mxu0 %v5189_v22 }
 0x39b   :  { %5222 = vmatprep.subr.bf16.mxu1 %v5221_v25 }
 0x39d   :  { %5192 = vmatpush3.bf16.msra.mxu0 %v5191_v38 }
 0x39e   :  { %5224 = vmatpush3.bf16.msra.mxu1 %v5223_v1  ;;  %5194 = vmatprep.subr.bf16.mxu0 %v5193_v29 }
 0x39f   :  { %5226 = vmatprep.subr.bf16.mxu1 %v5225_v33 }
 0x3a1   :  { %5196 = vmatpush3.bf16.msra.mxu0 %v5195_v35 }
 0x3a2   :  { %5228 = vmatpush3.bf16.msra.mxu1 %v5227_v49  ;;  %5198 = vmatprep.subr.bf16.mxu0 %v5197_v40 }
 0x3a3   :  { %5230 = vmatprep.subr.bf16.mxu1 %v5229_v18 }
 0x3a5   :  { %5200 = vmatpush3.bf16.msra.mxu0 %v5199_v43 }
 0x3a6   :  { %5232 = vmatpush3.bf16.msra.mxu1 %v5231_v46  ;;  %5202 = vmatprep.subr.bf16.mxu0 %v5201_v51 }
 0x3a7   :  { %5234 = vmatprep.subr.bf16.mxu1 %v5233_v16 }
 0x3a9   :  { %5204 = vmatpush3.bf16.msra.mxu0 %v5203_v57 }
 0x3aa   :  { %5236 = vmatpush3.bf16.msra.mxu1 %v5235_v61 }
 0x43f   :  { %v2950_v7 = vpop.f32.mrb[6].mxu0 }
 0x440   :  { %v5241_v8 = vadd.f32 %v2950_v7, %v2082_v62  ;;  %v3234_v26 = vpop.f32.mrb[6].mxu1  ;;  %v2952_v13 = vpop.f32.mrb[7].mxu0 }
 0x441   :  { %v5243_v15 = vadd.f32 %v3234_v26, %v2090_v10  ;;  %v5242_v59 = vadd.f32 %v2952_v13, %v2086_v2  ;;  %v3236_v19 = vpop.f32.mrb[7].mxu1 }
 0x442   :  { %v3251_v4 = vmul.f32 0.01, %v5241_v8  ;;  %v5244_v53 = vadd.f32 %v3236_v19, %v2094_v3  ;;  %vm3243_vm13 = vcmp.gt.f32.partialorder %v5241_v8, 0.0 }
 0x443   :  { %v3253_v21 = vmul.f32 0.01, %v5243_v15  ;;  %v3252_v5 = vmul.f32 0.01, %v5242_v59  ;;  %vm3244_vm14 = vcmp.gt.f32.partialorder %v5242_v59, 0.0  ;;  %vm3245_vm15 = vcmp.gt.f32.partialorder %v5243_v15, 0.0 }
 0x444   :  { %v3254_v58 = vmul.f32 0.01, %v5244_v53  ;;  %vm3246_vm0 = vcmp.gt.f32.partialorder %v5244_v53, 0.0  ;;  %v3259_v17 = vsel %vm3243_vm13, %v5241_v8, %v3251_v4 }
 0x445   :  { %v3260_v14 = vsel %vm3244_vm14, %v5242_v59, %v3252_v5  ;;  %v3261_v52 = vsel %vm3245_vm15, %v5243_v15, %v3253_v21 }
 0x446   :  { %3596 = vmatprep.mubr.f32.mxu0 %v3260_v14  ;;  %v3262_v32 = vsel %vm3246_vm0, %v5244_v53, %v3254_v58 }
 0x447   :  { %3666 = vmatprep.mubr.f32.mxu1 %v3262_v32  ;;  %3597 = vmatmul.mubr.f32.vlgmr.msra.gmra.mrb[10].mxu0 %v3259_v17 }
 0x448   :  { %3667 = vmatmul.mubr.f32.vlgmr.msra.gmra.mrb[10].mxu1 %v3261_v52 }
 0x45f   :  { %v3721_v22 = vpop.f32.mrb[8].mxu0 }
 0x460   :  { %v3756_v0 = vpop.f32.mrb[8].mxu1  ;;  %v3722_v24 = vpop.f32.mrb[9].mxu0 }
 0x461   :  { %v3723_v25 = vadd.f32 %v3722_v24, %v3721_v22  ;;  %v3757_v27 = vpop.f32.mrb[9].mxu1 }
 0x462   :  { %v3758_v28 = vadd.f32 %v3757_v27, %v3756_v0 }
 0x463   :  { %v3459_v44 = vadd.f32 %v3723_v25, %v3391_v23 }
 0x465   :  { %v3529_v41 = vadd.f32 %v3758_v28, %v3459_v44 }
 0x51a   :  { %v3791_v50 = vpop.f32.mrb[10].mxu0 }
 0x51b   :  { %v3826_v38 = vpop.f32.mrb[10].mxu1  ;;  %v3792_v1 = vpop.f32.mrb[11].mxu0 }
 0x51c   :  { %v3793_v29 = vadd.f32 %v3792_v1, %v3791_v50  ;;  %v3827_v30 = vpop.f32.mrb[11].mxu1 }
 0x51d   :  { %v3828_v31 = vadd.f32 %v3827_v30, %v3826_v38 }
 0x51e   :  { %v3599_v33 = vadd.f32 %v3793_v29, %v3529_v41 }
 0x520   :  { %v3669_v9 = vadd.f32 %v3828_v31, %v3599_v33 }
 0x522   :  { %3672 = vst [vmem:[%s5822_s9] sm:$0x1] %v3669_v9 }
 0x523   :  { %3677 = vsyncpa [#allocation3], 1 }
 0x524   :  { %3678 = vsyncpa [#allocation5], 1 }
 0x525   :  { %3679 = vsyncpa [#allocation8], 1 }
 0x526   :  { %3680 = vsyncpa [#allocation11], 1 }

</bundles_post_ra>
